<compile_context>
chip_gen: v7x
topology: tpu7x:2x2x1
jax: 0.10.0
libtpu: 0.0.40
codegen_flags: <defaults>
</compile_context>

<pallas_src>
import math

import jax
import jax.numpy as jnp
from jax.experimental import pallas as pl
from jax.experimental.pallas import tpu as pltpu


# --------------------------------------------------------------------------- #
# Kernel 1: CustomMappingNetwork (3x LeakyReLU(0.2) + final linear)
# --------------------------------------------------------------------------- #
def _mapping_kernel(z_ref, w1_ref, b1_ref, w2_ref, b2_ref, w3_ref, b3_ref,
                    w4_ref, b4_ref, out_ref):
    f32 = jnp.float32
    bf16 = jnp.bfloat16

    def lrelu(v):
        return jnp.where(v > 0, v, 0.2 * v)

    def dense(v, w_ref, b_ref):
        return (jnp.dot(v.astype(bf16), w_ref[...],
                        preferred_element_type=f32) + b_ref[...])

    h = lrelu(dense(z_ref[...].astype(f32), w1_ref, b1_ref))
    h = lrelu(dense(h, w2_ref, b2_ref))
    h = lrelu(dense(h, w3_ref, b3_ref))
    out_ref[...] = dense(h, w4_ref, b4_ref)


def mapping_network_forward(z, mparams):
    """z: (B, z_dim) -> (frequencies, phase_shifts), each (B, out_dim // 2)."""
    (w1, b1), (w2, b2), (w3, b3), (w4, b4) = mparams
    B, z_dim = z.shape
    out_dim = int(w4.shape[1])

    # Batch tile: full batch if small, else 256 rows (sized for v7x 64 MiB VMEM).
    TB = B if B <= 256 else 256
    grid = (pl.cdiv(B, TB),)

    def const2(i):
        return (0, 0)

    in_specs = [pl.BlockSpec((TB, z_dim), lambda i: (i, 0))]
    for w, b in mparams:
        in_specs.append(pl.BlockSpec(tuple(w.shape), const2))   # VMEM-resident
        in_specs.append(pl.BlockSpec(tuple(b.shape), const2))
    out_specs = pl.BlockSpec((TB, out_dim), lambda i: (i, 0))

    flops = 2 * B * sum(int(w.shape[0]) * int(w.shape[1]) for w, _ in mparams)
    bytes_accessed = int(
        z.size * z.dtype.itemsize
        + B * out_dim * 4
        + sum(int(w.size) * w.dtype.itemsize + int(b.size) * b.dtype.itemsize
              for w, b in mparams))

    out = pl.pallas_call(
        _mapping_kernel,
        out_shape=jax.ShapeDtypeStruct((B, out_dim), jnp.float32),
        grid=grid,
        in_specs=in_specs,
        out_specs=out_specs,
        compiler_params=pltpu.CompilerParams(
            dimension_semantics=("parallel",)),
        cost_estimate=pl.CostEstimate(flops=int(flops), transcendentals=0,
                                      bytes_accessed=bytes_accessed),
    )(z, w1, b1, w2, b2, w3, b3, w4, b4)

    half = out_dim // 2
    # Lane-dense single output; split outside the kernel (free slice in XLA).
    return out[:, :half], out[:, half:]


# --------------------------------------------------------------------------- #
# Kernel 2: SIREN synthesis (8 FiLM layers + sigma + color FiLM + rgb head)
# --------------------------------------------------------------------------- #
def _tallsiren_kernel(x_ref, rd_ref, freq_ref, phase_ref,
                      w0_ref, b0_ref, wh_ref, bh_ref,
                      wf_ref, bf_ref,
                      wcs_rd_ref, wcs_x_ref, bcs_ref,
                      wcl_ref, bcl_ref,
                      rgb_ref, sigma_ref):
    f32 = jnp.float32
    bf16 = jnp.bfloat16
    H = w0_ref.shape[1]
    n_hidden = wh_ref.shape[0]          # 7 stacked hidden FiLM layers

    freq = freq_ref[...].astype(f32) * 15.0 + 30.0     # (1, 9H)
    phase = phase_ref[...].astype(f32)                 # (1, 9H)

    def film(v, w, b, lo):
        pre = jnp.dot(v.astype(bf16), w, preferred_element_type=f32) + b
        return jnp.sin(freq[:, lo:lo + H] * pre + phase[:, lo:lo + H])

    # FiLM stack.
    x = film(x_ref[...].astype(f32), w0_ref[...], b0_ref[...], 0)
    for i in range(n_hidden):
        x = film(x, wh_ref[i], bh_ref[i], (i + 1) * H)

    # sigma head.
    sigma_ref[...] = (jnp.dot(x.astype(bf16), wf_ref[...],
                              preferred_element_type=f32) + bf_ref[...])

    # color FiLM layer: concat([ray_directions, x]) @ Wcs  ==  rd@W_rd + x@W_x.
    pre = (jnp.dot(rd_ref[...].astype(bf16), wcs_rd_ref[...],
                   preferred_element_type=f32)
           + jnp.dot(x.astype(bf16), wcs_x_ref[...],
                     preferred_element_type=f32)
           + bcs_ref[...])
    lo = (n_hidden + 1) * H
    rgb_h = jnp.sin(freq[:, lo:lo + H] * pre + phase[:, lo:lo + H])

    # color linear + sigmoid.
    lin = (jnp.dot(rgb_h.astype(bf16), wcl_ref[...],
                   preferred_element_type=f32) + bcl_ref[...])
    rgb_ref[...] = 1.0 / (1.0 + jnp.exp(-lin))


def siren_synthesis_forward(x, ray_directions, frequencies, phase_shifts,
                            sparams):
    """x: (B, N, in_dim), ray_directions: (B, N, 3),
       frequencies/phase_shifts: (B, 9*H)  ->  (B, N, 4) = [rgb, sigma]."""
    (w0, b0, wh, bh, wf, bf_, wcs_rd, wcs_x, bcs, wcl, bcl) = sparams
    B, N, in_dim = x.shape
    H = int(w0.shape[1])
    FD = int(frequencies.shape[-1])     # 9 * H

    # Keep the per-batch freq/phase rows as (B, 1, FD) so the VMEM block
    # (1, FD) equals the full last-two dims (clean layout, no ragged sublane).
    freqs3 = frequencies.reshape(B, 1, FD)
    phases3 = phase_shifts.reshape(B, 1, FD)

    TN = N if N <= 512 else 512
    grid = (B, pl.cdiv(N, TN))

    def per_point(last):
        return pl.BlockSpec((None, TN, last), lambda b, n: (b, n, 0))

    def per_batch(shape):
        nd = len(shape)
        return pl.BlockSpec(tuple(shape), lambda b, n, _nd=nd: (0,) * _nd)

    in_specs = [
        per_point(in_dim),                                    # x
        per_point(3),                                         # ray_directions
        pl.BlockSpec((None, 1, FD), lambda b, n: (b, 0, 0)),  # frequencies
        pl.BlockSpec((None, 1, FD), lambda b, n: (b, 0, 0)),  # phase_shifts
        per_batch(w0.shape), per_batch(b0.shape),
        per_batch(wh.shape), per_batch(bh.shape),
        per_batch(wf.shape), per_batch(bf_.shape),
        per_batch(wcs_rd.shape), per_batch(wcs_x.shape), per_batch(bcs.shape),
        per_batch(wcl.shape), per_batch(bcl.shape),
    ]
    out_specs = (per_point(3), per_point(1))                  # rgb, sigma

    n_hidden = int(wh.shape[0])
    macs = (in_dim * H + n_hidden * H * H + H * 1 + 3 * H + H * H + H * 3)
    flops = 2 * B * N * macs
    transcendentals = B * N * ((n_hidden + 2) * H + 3)
    param_bytes = sum(int(p.size) * p.dtype.itemsize for p in sparams)
    bytes_accessed = int(x.size * 4 + ray_directions.size * 4
                         + 2 * B * FD * 4 + param_bytes + B * N * 4 * 4)

    rgb, sigma = pl.pallas_call(
        _tallsiren_kernel,
        out_shape=(jax.ShapeDtypeStruct((B, N, 3), jnp.float32),
                   jax.ShapeDtypeStruct((B, N, 1), jnp.float32)),
        grid=grid,
        in_specs=in_specs,
        out_specs=out_specs,
        compiler_params=pltpu.CompilerParams(
            dimension_semantics=("parallel", "parallel")),
        cost_estimate=pl.CostEstimate(flops=int(flops),
                                      transcendentals=int(transcendentals),
                                      bytes_accessed=bytes_accessed),
    )(x, ray_directions, freqs3, phases3,
      w0, b0, wh, bh, wf, bf_, wcs_rd, wcs_x, bcs, wcl, bcl)

    return jnp.concatenate([rgb, sigma], axis=-1)


def tallsiren_forward(inp, z, ray_directions, mparams, sparams):
    freqs, phases = mapping_network_forward(z, mparams)
    return siren_synthesis_forward(inp, ray_directions, freqs, phases, sparams)


# --------------------------------------------------------------------------- #
# Parameter initialization (matches the PyTorch init schemes)
# --------------------------------------------------------------------------- #
def init_mapping_params(key, z_dim, map_hidden_dim, map_output_dim):
    dims = [(z_dim, map_hidden_dim), (map_hidden_dim, map_hidden_dim),
            (map_hidden_dim, map_hidden_dim), (map_hidden_dim, map_output_dim)]
    gain = math.sqrt(2.0 / (1.0 + 0.2 ** 2))   # kaiming, a=0.2, leaky_relu
    params = []
    for li, (fan_in, fan_out) in enumerate(dims):
        key, kw, kb = jax.random.split(key, 3)
        std = gain / math.sqrt(fan_in)
        w = std * jax.random.normal(kw, (fan_in, fan_out), dtype=jnp.float32)
        if li == len(dims) - 1:
            w = w * 0.25
        bound = 1.0 / math.sqrt(fan_in)
        b = jax.random.uniform(kb, (1, fan_out), jnp.float32, -bound, bound)
        params.append((w.astype(jnp.bfloat16), b))
    return params


def _uniform_linear(key, fan_in, fan_out, w_bound):
    kw, kb = jax.random.split(key)
    w = jax.random.uniform(kw, (fan_in, fan_out), jnp.float32,
                           -w_bound, w_bound)
    b_bound = 1.0 / math.sqrt(fan_in)
    b = jax.random.uniform(kb, (1, fan_out), jnp.float32, -b_bound, b_bound)
    return w.astype(jnp.bfloat16), b


def init_siren_params(key, input_dim, hidden_dim, n_film=8):
    H = hidden_dim
    f25 = lambda fi: math.sqrt(6.0 / fi) / 25.0   # frequency_init(25)
    keys = jax.random.split(key, n_film + 4)

    # FiLM layer 0: first_layer_film_sine_init -> U(-1/in_dim, 1/in_dim)
    w0, b0 = _uniform_linear(keys[0], input_dim, H, 1.0 / input_dim)

    # FiLM layers 1..7 (stacked): frequency_init(25)
    wh_list, bh_list = [], []
    for i in range(n_film - 1):
        w, b = _uniform_linear(keys[1 + i], H, H, f25(H))
        wh_list.append(w)
        bh_list.append(b)
    wh = jnp.stack(wh_list, axis=0)              # (7, H, H) bf16
    bh = jnp.stack(bh_list, axis=0)              # (7, 1, H) f32

    # final sigma layer
    wf, bf_ = _uniform_linear(keys[n_film], H, 1, f25(H))

    # color FiLM layer over concat([ray_dirs, x]) -> split weight
    fan_in_cs = H + 3
    kw, kb = jax.random.split(keys[n_film + 1])
    wcs = jax.random.uniform(kw, (fan_in_cs, H), jnp.float32,
                             -f25(fan_in_cs), f25(fan_in_cs))
    bcs_bound = 1.0 / math.sqrt(fan_in_cs)
    bcs = jax.random.uniform(kb, (1, H), jnp.float32, -bcs_bound, bcs_bound)
    wcs_rd = wcs[:3].astype(jnp.bfloat16)        # ray_directions part (3, H)
    wcs_x = wcs[3:].astype(jnp.bfloat16)         # x part (H, H)

    # color linear (256 -> 3), sigmoid has no params
    wcl, bcl = _uniform_linear(keys[n_film + 2], H, 3, f25(H))

    return (w0, b0, wh, bh, wf, bf_, wcs_rd, wcs_x, bcs, wcl, bcl)


# --------------------------------------------------------------------------- #
# Pure-JAX reference (same bf16/f32 arithmetic as the kernels)
# --------------------------------------------------------------------------- #
def reference_forward(inp, z, rd, mparams, sparams):
    bf16, f32 = jnp.bfloat16, jnp.float32

    h = z
    for i, (w, b) in enumerate(mparams):
        h = jnp.dot(h.astype(bf16), w, preferred_element_type=f32) + b
        if i < len(mparams) - 1:
            h = jnp.where(h > 0, h, 0.2 * h)
    half = h.shape[-1] // 2
    freqs_raw, phases = h[:, :half], h[:, half:]

    (w0, b0, wh, bh, wf, bf_, wcs_rd, wcs_x, bcs, wcl, bcl) = sparams
    H = w0.shape[1]
    freq = freqs_raw * 15.0 + 30.0

    def dot(a, w):
        return jnp.einsum('bni,io->bno', a.astype(bf16), w,
                          preferred_element_type=f32)

    def film(v, w, b, lo):
        pre = dot(v, w) + b
        return jnp.sin(freq[:, None, lo:lo + H] * pre
                       + phases[:, None, lo:lo + H])

    x = film(inp, w0, b0, 0)
    for i in range(wh.shape[0]):
        x = film(x, wh[i], bh[i], (i + 1) * H)

    sigma = dot(x, wf) + bf_
    lo = (wh.shape[0] + 1) * H
    pre = dot(rd, wcs_rd) + dot(x, wcs_x) + bcs
    rgb_h = jnp.sin(freq[:, None, lo:lo + H] * pre
                    + phases[:, None, lo:lo + H])
    lin = dot(rgb_h, wcl) + bcl
    rgb = 1.0 / (1.0 + jnp.exp(-lin))
    return jnp.concatenate([rgb, sigma], axis=-1), freqs_raw, phases


# --------------------------------------------------------------------------- #
if __name__ == "__main__":
    B, N = 2, 128                      # batch of rays x points per ray batch
    INPUT_DIM, Z_DIM, HIDDEN = 2, 100, 256
    MAP_HIDDEN = 256
    N_FILM = 8
    MAP_OUT = (N_FILM + 1) * HIDDEN * 2   # 4608

    key = jax.random.PRNGKey(0)
    k_in, k_z, k_rd, k_map, k_siren = jax.random.split(key, 5)

    inp = jax.random.uniform(k_in, (B, N, INPUT_DIM), jnp.float32, -1.0, 1.0)
    z = jax.random.normal(k_z, (B, Z_DIM), jnp.float32)
    rd = jax.random.normal(k_rd, (B, N, 3), jnp.float32)
    rd = rd / jnp.linalg.norm(rd, axis=-1, keepdims=True)

    mparams = init_mapping_params(k_map, Z_DIM, MAP_HIDDEN, MAP_OUT)
    sparams = init_siren_params(k_siren, INPUT_DIM, HIDDEN, N_FILM)

    # Pallas forward
    freqs, phases = mapping_network_forward(z, mparams)
    out = siren_synthesis_forward(inp, rd, freqs, phases, sparams)
    out, freqs, phases = jax.block_until_ready((out, freqs, phases))

    # Reference
    ref_out, ref_freqs, ref_phases = reference_forward(inp, z, rd,
                                                       mparams, sparams)

    assert out.shape == (B, N, 4)
    assert freqs.shape == (B, (N_FILM + 1) * HIDDEN)
    assert phases.shape == (B, (N_FILM + 1) * HIDDEN)
    assert float(jnp.max(jnp.abs(freqs - ref_freqs))) < 5e-3
    assert float(jnp.max(jnp.abs(phases - ref_phases))) < 5e-3
    assert float(jnp.max(jnp.abs(out - ref_out))) < 2e-2
    assert bool(jnp.all(jnp.isfinite(out)))

    print("KERNEL_OK")
</pallas_src>

<mosaic_0001>
module attributes {stable_mosaic.version = 11 : i64} {
  func.func @_mapping_kernel(%arg0: i32, %arg1: memref<2x100xf32, #tpu.memory_space<vmem>>, %arg2: memref<100x256xbf16, #tpu.memory_space<vmem>>, %arg3: memref<1x256xf32, #tpu.memory_space<vmem>>, %arg4: memref<256x256xbf16, #tpu.memory_space<vmem>>, %arg5: memref<1x256xf32, #tpu.memory_space<vmem>>, %arg6: memref<256x256xbf16, #tpu.memory_space<vmem>>, %arg7: memref<1x256xf32, #tpu.memory_space<vmem>>, %arg8: memref<256x4608xbf16, #tpu.memory_space<vmem>>, %arg9: memref<1x4608xf32, #tpu.memory_space<vmem>>, %arg10: memref<2x4608xf32, #tpu.memory_space<vmem>>) attributes {dimension_semantics = [#tpu.dimension_semantics<parallel>], iteration_bounds = array<i64: 1>, scalar_prefetch = 0 : i64, scratch_operands = 0 : i64, tpu.core_type = #tpu.core_type<tc>, window_params = [{transform_indices = @transform_0, window_bounds = array<i64: 2, 100>}, {pipeline_mode = #tpu.pipeline_mode<synchronous>, transform_indices = @transform_1, window_bounds = array<i64: 100, 256>}, {pipeline_mode = #tpu.pipeline_mode<synchronous>, transform_indices = @transform_2, window_bounds = array<i64: 1, 256>}, {pipeline_mode = #tpu.pipeline_mode<synchronous>, transform_indices = @transform_3, window_bounds = array<i64: 256, 256>}, {pipeline_mode = #tpu.pipeline_mode<synchronous>, transform_indices = @transform_4, window_bounds = array<i64: 1, 256>}, {pipeline_mode = #tpu.pipeline_mode<synchronous>, transform_indices = @transform_5, window_bounds = array<i64: 256, 256>}, {pipeline_mode = #tpu.pipeline_mode<synchronous>, transform_indices = @transform_6, window_bounds = array<i64: 1, 256>}, {pipeline_mode = #tpu.pipeline_mode<synchronous>, transform_indices = @transform_7, window_bounds = array<i64: 256, 4608>}, {pipeline_mode = #tpu.pipeline_mode<synchronous>, transform_indices = @transform_8, window_bounds = array<i64: 1, 4608>}, {transform_indices = @transform_9, window_bounds = array<i64: 2, 4608>}]} {
    %c0 = arith.constant 0 : index
    %c0_0 = arith.constant 0 : index
    %0 = vector.load %arg1[%c0, %c0_0] : memref<2x100xf32, #tpu.memory_space<vmem>>, vector<2x100xf32>
    %1 = arith.truncf %0 : vector<2x100xf32> to vector<2x100xbf16>
    %c0_1 = arith.constant 0 : index
    %c0_2 = arith.constant 0 : index
    %2 = vector.load %arg2[%c0_1, %c0_2] : memref<100x256xbf16, #tpu.memory_space<vmem>>, vector<100x256xbf16>
    %cst = arith.constant dense<0.000000e+00> : vector<2x256xf32>
    %3 = tpu.matmul %1, %2, %cst {dimension_numbers = #tpu.dot_dimension_numbers<[1], [0], [0], [1], [0, 0, 1, 1], [], []>} : vector<2x100xbf16>, vector<100x256xbf16>, vector<2x256xf32> -> vector<2x256xf32>
    %c0_3 = arith.constant 0 : index
    %c0_4 = arith.constant 0 : index
    %4 = vector.load %arg3[%c0_3, %c0_4] : memref<1x256xf32, #tpu.memory_space<vmem>>, vector<1x256xf32>
    %5 = vector.broadcast %4 : vector<1x256xf32> to vector<2x256xf32>
    %6 = arith.addf %3, %5 : vector<2x256xf32>
    %cst_5 = arith.constant 0.000000e+00 : f32
    %7 = vector.broadcast %cst_5 : f32 to vector<2x256xf32>
    %8 = arith.cmpf ogt, %6, %7 : vector<2x256xf32>
    %cst_6 = arith.constant 2.000000e-01 : f32
    %9 = vector.broadcast %cst_6 : f32 to vector<2x256xf32>
    %10 = arith.mulf %9, %6 : vector<2x256xf32>
    %11 = arith.select %8, %6, %10 : vector<2x256xi1>, vector<2x256xf32>
    %12 = arith.truncf %11 : vector<2x256xf32> to vector<2x256xbf16>
    %c0_7 = arith.constant 0 : index
    %c0_8 = arith.constant 0 : index
    %13 = vector.load %arg4[%c0_7, %c0_8] : memref<256x256xbf16, #tpu.memory_space<vmem>>, vector<256x256xbf16>
    %cst_9 = arith.constant dense<0.000000e+00> : vector<2x256xf32>
    %14 = tpu.matmul %12, %13, %cst_9 {dimension_numbers = #tpu.dot_dimension_numbers<[1], [0], [0], [1], [0, 0, 1, 1], [], []>} : vector<2x256xbf16>, vector<256x256xbf16>, vector<2x256xf32> -> vector<2x256xf32>
    %c0_10 = arith.constant 0 : index
    %c0_11 = arith.constant 0 : index
    %15 = vector.load %arg5[%c0_10, %c0_11] : memref<1x256xf32, #tpu.memory_space<vmem>>, vector<1x256xf32>
    %16 = vector.broadcast %15 : vector<1x256xf32> to vector<2x256xf32>
    %17 = arith.addf %14, %16 : vector<2x256xf32>
    %cst_12 = arith.constant 0.000000e+00 : f32
    %18 = vector.broadcast %cst_12 : f32 to vector<2x256xf32>
    %19 = arith.cmpf ogt, %17, %18 : vector<2x256xf32>
    %cst_13 = arith.constant 2.000000e-01 : f32
    %20 = vector.broadcast %cst_13 : f32 to vector<2x256xf32>
    %21 = arith.mulf %20, %17 : vector<2x256xf32>
    %22 = arith.select %19, %17, %21 : vector<2x256xi1>, vector<2x256xf32>
    %23 = arith.truncf %22 : vector<2x256xf32> to vector<2x256xbf16>
    %c0_14 = arith.constant 0 : index
    %c0_15 = arith.constant 0 : index
    %24 = vector.load %arg6[%c0_14, %c0_15] : memref<256x256xbf16, #tpu.memory_space<vmem>>, vector<256x256xbf16>
    %cst_16 = arith.constant dense<0.000000e+00> : vector<2x256xf32>
    %25 = tpu.matmul %23, %24, %cst_16 {dimension_numbers = #tpu.dot_dimension_numbers<[1], [0], [0], [1], [0, 0, 1, 1], [], []>} : vector<2x256xbf16>, vector<256x256xbf16>, vector<2x256xf32> -> vector<2x256xf32>
    %c0_17 = arith.constant 0 : index
    %c0_18 = arith.constant 0 : index
    %26 = vector.load %arg7[%c0_17, %c0_18] : memref<1x256xf32, #tpu.memory_space<vmem>>, vector<1x256xf32>
    %27 = vector.broadcast %26 : vector<1x256xf32> to vector<2x256xf32>
    %28 = arith.addf %25, %27 : vector<2x256xf32>
    %cst_19 = arith.constant 0.000000e+00 : f32
    %29 = vector.broadcast %cst_19 : f32 to vector<2x256xf32>
    %30 = arith.cmpf ogt, %28, %29 : vector<2x256xf32>
    %cst_20 = arith.constant 2.000000e-01 : f32
    %31 = vector.broadcast %cst_20 : f32 to vector<2x256xf32>
    %32 = arith.mulf %31, %28 : vector<2x256xf32>
    %33 = arith.select %30, %28, %32 : vector<2x256xi1>, vector<2x256xf32>
    %34 = arith.truncf %33 : vector<2x256xf32> to vector<2x256xbf16>
    %c0_21 = arith.constant 0 : index
    %c0_22 = arith.constant 0 : index
    %35 = vector.load %arg8[%c0_21, %c0_22] : memref<256x4608xbf16, #tpu.memory_space<vmem>>, vector<256x4608xbf16>
    %cst_23 = arith.constant dense<0.000000e+00> : vector<2x4608xf32>
    %36 = tpu.matmul %34, %35, %cst_23 {dimension_numbers = #tpu.dot_dimension_numbers<[1], [0], [0], [1], [0, 0, 1, 1], [], []>} : vector<2x256xbf16>, vector<256x4608xbf16>, vector<2x4608xf32> -> vector<2x4608xf32>
    %c0_24 = arith.constant 0 : index
    %c0_25 = arith.constant 0 : index
    %37 = vector.load %arg9[%c0_24, %c0_25] : memref<1x4608xf32, #tpu.memory_space<vmem>>, vector<1x4608xf32>
    %38 = vector.broadcast %37 : vector<1x4608xf32> to vector<2x4608xf32>
    %39 = arith.addf %36, %38 : vector<2x4608xf32>
    %c0_26 = arith.constant 0 : index
    %c0_27 = arith.constant 0 : index
    %40 = vector.load %arg10[%c0_26, %c0_27] : memref<2x4608xf32, #tpu.memory_space<vmem>>, vector<2x4608xf32>
    tpu.vector_store %arg10[%c0_26, %c0_27], %39 {strides = array<i32>} : memref<2x4608xf32, #tpu.memory_space<vmem>>, vector<2x4608xf32>,
    return
  }
  func.func @transform_0(%arg0: i32) -> (i32, i32) {
    %c0_i32 = arith.constant 0 : i32
    %c0_i32_0 = arith.constant 0 : i32
    return %arg0, %c0_i32 : i32, i32
  }
  func.func @transform_1(%arg0: i32) -> (i32, i32) {
    %c0_i32 = arith.constant 0 : i32
    %c0_i32_0 = arith.constant 0 : i32
    %c0_i32_1 = arith.constant 0 : i32
    return %c0_i32, %c0_i32_0 : i32, i32
  }
  func.func @transform_2(%arg0: i32) -> (i32, i32) {
    %c0_i32 = arith.constant 0 : i32
    %c0_i32_0 = arith.constant 0 : i32
    %c0_i32_1 = arith.constant 0 : i32
    return %c0_i32, %c0_i32_0 : i32, i32
  }
  func.func @transform_3(%arg0: i32) -> (i32, i32) {
    %c0_i32 = arith.constant 0 : i32
    %c0_i32_0 = arith.constant 0 : i32
    %c0_i32_1 = arith.constant 0 : i32
    return %c0_i32, %c0_i32_0 : i32, i32
  }
  func.func @transform_4(%arg0: i32) -> (i32, i32) {
    %c0_i32 = arith.constant 0 : i32
    %c0_i32_0 = arith.constant 0 : i32
    %c0_i32_1 = arith.constant 0 : i32
    return %c0_i32, %c0_i32_0 : i32, i32
  }
  func.func @transform_5(%arg0: i32) -> (i32, i32) {
    %c0_i32 = arith.constant 0 : i32
    %c0_i32_0 = arith.constant 0 : i32
    %c0_i32_1 = arith.constant 0 : i32
    return %c0_i32, %c0_i32_0 : i32, i32
  }
  func.func @transform_6(%arg0: i32) -> (i32, i32) {
    %c0_i32 = arith.constant 0 : i32
    %c0_i32_0 = arith.constant 0 : i32
    %c0_i32_1 = arith.constant 0 : i32
    return %c0_i32, %c0_i32_0 : i32, i32
  }
  func.func @transform_7(%arg0: i32) -> (i32, i32) {
    %c0_i32 = arith.constant 0 : i32
    %c0_i32_0 = arith.constant 0 : i32
    %c0_i32_1 = arith.constant 0 : i32
    return %c0_i32, %c0_i32_0 : i32, i32
  }
  func.func @transform_8(%arg0: i32) -> (i32, i32) {
    %c0_i32 = arith.constant 0 : i32
    %c0_i32_0 = arith.constant 0 : i32
    %c0_i32_1 = arith.constant 0 : i32
    return %c0_i32, %c0_i32_0 : i32, i32
  }
  func.func @transform_9(%arg0: i32) -> (i32, i32) {
    %c0_i32 = arith.constant 0 : i32
    %c0_i32_0 = arith.constant 0 : i32
    return %arg0, %c0_i32 : i32, i32
  }
}

</mosaic_0001>

<bundles_post_ra>
// kernel: tpu_custom_call.1
= control target key start
LH: loop header
LB: loop body
LE: loop exit
PB: predicated region body
PF: predicated region fallthrough
CT: control target
= control target key end

     0   :  { %14 = vsyncpa [#allocation3], 0  ;;  %s7652_s0 = inlined_call_operand.hbm [shape: f32[2,100], index: 0, kind: input, shape index: {}]   ;;  %s7653_s1 = inlined_call_operand.hbm [shape: bf16[100,256], index: 1, kind: input, shape index: {}]   ;;  %s7654_s2 = inlined_call_operand.hbm [shape: f32[1,256], index: 2, kind: input, shape index: {}]   ;;  %s7655_s3 = inlined_call_operand.hbm [shape: bf16[256,256], index: 3, kind: input, shape index: {}]   ;;  %s7656_s4 = inlined_call_operand.hbm [shape: f32[1,256], index: 4, kind: input, shape index: {}]   ;;  %s7657_s5 = inlined_call_operand.hbm [shape: bf16[256,256], index: 5, kind: input, shape index: {}]   ;;  %s7658_s6 = inlined_call_operand.hbm [shape: f32[1,256], index: 6, kind: input, shape index: {}]   ;;  %s7659_s7 = inlined_call_operand.hbm [shape: bf16[256,4608], index: 7, kind: input, shape index: {}]   ;;  %s7660_s8 = inlined_call_operand.hbm [shape: f32[1,4608], index: 8, kind: input, shape index: {}]   ;;  %s7661_s9 = inlined_call_operand.hbm [shape: f32[2,4608], index: 9, kind: output, shape index: {}]  }
   0x1   :  { %15 = vsyncpa [#allocation6], 0 }
   0x2   :  { %16 = vsyncpa [#allocation9], 0 }
   0x3   :  { %17 = vsyncpa [#allocation12], 0 }
   0x4   :  { %18 = vsyncpa [#allocation15], 0 }
   0x5   :  { %19 = vsyncpa [#allocation4], 0  ;;  %s7298_s30 = smov [#allocation5]   ;;  %s7066_s13 = scalar_lea.hbm %s7653_s1, 1664 }
   0x6   :  { %s35_s10 = sshll.u32 %s7298_s30, 4  ;;  %p7067_p0 = scmp.ne.s32.totalorder %s7653_s1, %s7066_s13  ;;  %s36_s10 = int_to_ptr.vmem [resolvable:$true] %s35_s10 }
   0x7   :  { %p7070_p1 = scmp.lt.u32.totalorder %s7066_s13, %s7653_s1 }
   0x9   :  { %p7072_p2 = pnand %p7070_p1, %p7067_p0 }
   0xb   :  { %7075 = shalt.err (!%p7072_p2)
}
   0xc   :  { %s7076_s18 = scalar_lea.vmem %s36_s10, 1664  ;;  %p7081_p4 = scmp.lt.s32.totalorder %s36_s10, %s36_s10 }
   0xd   :  { %p7077_p3 = scmp.ne.s32.totalorder %s36_s10, %s7076_s18  ;;  %p7082_p5 = scmp.lt.s32.totalorder %s7076_s18, %s7076_s18 }
   0xf   :  { %p7083_p6 = por %p7082_p5, %p7081_p4 }
  0x11   :  { %p7084_p7 = pnand %p7083_p6, %p7077_p3 }
  0x13   :  { %7087 = shalt.err (!%p7084_p7)
}
  0x14   :  { %s7299_s19 = smov 128   ;;  %s7300_s20 = smov 8  }
  0x15   :  { %41 = dma.hbm_to_vmem [thread:$0]  %s7653_s1, 1664, %s36_s10, [#allocation6], %s7299_s19, %s7299_s19, %s7300_s20  }
  0x16   :  { %s7301_s23 = smov [#allocation8]   ;;  %s7302_s25 = smov [#allocation11]  }
  0x17   :  { %s57_s24 = sshll.u32 %s7301_s23, 4  ;;  %s79_s26 = sshll.u32 %s7302_s25, 4  ;;  %s58_s24 = int_to_ptr.vmem [resolvable:$true] %s57_s24  ;;  %s80_s26 = int_to_ptr.vmem [resolvable:$true] %s79_s26 }
  0x18   :  { %s7088_s29 = scalar_lea.hbm %s7655_s3, 4096 }
  0x19   :  { %p7089_p8 = scmp.ne.s32.totalorder %s7655_s3, %s7088_s29  ;;  %p7092_p9 = scmp.lt.u32.totalorder %s7088_s29, %s7655_s3 }
  0x1b   :  { %p7094_p10 = pnand %p7092_p9, %p7089_p8 }
  0x1d   :  { %7097 = shalt.err (!%p7094_p10)
}
  0x1e   :  { %s7098_s1 = scalar_lea.vmem %s58_s24, 4096  ;;  %p7103_p12 = scmp.lt.s32.totalorder %s58_s24, %s58_s24 }
  0x1f   :  { %p7099_p11 = scmp.ne.s32.totalorder %s58_s24, %s7098_s1  ;;  %p7104_p13 = scmp.lt.s32.totalorder %s7098_s1, %s7098_s1 }
  0x21   :  { %p7105_p0 = por %p7104_p13, %p7103_p12 }
  0x23   :  { %p7106_p1 = pnand %p7105_p0, %p7099_p11 }
  0x25   :  { %7109 = shalt.err (!%p7106_p1)
}
  0x26   :  { %63 = dma.hbm_to_vmem [thread:$0]  %s7655_s3, 4096, %s58_s24, [#allocation9], %s7299_s19, %s7299_s19, %s7300_s20  }
  0x27   :  { %s7110_s17 = scalar_lea.hbm %s7657_s5, 4096 }
  0x28   :  { %p7111_p2 = scmp.ne.s32.totalorder %s7657_s5, %s7110_s17  ;;  %p7114_p3 = scmp.lt.u32.totalorder %s7110_s17, %s7657_s5 }
  0x2a   :  { %p7116_p4 = pnand %p7114_p3, %p7111_p2 }
  0x2c   :  { %7119 = shalt.err (!%p7116_p4)
}
  0x2d   :  { %s7120_s25 = scalar_lea.vmem %s80_s26, 4096  ;;  %p7125_p6 = scmp.lt.s32.totalorder %s80_s26, %s80_s26 }
  0x2e   :  { %p7121_p5 = scmp.ne.s32.totalorder %s80_s26, %s7120_s25  ;;  %p7126_p7 = scmp.lt.s32.totalorder %s7120_s25, %s7120_s25 }
  0x30   :  { %p7127_p8 = por %p7126_p7, %p7125_p6 }
  0x32   :  { %p7128_p9 = pnand %p7127_p8, %p7121_p5 }
  0x34   :  { %7131 = shalt.err (!%p7128_p9)
}
  0x35   :  { %85 = dma.hbm_to_vmem [thread:$0]  %s7657_s5, 4096, %s80_s26, [#allocation12], %s7299_s19, %s7299_s19, %s7300_s20  }
  0x36   :  { %s7303_s27 = smov [#allocation14]   ;;  %s7132_s11 = scalar_lea.hbm %s7659_s7, 73728 }
  0x37   :  { %s101_s28 = sshll.u32 %s7303_s27, 4  ;;  %p7133_p10 = scmp.ne.s32.totalorder %s7659_s7, %s7132_s11  ;;  %s102_s28 = int_to_ptr.vmem [resolvable:$true] %s101_s28 }
  0x38   :  { %p7136_p11 = scmp.lt.u32.totalorder %s7132_s11, %s7659_s7 }
  0x3a   :  { %p7138_p12 = pnand %p7136_p11, %p7133_p10 }
  0x3c   :  { %7141 = shalt.err (!%p7138_p12)
}
  0x3d   :  { %s7142_s14 = scalar_lea.vmem %s102_s28, 73728  ;;  %p7147_p0 = scmp.lt.s32.totalorder %s102_s28, %s102_s28 }
  0x3e   :  { %p7143_p13 = scmp.ne.s32.totalorder %s102_s28, %s7142_s14  ;;  %p7148_p1 = scmp.lt.s32.totalorder %s7142_s14, %s7142_s14 }
  0x40   :  { %p7149_p2 = por %p7148_p1, %p7147_p0 }
  0x42   :  { %p7150_p3 = pnand %p7149_p2, %p7143_p13 }
  0x44   :  { %7153 = shalt.err (!%p7150_p3)
}
  0x45   :  { %s7304_s5 = smov 2304   ;;  %s7305_s19 = smov 144  }
  0x46   :  { %107 = dma.hbm_to_vmem [thread:$0]  %s7659_s7, 73728, %s102_s28, [#allocation15], %s7304_s5, %s7304_s5, %s7305_s19  }
  0x47   :  { %s7306_s15 = smov [#allocation2]   ;;  %s7307_s17 = smov [#allocation7]  }
  0x48   :  { %s26_s16 = sshll.u32 %s7306_s15, 4  ;;  %s48_s18 = sshll.u32 %s7307_s17, 4  ;;  %s27_s16 = int_to_ptr.vmem [resolvable:$true] %s26_s16  ;;  %s49_s18 = int_to_ptr.vmem [resolvable:$true] %s48_s18 }
  0x49   :  { %s7154_s23 = scalar_lea.hbm %s7652_s0, 32 }
  0x4a   :  { %p7155_p4 = scmp.ne.s32.totalorder %s7652_s0, %s7154_s23  ;;  %p7158_p5 = scmp.lt.u32.totalorder %s7154_s23, %s7652_s0 }
  0x4c   :  { %p7160_p6 = pnand %p7158_p5, %p7155_p4 }
  0x4e   :  { %7163 = shalt.err (!%p7160_p6)
}
  0x4f   :  { %s7164_s7 = scalar_lea.vmem %s27_s16, 32  ;;  %p7169_p8 = scmp.lt.s32.totalorder %s27_s16, %s27_s16 }
  0x50   :  { %p7165_p7 = scmp.ne.s32.totalorder %s27_s16, %s7164_s7  ;;  %p7170_p9 = scmp.lt.s32.totalorder %s7164_s7, %s7164_s7 }
  0x52   :  { %p7171_p10 = por %p7170_p9, %p7169_p8 }
  0x54   :  { %p7172_p11 = pnand %p7171_p10, %p7165_p7 }
  0x56   :  { %7175 = shalt.err (!%p7172_p11)
}
  0x57   :  { %29 = dma.hbm_to_vmem [thread:$0]  %s7652_s0, 32, %s27_s16, [#allocation3]  }
  0x58   :  { %s7176_s12 = scalar_lea.hbm %s7654_s2, 32 }
  0x59   :  { %p7177_p12 = scmp.ne.s32.totalorder %s7654_s2, %s7176_s12  ;;  %p7180_p13 = scmp.lt.u32.totalorder %s7176_s12, %s7654_s2 }
  0x5b   :  { %p7182_p0 = pnand %p7180_p13, %p7177_p12 }
  0x5d   :  { %7185 = shalt.err (!%p7182_p0)
}
  0x5e   :  { %s7186_s5 = scalar_lea.vmem %s49_s18, 32  ;;  %p7191_p2 = scmp.lt.s32.totalorder %s49_s18, %s49_s18 }
  0x5f   :  { %p7187_p1 = scmp.ne.s32.totalorder %s49_s18, %s7186_s5  ;;  %p7192_p3 = scmp.lt.s32.totalorder %s7186_s5, %s7186_s5 }
  0x61   :  { %p7193_p4 = por %p7192_p3, %p7191_p2 }
  0x63   :  { %p7194_p5 = pnand %p7193_p4, %p7187_p1 }
  0x65   :  { %7197 = shalt.err (!%p7194_p5)
}
  0x66   :  { %51 = dma.hbm_to_vmem [thread:$0]  %s7654_s2, 32, %s49_s18, [#allocation6]  }
  0x67   :  { %s7308_s20 = smov [#allocation10]   ;;  %s7309_s15 = smov [#allocation13]  }
  0x68   :  { %s70_s26 = sshll.u32 %s7308_s20, 4  ;;  %s92_s16 = sshll.u32 %s7309_s15, 4  ;;  %s71_s26 = int_to_ptr.vmem [resolvable:$true] %s70_s26  ;;  %s93_s16 = int_to_ptr.vmem [resolvable:$true] %s92_s16 }
  0x69   :  { %s7198_s22 = scalar_lea.hbm %s7656_s4, 32 }
  0x6a   :  { %p7199_p6 = scmp.ne.s32.totalorder %s7656_s4, %s7198_s22  ;;  %p7202_p7 = scmp.lt.u32.totalorder %s7198_s22, %s7656_s4 }
  0x6c   :  { %p7204_p8 = pnand %p7202_p7, %p7199_p6 }
  0x6e   :  { %7207 = shalt.err (!%p7204_p8)
}
  0x6f   :  { %s7208_s2 = scalar_lea.vmem %s71_s26, 32  ;;  %p7213_p10 = scmp.lt.s32.totalorder %s71_s26, %s71_s26 }
  0x70   :  { %p7209_p9 = scmp.ne.s32.totalorder %s71_s26, %s7208_s2  ;;  %p7214_p11 = scmp.lt.s32.totalorder %s7208_s2, %s7208_s2 }
  0x72   :  { %p7215_p12 = por %p7214_p11, %p7213_p10 }
  0x74   :  { %p7216_p13 = pnand %p7215_p12, %p7209_p9 }
  0x76   :  { %7219 = shalt.err (!%p7216_p13)
}
  0x77   :  { %73 = dma.hbm_to_vmem [thread:$0]  %s7656_s4, 32, %s71_s26, [#allocation9]  }
  0x78   :  { %s7220_s29 = scalar_lea.hbm %s7658_s6, 32 }
  0x79   :  { %p7221_p0 = scmp.ne.s32.totalorder %s7658_s6, %s7220_s29  ;;  %p7224_p1 = scmp.lt.u32.totalorder %s7220_s29, %s7658_s6 }
  0x7b   :  { %p7226_p2 = pnand %p7224_p1, %p7221_p0 }
  0x7d   :  { %7229 = shalt.err (!%p7226_p2)
}
  0x7e   :  { %s7230_s1 = scalar_lea.vmem %s93_s16, 32  ;;  %p7235_p4 = scmp.lt.s32.totalorder %s93_s16, %s93_s16 }
  0x7f   :  { %p7231_p3 = scmp.ne.s32.totalorder %s93_s16, %s7230_s1  ;;  %p7236_p5 = scmp.lt.s32.totalorder %s7230_s1, %s7230_s1 }
  0x81   :  { %p7237_p6 = por %p7236_p5, %p7235_p4 }
  0x83   :  { %p7238_p7 = pnand %p7237_p6, %p7231_p3 }
  0x85   :  { %7241 = shalt.err (!%p7238_p7)
}
  0x86   :  { %95 = dma.hbm_to_vmem [thread:$0]  %s7658_s6, 32, %s93_s16, [#allocation12]  }
  0x87   :  { %s7310_s14 = smov [#allocation16]   ;;  %s7242_s20 = scalar_lea.hbm %s7660_s8, 576 }
  0x88   :  { %s114_s5 = sshll.u32 %s7310_s14, 4  ;;  %p7243_p8 = scmp.ne.s32.totalorder %s7660_s8, %s7242_s20  ;;  %s115_s5 = int_to_ptr.vmem [resolvable:$true] %s114_s5 }
  0x89   :  { %p7246_p9 = scmp.lt.u32.totalorder %s7242_s20, %s7660_s8 }
  0x8b   :  { %p7248_p10 = pnand %p7246_p9, %p7243_p8 }
  0x8d   :  { %7251 = shalt.err (!%p7248_p10)
}
  0x8e   :  { %s7252_s22 = scalar_lea.vmem %s115_s5, 576  ;;  %p7257_p12 = scmp.lt.s32.totalorder %s115_s5, %s115_s5 }
  0x8f   :  { %p7253_p11 = scmp.ne.s32.totalorder %s115_s5, %s7252_s22  ;;  %p7258_p13 = scmp.lt.s32.totalorder %s7252_s22, %s7252_s22 }
  0x91   :  { %p7259_p0 = por %p7258_p13, %p7257_p12 }
  0x93   :  { %p7260_p1 = pnand %p7259_p0, %p7253_p11 }
  0x95   :  { %7263 = shalt.err (!%p7260_p1)
}
  0x96   :  { %117 = dma.hbm_to_vmem [thread:$0]  %s7660_s8, 576, %s115_s5, [#allocation15]  }
  0x97   :  { %7286 = dma.done.wait [#allocation3], 32  }
  0x98   :  { %7287 = vsyncadd [#allocation3], 4294967264 }
  0x99   :  { %7288 = dma.done.wait [#allocation6], 1696  }
  0x9a   :  { %7289 = vsyncadd [#allocation6], 4294965600 }
  0x9b   :  { %7290 = dma.done.wait [#allocation9], 4128  }
  0x9c   :  { %7291 = vsyncadd [#allocation9], 4294963168 }
  0x9d   :  { %7292 = dma.done.wait [#allocation12], 4128  }
  0x9e   :  { %7293 = vsyncadd [#allocation12], 4294963168 }
  0x9f   :  { %7294 = dma.done.wait [#allocation15], 74304  }
  0xa0   :  { %7295 = vsyncadd [#allocation15], 4294892992  ;;  %v7311_v0 = vmov 0   ;;  %v6086_v1 = vld [vmem:[#allocation5 + $0x4] ss:$8 sps:$4 sm:$0xff]   ;;  %vm242_vm0 = vcmask 1041408  }
  0xa1   :  { %281 = vmatprep.mubr.bf16.mxu0 %v7311_v0  ;;  %v6088_v2 = vld [vmem:[#allocation5] ss:$8 sps:$4 sm:$0xff]   ;;  %249 = vmatprep.subr.bf16.mxu0 %v6086_v1  ;;  %v6089_v3 = vld [vmem:[#allocation5 + $0x14] ss:$8 sps:$4 sm:$0xff]   ;;  %v6091_v4 = vld [vmem:[#allocation5 + $0x10] ss:$8 sps:$4 sm:$0xff]  }
  0xa2   :  { %250 = vmatpush1.bf16.msra.mxu0 %v6088_v2  ;;  %v6092_v5 = vld [vmem:[#allocation5 + $0x24] ss:$8 sps:$4 sm:$0xff]   ;;  %v6094_v6 = vld [vmem:[#allocation5 + $0x20] ss:$8 sps:$4 sm:$0xff]   ;;  %v6095_v7 = vld [vmem:[#allocation5 + $0x34] ss:$8 sps:$4 sm:$0xff]  }
  0xa3   :  { %251 = vmatprep.subr.bf16.mxu0 %v6089_v3  ;;  %v6106_v8 = vld [vmem:[#allocation8 + $0x4] ss:$8 sps:$4 sm:$0xff]   ;;  %v6108_v9 = vld [vmem:[#allocation8] ss:$8 sps:$4 sm:$0xff]   ;;  %v6109_v10 = vld [vmem:[#allocation8 + $0x14] ss:$8 sps:$4 sm:$0xff]  }
  0xa4   :  { %v6097_v11 = vld [vmem:[#allocation5 + $0x30] ss:$8 sps:$4 sm:$0xff]   ;;  %502 = vmatprep.subr.bf16.mxu1 %v6106_v8  ;;  %v6098_v12 = vld [vmem:[#allocation5 + $0x44] ss:$8 sps:$4 sm:$0xff]   ;;  %v6100_v15 = vld [vmem:[#allocation5 + $0x40] ss:$8 sps:$4 sm:$0xff]  }
  0xa5   :  { %503 = vmatpush1.bf16.msra.mxu1 %v6108_v9  ;;  %v6111_v13 = vld [vmem:[#allocation8 + $0x10] ss:$8 sps:$4 sm:$0xff]   ;;  %v6112_v14 = vld [vmem:[#allocation8 + $0x24] ss:$8 sps:$4 sm:$0xff]   ;;  %v6114_v17 = vld [vmem:[#allocation8 + $0x20] ss:$8 sps:$4 sm:$0xff]  }
  0xa6   :  { %252 = vmatpush1.bf16.msra.mxu0 %v6091_v4  ;;  %504 = vmatprep.subr.bf16.mxu1 %v6109_v10  ;;  %v6101_v16 = vld [vmem:[#allocation5 + $0x54] ss:$8 sps:$4 sm:$0xff]   ;;  %v160_v18 = vld [vmem:[#allocation5 + $0x60] sm:$0x33]  ;;  %v6103_v20 = vld [vmem:[#allocation5 + $0x50] ss:$8 sps:$4 sm:$0xff]  }
  0xa7   :  { %253 = vmatprep.subr.bf16.mxu0 %v6092_v5  ;;  %v6115_v19 = vld [vmem:[#allocation8 + $0x34] ss:$8 sps:$4 sm:$0xff]   ;;  %v5427_v21 = vcombine.high %v160_v18, %v160_v18  ;;  %v5426_v22 = vcombine.low %v160_v18, %v160_v18  ;;  %v6117_v23 = vld [vmem:[#allocation8 + $0x30] ss:$8 sps:$4 sm:$0xff]   ;;  %v6118_v24 = vld [vmem:[#allocation8 + $0x44] ss:$8 sps:$4 sm:$0xff]  }
  0xa8   :  { %v146_v25 = vld [vmem:[#allocation2] sm:$0x3]  ;;  %v6120_v27 = vld [vmem:[#allocation8 + $0x40] ss:$8 sps:$4 sm:$0xff]   ;;  %vm238_vm1 = vcmask 818176   ;;  %s7313_s8 = smov [#allocation17]  }
  0xa9   :  { %505 = vmatpush1.bf16.msra.mxu1 %v6111_v13  ;;  %v244_v26 = vsel %vm242_vm0, %v5426_v22, 0  ;;  %v6121_v28 = vld [vmem:[#allocation8 + $0x54] ss:$8 sps:$4 sm:$0xff]   ;;  %v147_v29 = vpack.c.bf16 %v146_v25, %v146_v25  ;;  %v6123_v30 = vld [vmem:[#allocation8 + $0x50] ss:$8 sps:$4 sm:$0xff]   ;;  %s5401_s23 = sshll.u32 %s7313_s8, 4  ;;  %s5402_s23 = int_to_ptr.vmem [resolvable:$true] %s5401_s23 }
  0xaa   :  { %254 = vmatpush1.bf16.msra.mxu0 %v6094_v6  ;;  %506 = vmatprep.subr.bf16.mxu1 %v6112_v14  ;;  %v6124_v31 = vld [vmem:[#allocation8 + $0x64] ss:$8 sps:$4 sm:$0xff]   ;;  %v6126_v32 = vld [vmem:[#allocation8 + $0x60] ss:$8 sps:$4 sm:$0xff]   ;;  %v6127_v33 = vld [vmem:[#allocation8 + $0x74] ss:$8 sps:$4 sm:$0xff]   ;;  %p7269_p3 = scmp.lt.s32.totalorder %s5402_s23, %s5402_s23 }
  0xab   :  { %255 = vmatprep.subr.bf16.mxu0 %v6095_v7  ;;  %v6129_v34 = vld [vmem:[#allocation8 + $0x70] ss:$8 sps:$4 sm:$0xff]   ;;  %v6130_v35 = vld [vmem:[#allocation8 + $0x84] ss:$8 sps:$4 sm:$0xff]   ;;  %v6132_v36 = vld [vmem:[#allocation8 + $0x80] ss:$8 sps:$4 sm:$0xff]  }
  0xac   :  { %v6133_v37 = vld [vmem:[#allocation8 + $0x94] ss:$8 sps:$4 sm:$0xff]   ;;  %v6135_v38 = vld [vmem:[#allocation8 + $0x90] ss:$8 sps:$4 sm:$0xff]   ;;  %v6136_v39 = vld [vmem:[#allocation8 + $0xa4] ss:$8 sps:$4 sm:$0xff]  }
  0xad   :  { %507 = vmatpush1.bf16.msra.mxu1 %v6114_v17  ;;  %v6138_v40 = vld [vmem:[#allocation8 + $0xa0] ss:$8 sps:$4 sm:$0xff]   ;;  %v6139_v41 = vld [vmem:[#allocation8 + $0xb4] ss:$8 sps:$4 sm:$0xff]   ;;  %v6141_v42 = vld [vmem:[#allocation8 + $0xb0] ss:$8 sps:$4 sm:$0xff]  }
  0xae   :  { %256 = vmatpush1.bf16.msra.mxu0 %v6097_v11  ;;  %508 = vmatprep.subr.bf16.mxu1 %v6115_v19  ;;  %v6142_v43 = vld [vmem:[#allocation8 + $0xc4] ss:$8 sps:$4 sm:$0xff]   ;;  %v6144_v44 = vld [vmem:[#allocation8 + $0xc0] ss:$8 sps:$4 sm:$0xff]   ;;  %v6145_v45 = vld [vmem:[#allocation8 + $0xd4] ss:$8 sps:$4 sm:$0xff]  }
  0xaf   :  { %257 = vmatprep.subr.bf16.mxu0 %v6098_v12  ;;  %v6147_v46 = vld [vmem:[#allocation8 + $0xd0] ss:$8 sps:$4 sm:$0xff]   ;;  %v6148_v47 = vld [vmem:[#allocation8 + $0xe4] ss:$8 sps:$4 sm:$0xff]   ;;  %v6150_v48 = vld [vmem:[#allocation8 + $0xe0] ss:$8 sps:$4 sm:$0xff]  }
  0xb0   :  { %v6151_v49 = vld [vmem:[#allocation8 + $0xf4] ss:$8 sps:$4 sm:$0xff]   ;;  %v6153_v50 = vld [vmem:[#allocation8 + $0xf0] ss:$8 sps:$4 sm:$0xff]   ;;  %v6154_v51 = vld [vmem:[#allocation11] ss:$8 sps:$4 sm:$0xff]  }
  0xb1   :  { %509 = vmatpush1.bf16.msra.mxu1 %v6117_v23  ;;  %v6156_v52 = vld [vmem:[#allocation11 + $0x4] ss:$8 sps:$4 sm:$0xff]   ;;  %v6159_v53 = vld [vmem:[#allocation11 + $0x14] ss:$8 sps:$4 sm:$0xff]   ;;  %v6157_v54 = vld [vmem:[#allocation11 + $0x10] ss:$8 sps:$4 sm:$0xff]  }
  0xb2   :  { %258 = vmatpush1.bf16.msra.mxu0 %v6100_v15  ;;  %510 = vmatprep.subr.bf16.mxu1 %v6118_v24  ;;  %v6162_v55 = vld [vmem:[#allocation11 + $0x24] ss:$8 sps:$4 sm:$0xff]   ;;  %v6160_v56 = vld [vmem:[#allocation11 + $0x20] ss:$8 sps:$4 sm:$0xff]   ;;  %v6165_v57 = vld [vmem:[#allocation11 + $0x34] ss:$8 sps:$4 sm:$0xff]   ;;  %v163_v15 = vlaneseq }
  0xb3   :  { %259 = vmatprep.subr.bf16.mxu0 %v6101_v16  ;;  %v6163_v58 = vld [vmem:[#allocation11 + $0x30] ss:$8 sps:$4 sm:$0xff]   ;;  %v6168_v59 = vld [vmem:[#allocation11 + $0x44] ss:$8 sps:$4 sm:$0xff]   ;;  %v6166_v60 = vld [vmem:[#allocation11 + $0x40] ss:$8 sps:$4 sm:$0xff]  }
  0xb4   :  { %v6171_v61 = vld [vmem:[#allocation11 + $0x54] ss:$8 sps:$4 sm:$0xff]   ;;  %v6169_v62 = vld [vmem:[#allocation11 + $0x50] ss:$8 sps:$4 sm:$0xff]   ;;  %v6174_v63 = vld [vmem:[#allocation11 + $0x64] ss:$8 sps:$4 sm:$0xff]  }
  0xb5   :  { %511 = vmatpush1.bf16.msra.mxu1 %v6120_v27  ;;  %v6172_v0 = vld [vmem:[#allocation11 + $0x60] ss:$8 sps:$4 sm:$0xff]   ;;  %v6177_v1 = vld [vmem:[#allocation11 + $0x74] ss:$8 sps:$4 sm:$0xff]   ;;  %v6175_v2 = vld [vmem:[#allocation11 + $0x70] ss:$8 sps:$4 sm:$0xff]  }
  0xb6   :  { %260 = vmatpush1.bf16.msra.mxu0 %v6103_v20  ;;  %512 = vmatprep.subr.bf16.mxu1 %v6121_v28  ;;  %v6180_v3 = vld [vmem:[#allocation11 + $0x84] ss:$8 sps:$4 sm:$0xff]   ;;  %v6178_v4 = vld [vmem:[#allocation11 + $0x80] ss:$8 sps:$4 sm:$0xff]   ;;  %v6183_v5 = vld [vmem:[#allocation11 + $0x94] ss:$8 sps:$4 sm:$0xff]  }
  0xb7   :  { %5428 = vmatprep.subr.msk.bf16.mxu0 %vm242_vm0, %v5427_v21  ;;  %v6181_v6 = vld [vmem:[#allocation11 + $0x90] ss:$8 sps:$4 sm:$0xff]   ;;  %v6186_v7 = vld [vmem:[#allocation11 + $0xa4] ss:$8 sps:$4 sm:$0xff]   ;;  %v6184_v8 = vld [vmem:[#allocation11 + $0xa0] ss:$8 sps:$4 sm:$0xff]  }
  0xb8   :  { %v6189_v9 = vld [vmem:[#allocation11 + $0xb4] ss:$8 sps:$4 sm:$0xff]   ;;  %v6187_v10 = vld [vmem:[#allocation11 + $0xb0] ss:$8 sps:$4 sm:$0xff]   ;;  %v6192_v11 = vld [vmem:[#allocation11 + $0xc4] ss:$8 sps:$4 sm:$0xff]  }
  0xb9   :  { %513 = vmatpush1.bf16.msra.mxu1 %v6123_v30  ;;  %v6190_v12 = vld [vmem:[#allocation11 + $0xc0] ss:$8 sps:$4 sm:$0xff]   ;;  %v6195_v13 = vld [vmem:[#allocation11 + $0xd4] ss:$8 sps:$4 sm:$0xff]   ;;  %v6193_v14 = vld [vmem:[#allocation11 + $0xd0] ss:$8 sps:$4 sm:$0xff]  }
  0xba   :  { %262 = vmatpush1.bf16.msra.mxu0 %v244_v26  ;;  %514 = vmatprep.subr.bf16.mxu1 %v6124_v31  ;;  %v7481_v16 = vshrl.u32 %v163_v15, 7  ;;  %v161_v17 = vld [vmem:[#allocation7] sm:$0x3]  ;;  %s7264_s25 = scalar_lea.vmem %s5402_s23, 1152 }
  0xbb   :  { %755 = vmatprep.subr.bf16.mxu0 %v6156_v52  ;;  %v6238_v52 = vld [vmem:[#allocation14 + $0x6c0] ss:$144 sps:$4 sm:$0xff]   ;;  %p7265_p2 = scmp.ne.s32.totalorder %s5402_s23, %s7264_s25  ;;  %p7270_p4 = scmp.lt.s32.totalorder %s7264_s25, %s7264_s25 }
  0xbc   :  { %v7484_v18 = vsub.s32 0, %v7481_v16  ;;  %v7487_v19 = vsub.s32 1, %v7481_v16 }
  0xbd   :  { %5429 = vmatmul.mubr.msk.bf16.vlgmr.msra.gmra.mrb[0].mxu0 %vm238_vm1, %v147_v29  ;;  %515 = vmatpush1.bf16.msra.mxu1 %v6126_v32  ;;  %p7271_p5 = por %p7270_p4, %p7269_p3 }
  0xbe   :  { %516 = vmatprep.subr.bf16.mxu1 %v6127_v33  ;;  %756 = vmatpush1.bf16.msra.mxu0 %v6154_v51  ;;  %v166_v20 = vrot.slane %v161_v17, %v7484_v18  ;;  %v170_v21 = vrot.slane %v161_v17, %v7487_v19  ;;  %v6240_v51 = vld [vmem:[#allocation14 + $0x6c4] ss:$144 sps:$4 sm:$0xff]  }
  0xbf   :  { %757 = vmatprep.subr.bf16.mxu0 %v6159_v53  ;;  %v6246_v53 = vld [vmem:[#allocation14 + $0x7e4] ss:$144 sps:$4 sm:$0xff]   ;;  %p7272_p6 = pnand %p7271_p5, %p7265_p2 }
  0xc1   :  { %517 = vmatpush1.bf16.msra.mxu1 %v6129_v34  ;;  %v6198_v34 = vld [vmem:[#allocation11 + $0xe4] ss:$8 sps:$4 sm:$0xff]  }
  0xc2   :  { %518 = vmatprep.subr.bf16.mxu1 %v6130_v35  ;;  %758 = vmatpush1.bf16.msra.mxu0 %v6157_v54  ;;  %v6196_v35 = vld [vmem:[#allocation11 + $0xe0] ss:$8 sps:$4 sm:$0xff]  }
  0xc3   :  { %759 = vmatprep.subr.bf16.mxu0 %v6162_v55  ;;  %v6244_v54 = vld [vmem:[#allocation14 + $0x7e0] ss:$144 sps:$4 sm:$0xff]   ;;  %v6252_v55 = vld [vmem:[#allocation14 + $0x904] ss:$144 sps:$4 sm:$0xff]  }
  0xc5   :  { %519 = vmatpush1.bf16.msra.mxu1 %v6132_v36  ;;  %v6201_v36 = vld [vmem:[#allocation11 + $0xf4] ss:$8 sps:$4 sm:$0xff]  }
  0xc6   :  { %520 = vmatprep.subr.bf16.mxu1 %v6133_v37  ;;  %760 = vmatpush1.bf16.msra.mxu0 %v6160_v56  ;;  %v6199_v37 = vld [vmem:[#allocation11 + $0xf0] ss:$8 sps:$4 sm:$0xff]  }
  0xc7   :  { %761 = vmatprep.subr.bf16.mxu0 %v6165_v57  ;;  %v6250_v56 = vld [vmem:[#allocation14 + $0x900] ss:$144 sps:$4 sm:$0xff]   ;;  %v6258_v57 = vld [vmem:[#allocation14 + $0xa24] ss:$144 sps:$4 sm:$0xff]  }
  0xc9   :  { %521 = vmatpush1.bf16.msra.mxu1 %v6135_v38  ;;  %v6202_v38 = vld [vmem:[#allocation14] ss:$144 sps:$4 sm:$0xff]  }
  0xca   :  { %522 = vmatprep.subr.bf16.mxu1 %v6136_v39  ;;  %762 = vmatpush1.bf16.msra.mxu0 %v6163_v58  ;;  %v6204_v39 = vld [vmem:[#allocation14 + $0x4] ss:$144 sps:$4 sm:$0xff]   ;;  %v6256_v58 = vld [vmem:[#allocation14 + $0xa20] ss:$144 sps:$4 sm:$0xff]  }
  0xcb   :  { %763 = vmatprep.subr.bf16.mxu0 %v6168_v59  ;;  %v6264_v59 = vld [vmem:[#allocation14 + $0xb44] ss:$144 sps:$4 sm:$0xff]  }
  0xcd   :  { %523 = vmatpush1.bf16.msra.mxu1 %v6138_v40  ;;  %v6207_v40 = vld [vmem:[#allocation14 + $0xc] ss:$144 sps:$4 sm:$0xff]  }
  0xce   :  { %524 = vmatprep.subr.bf16.mxu1 %v6139_v41  ;;  %764 = vmatpush1.bf16.msra.mxu0 %v6166_v60  ;;  %v6210_v41 = vld [vmem:[#allocation14 + $0x124] ss:$144 sps:$4 sm:$0xff]   ;;  %v6262_v60 = vld [vmem:[#allocation14 + $0xb40] ss:$144 sps:$4 sm:$0xff]  }
  0xcf   :  { %765 = vmatprep.subr.bf16.mxu0 %v6171_v61  ;;  %v6270_v61 = vld [vmem:[#allocation14 + $0xc64] ss:$144 sps:$4 sm:$0xff]  }
  0xd1   :  { %525 = vmatpush1.bf16.msra.mxu1 %v6141_v42  ;;  %v6208_v42 = vld [vmem:[#allocation14 + $0x120] ss:$144 sps:$4 sm:$0xff]  }
  0xd2   :  { %526 = vmatprep.subr.bf16.mxu1 %v6142_v43  ;;  %766 = vmatpush1.bf16.msra.mxu0 %v6169_v62  ;;  %v6216_v43 = vld [vmem:[#allocation14 + $0x244] ss:$144 sps:$4 sm:$0xff]   ;;  %v6268_v62 = vld [vmem:[#allocation14 + $0xc60] ss:$144 sps:$4 sm:$0xff]  }
  0xd3   :  { %767 = vmatprep.subr.bf16.mxu0 %v6174_v63  ;;  %v6276_v63 = vld [vmem:[#allocation14 + $0xd84] ss:$144 sps:$4 sm:$0xff]  }
  0xd5   :  { %527 = vmatpush1.bf16.msra.mxu1 %v6144_v44  ;;  %v6214_v44 = vld [vmem:[#allocation14 + $0x240] ss:$144 sps:$4 sm:$0xff]  }
  0xd6   :  { %528 = vmatprep.subr.bf16.mxu1 %v6145_v45  ;;  %768 = vmatpush1.bf16.msra.mxu0 %v6172_v0  ;;  %v6222_v45 = vld [vmem:[#allocation14 + $0x364] ss:$144 sps:$4 sm:$0xff]   ;;  %v6274_v0 = vld [vmem:[#allocation14 + $0xd80] ss:$144 sps:$4 sm:$0xff]  }
  0xd7   :  { %769 = vmatprep.subr.bf16.mxu0 %v6177_v1  ;;  %v6282_v1 = vld [vmem:[#allocation14 + $0xea4] ss:$144 sps:$4 sm:$0xff]  }
  0xd9   :  { %529 = vmatpush1.bf16.msra.mxu1 %v6147_v46  ;;  %v6220_v46 = vld [vmem:[#allocation14 + $0x360] ss:$144 sps:$4 sm:$0xff]  }
  0xda   :  { %530 = vmatprep.subr.bf16.mxu1 %v6148_v47  ;;  %770 = vmatpush1.bf16.msra.mxu0 %v6175_v2  ;;  %v6228_v47 = vld [vmem:[#allocation14 + $0x484] ss:$144 sps:$4 sm:$0xff]   ;;  %v6280_v2 = vld [vmem:[#allocation14 + $0xea0] ss:$144 sps:$4 sm:$0xff]  }
  0xdb   :  { %771 = vmatprep.subr.bf16.mxu0 %v6180_v3  ;;  %v330_v3 = vld [vmem:[#allocation10] sm:$0x3] }
  0xdd   :  { %531 = vmatpush1.bf16.msra.mxu1 %v6150_v48  ;;  %v6226_v48 = vld [vmem:[#allocation14 + $0x480] ss:$144 sps:$4 sm:$0xff]  }
  0xde   :  { %532 = vmatprep.subr.bf16.mxu1 %v6151_v49  ;;  %772 = vmatpush1.bf16.msra.mxu0 %v6178_v4  ;;  %v6234_v49 = vld [vmem:[#allocation14 + $0x5a4] ss:$144 sps:$4 sm:$0xff]   ;;  %v335_v4 = vrot.slane %v330_v3, %v7484_v18 }
  0xdf   :  { %773 = vmatprep.subr.bf16.mxu0 %v6183_v5  ;;  %v339_v5 = vrot.slane %v330_v3, %v7487_v19 }
  0xe1   :  { %533 = vmatpush1.bf16.msra.mxu1 %v6153_v50  ;;  %v6232_v50 = vld [vmem:[#allocation14 + $0x5a0] ss:$144 sps:$4 sm:$0xff]  }
  0xe2   :  { %774 = vmatpush1.bf16.msra.mxu0 %v6181_v6  ;;  %4450 = vmatprep.subr.bf16.mxu1 %v6204_v39  ;;  %v6259_v39 = vld [vmem:[#allocation14 + $0xa28] ss:$144 sps:$4 sm:$0xff]  }
  0xe3   :  { %775 = vmatprep.subr.bf16.mxu0 %v6186_v7 }
  0xe6   :  { %776 = vmatpush1.bf16.msra.mxu0 %v6184_v8 }
  0xe7   :  { %777 = vmatprep.subr.bf16.mxu0 %v6189_v9 }
  0xea   :  { %778 = vmatpush1.bf16.msra.mxu0 %v6187_v10 }
  0xeb   :  { %779 = vmatprep.subr.bf16.mxu0 %v6192_v11 }
  0xee   :  { %780 = vmatpush1.bf16.msra.mxu0 %v6190_v12 }
  0xef   :  { %781 = vmatprep.subr.bf16.mxu0 %v6195_v13 }
  0xf2   :  { %782 = vmatpush1.bf16.msra.mxu0 %v6193_v14 }
  0xf3   :  { %783 = vmatprep.subr.bf16.mxu0 %v6198_v34  ;;  %v6249_v34 = vld [vmem:[#allocation14 + $0x7ec] ss:$144 sps:$4 sm:$0xff]  }
  0xf6   :  { %784 = vmatpush1.bf16.msra.mxu0 %v6196_v35  ;;  %v6247_v35 = vld [vmem:[#allocation14 + $0x7e8] ss:$144 sps:$4 sm:$0xff]  }
  0xf7   :  { %785 = vmatprep.subr.bf16.mxu0 %v6201_v36  ;;  %v6255_v36 = vld [vmem:[#allocation14 + $0x90c] ss:$144 sps:$4 sm:$0xff]  }
  0xfa   :  { %786 = vmatpush1.bf16.msra.mxu0 %v6199_v37  ;;  %v6253_v37 = vld [vmem:[#allocation14 + $0x908] ss:$144 sps:$4 sm:$0xff]  }
  0xfb   :  { %4491 = vmatprep.subr.bf16.mxu0 %v6207_v40  ;;  %v6267_v40 = vld [vmem:[#allocation14 + $0xb4c] ss:$144 sps:$4 sm:$0xff]  }
 0x190   :  { %v283_v22 = vpop.f32.mrb[0].mxu0 }
 0x191   :  { %v284_v23 = vadd.f32 %v283_v22, %v166_v20  ;;  %v285_v24 = vpop.f32.mrb[1].mxu0  ;;  %v6205_v20 = vld [vmem:[#allocation14 + $0x8] ss:$144 sps:$4 sm:$0xff]   ;;  %v6213_v22 = vld [vmem:[#allocation14 + $0x12c] ss:$144 sps:$4 sm:$0xff]  }
 0x192   :  { %v286_v25 = vadd.f32 %v285_v24, %v170_v21  ;;  %v287_v26 = vpop.f32.mrb[2].mxu0  ;;  %v6219_v24 = vld [vmem:[#allocation14 + $0x24c] ss:$144 sps:$4 sm:$0xff]  }
 0x193   :  { %vm290_vm2 = vcmp.gt.f32.partialorder %v284_v23, 0.0  ;;  %v292_v27 = vmul.f32 0.2, %v284_v23  ;;  %v288_v28 = vpop.f32.mrb[3].mxu0  ;;  %v6225_v26 = vld [vmem:[#allocation14 + $0x36c] ss:$144 sps:$4 sm:$0xff]  }
 0x194   :  { %vm291_vm3 = vcmp.gt.f32.partialorder %v286_v25, 0.0  ;;  %v293_v29 = vmul.f32 0.2, %v286_v25  ;;  %v6231_v28 = vld [vmem:[#allocation14 + $0x48c] ss:$144 sps:$4 sm:$0xff]  }
 0x195   :  { %v294_v30 = vsel %vm290_vm2, %v284_v23, %v292_v27  ;;  %v6211_v23 = vld [vmem:[#allocation14 + $0x128] ss:$144 sps:$4 sm:$0xff]  }
 0x196   :  { %v295_v31 = vsel %vm291_vm3, %v286_v25, %v293_v29  ;;  %v296_v33 = vpack.c.bf16 %v294_v30, %v294_v30  ;;  %v6217_v25 = vld [vmem:[#allocation14 + $0x248] ss:$144 sps:$4 sm:$0xff]   ;;  %v6237_v30 = vld [vmem:[#allocation14 + $0x5ac] ss:$144 sps:$4 sm:$0xff]  }
 0x197   :  { %v297_v32 = vpack.c.bf16 %v295_v31, %v295_v31  ;;  %v6223_v27 = vld [vmem:[#allocation14 + $0x368] ss:$144 sps:$4 sm:$0xff]  }
 0x198   :  { %v6229_v29 = vld [vmem:[#allocation14 + $0x488] ss:$144 sps:$4 sm:$0xff]  }
 0x199   :  { %534 = vmatprep.mubr.bf16.mxu1 %v297_v32  ;;  %v6235_v31 = vld [vmem:[#allocation14 + $0x5a8] ss:$144 sps:$4 sm:$0xff]   ;;  %v6243_v32 = vld [vmem:[#allocation14 + $0x6cc] ss:$144 sps:$4 sm:$0xff]  }
 0x19a   :  { %535 = vmatmul.mubr.bf16.vlgmr.msra.gmra.mrb[0].mxu1 %v296_v33  ;;  %v6241_v33 = vld [vmem:[#allocation14 + $0x6c8] ss:$144 sps:$4 sm:$0xff]  }
 0x19b   :  { %4451 = vmatpush1.bf16.msra.mxu1 %v6202_v38  ;;  %v6261_v38 = vld [vmem:[#allocation14 + $0xa2c] ss:$144 sps:$4 sm:$0xff]  }
 0x19c   :  { %4452 = vmatprep.subr.bf16.mxu1 %v6210_v41  ;;  %v6265_v41 = vld [vmem:[#allocation14 + $0xb48] ss:$144 sps:$4 sm:$0xff]  }
 0x19f   :  { %4453 = vmatpush1.bf16.msra.mxu1 %v6208_v42  ;;  %v6273_v42 = vld [vmem:[#allocation14 + $0xc6c] ss:$144 sps:$4 sm:$0xff]  }
 0x1a0   :  { %4454 = vmatprep.subr.bf16.mxu1 %v6216_v43  ;;  %v6271_v43 = vld [vmem:[#allocation14 + $0xc68] ss:$144 sps:$4 sm:$0xff]  }
 0x1a3   :  { %4455 = vmatpush1.bf16.msra.mxu1 %v6214_v44  ;;  %v6279_v44 = vld [vmem:[#allocation14 + $0xd8c] ss:$144 sps:$4 sm:$0xff]  }
 0x1a4   :  { %4456 = vmatprep.subr.bf16.mxu1 %v6222_v45  ;;  %v6277_v45 = vld [vmem:[#allocation14 + $0xd88] ss:$144 sps:$4 sm:$0xff]  }
 0x1a7   :  { %4457 = vmatpush1.bf16.msra.mxu1 %v6220_v46  ;;  %v6285_v46 = vld [vmem:[#allocation14 + $0xeac] ss:$144 sps:$4 sm:$0xff]  }
 0x1a8   :  { %4458 = vmatprep.subr.bf16.mxu1 %v6228_v47  ;;  %v6283_v47 = vld [vmem:[#allocation14 + $0xea8] ss:$144 sps:$4 sm:$0xff]  }
 0x1ab   :  { %4459 = vmatpush1.bf16.msra.mxu1 %v6226_v48  ;;  %v6288_v48 = vld [vmem:[#allocation14 + $0xfc4] ss:$144 sps:$4 sm:$0xff]  }
 0x1ac   :  { %4460 = vmatprep.subr.bf16.mxu1 %v6234_v49  ;;  %v6291_v49 = vld [vmem:[#allocation14 + $0xfcc] ss:$144 sps:$4 sm:$0xff]  }
 0x1af   :  { %4461 = vmatpush1.bf16.msra.mxu1 %v6232_v50  ;;  %v6286_v50 = vld [vmem:[#allocation14 + $0xfc0] ss:$144 sps:$4 sm:$0xff]  }
 0x1b0   :  { %4462 = vmatprep.subr.bf16.mxu1 %v6240_v51  ;;  %v6289_v51 = vld [vmem:[#allocation14 + $0xfc8] ss:$144 sps:$4 sm:$0xff]  }
 0x1b3   :  { %4463 = vmatpush1.bf16.msra.mxu1 %v6238_v52  ;;  %v6294_v52 = vld [vmem:[#allocation14 + $0x10e4] ss:$144 sps:$4 sm:$0xff]  }
 0x1b4   :  { %4464 = vmatprep.subr.bf16.mxu1 %v6246_v53  ;;  %v6297_v53 = vld [vmem:[#allocation14 + $0x10ec] ss:$144 sps:$4 sm:$0xff]  }
 0x1b7   :  { %4465 = vmatpush1.bf16.msra.mxu1 %v6244_v54  ;;  %v6292_v54 = vld [vmem:[#allocation14 + $0x10e0] ss:$144 sps:$4 sm:$0xff]  }
 0x1b8   :  { %4466 = vmatprep.subr.bf16.mxu1 %v6252_v55  ;;  %v6295_v55 = vld [vmem:[#allocation14 + $0x10e8] ss:$144 sps:$4 sm:$0xff]  }
 0x1bb   :  { %4467 = vmatpush1.bf16.msra.mxu1 %v6250_v56  ;;  %v6300_v56 = vld [vmem:[#allocation14 + $0x14] ss:$144 sps:$4 sm:$0xff]  }
 0x1bc   :  { %4468 = vmatprep.subr.bf16.mxu1 %v6258_v57  ;;  %v6303_v57 = vld [vmem:[#allocation14 + $0x1c] ss:$144 sps:$4 sm:$0xff]  }
 0x1bf   :  { %4469 = vmatpush1.bf16.msra.mxu1 %v6256_v58  ;;  %v583_v58 = vld [vmem:[#allocation13] sm:$0x3] }
 0x1c0   :  { %4470 = vmatprep.subr.bf16.mxu1 %v6264_v59  ;;  %v588_v59 = vrot.slane %v583_v58, %v7484_v18 }
 0x1c3   :  { %4471 = vmatpush1.bf16.msra.mxu1 %v6262_v60  ;;  %v592_v60 = vrot.slane %v583_v58, %v7487_v19  ;;  %v6372_v58 = vld [vmem:[#allocation14 + $0xd94] ss:$144 sps:$4 sm:$0xff]  }
 0x1c4   :  { %4472 = vmatprep.subr.bf16.mxu1 %v6270_v61 }
 0x1c7   :  { %4473 = vmatpush1.bf16.msra.mxu1 %v6268_v62 }
 0x1c8   :  { %4474 = vmatprep.subr.bf16.mxu1 %v6276_v63 }
 0x1cb   :  { %4475 = vmatpush1.bf16.msra.mxu1 %v6274_v0 }
 0x1cc   :  { %4476 = vmatprep.subr.bf16.mxu1 %v6282_v1 }
 0x1cf   :  { %4477 = vmatpush1.bf16.msra.mxu1 %v6280_v2 }
 0x1d0   :  { %4478 = vmatprep.subr.bf16.mxu1 %v6288_v48  ;;  %v6352_v48 = vld [vmem:[#allocation14 + $0xa30] ss:$144 sps:$4 sm:$0xff]  }
 0x1d3   :  { %4479 = vmatpush1.bf16.msra.mxu1 %v6286_v50  ;;  %v6360_v50 = vld [vmem:[#allocation14 + $0xb54] ss:$144 sps:$4 sm:$0xff]  }
 0x1d4   :  { %4480 = vmatprep.subr.bf16.mxu1 %v6294_v52  ;;  %v6358_v52 = vld [vmem:[#allocation14 + $0xb50] ss:$144 sps:$4 sm:$0xff]  }
 0x1d7   :  { %4481 = vmatpush1.bf16.msra.mxu1 %v6292_v54  ;;  %v6366_v54 = vld [vmem:[#allocation14 + $0xc74] ss:$144 sps:$4 sm:$0xff]  }
 0x1d8   :  { %4532 = vmatprep.subr.bf16.mxu1 %v6300_v56  ;;  %v6364_v56 = vld [vmem:[#allocation14 + $0xc70] ss:$144 sps:$4 sm:$0xff]  }
 0x26d   :  { %v536_v6 = vpop.f32.mrb[0].mxu1 }
 0x26e   :  { %v537_v7 = vadd.f32 %v536_v6, %v335_v4  ;;  %v538_v8 = vpop.f32.mrb[1].mxu1 }
 0x26f   :  { %v539_v9 = vadd.f32 %v538_v8, %v339_v5  ;;  %v540_v10 = vpop.f32.mrb[2].mxu1  ;;  %v6298_v8 = vld [vmem:[#allocation14 + $0x10] ss:$144 sps:$4 sm:$0xff]  }
 0x270   :  { %vm543_vm4 = vcmp.gt.f32.partialorder %v537_v7, 0.0  ;;  %v545_v11 = vmul.f32 0.2, %v537_v7  ;;  %v541_v12 = vpop.f32.mrb[3].mxu1 }
 0x271   :  { %vm544_vm5 = vcmp.gt.f32.partialorder %v539_v9, 0.0  ;;  %v546_v13 = vmul.f32 0.2, %v539_v9  ;;  %v6309_v12 = vld [vmem:[#allocation14 + $0x13c] ss:$144 sps:$4 sm:$0xff]  }
 0x272   :  { %v547_v14 = vsel %vm543_vm4, %v537_v7, %v545_v11  ;;  %v6306_v11 = vld [vmem:[#allocation14 + $0x134] ss:$144 sps:$4 sm:$0xff]  }
 0x273   :  { %v548_v15 = vsel %vm544_vm5, %v539_v9, %v546_v13  ;;  %v549_v21 = vpack.c.bf16 %v547_v14, %v547_v14  ;;  %v6301_v9 = vld [vmem:[#allocation14 + $0x18] ss:$144 sps:$4 sm:$0xff]   ;;  %v6304_v13 = vld [vmem:[#allocation14 + $0x130] ss:$144 sps:$4 sm:$0xff]  }
 0x274   :  { %v550_v17 = vpack.c.bf16 %v548_v15, %v548_v15  ;;  %v6307_v14 = vld [vmem:[#allocation14 + $0x138] ss:$144 sps:$4 sm:$0xff]   ;;  %v6312_v15 = vld [vmem:[#allocation14 + $0x254] ss:$144 sps:$4 sm:$0xff]  }
 0x276   :  { %787 = vmatprep.mubr.bf16.mxu0 %v550_v17  ;;  %v6315_v17 = vld [vmem:[#allocation14 + $0x25c] ss:$144 sps:$4 sm:$0xff]  }
 0x277   :  { %788 = vmatmul.mubr.bf16.vlgmr.msra.gmra.mrb[4].mxu0 %v549_v21  ;;  %v6313_v21 = vld [vmem:[#allocation14 + $0x258] ss:$144 sps:$4 sm:$0xff]  }
 0x278   :  { %4492 = vmatpush1.bf16.msra.mxu0 %v6205_v20  ;;  %v6310_v20 = vld [vmem:[#allocation14 + $0x250] ss:$144 sps:$4 sm:$0xff]  }
 0x279   :  { %4493 = vmatprep.subr.bf16.mxu0 %v6213_v22  ;;  %v6318_v22 = vld [vmem:[#allocation14 + $0x374] ss:$144 sps:$4 sm:$0xff]  }
 0x27c   :  { %4494 = vmatpush1.bf16.msra.mxu0 %v6211_v23  ;;  %v6321_v23 = vld [vmem:[#allocation14 + $0x37c] ss:$144 sps:$4 sm:$0xff]  }
 0x27d   :  { %4495 = vmatprep.subr.bf16.mxu0 %v6219_v24  ;;  %v6316_v24 = vld [vmem:[#allocation14 + $0x370] ss:$144 sps:$4 sm:$0xff]  }
 0x280   :  { %4496 = vmatpush1.bf16.msra.mxu0 %v6217_v25  ;;  %v6319_v25 = vld [vmem:[#allocation14 + $0x378] ss:$144 sps:$4 sm:$0xff]  }
 0x281   :  { %4497 = vmatprep.subr.bf16.mxu0 %v6225_v26  ;;  %v6324_v26 = vld [vmem:[#allocation14 + $0x494] ss:$144 sps:$4 sm:$0xff]  }
 0x284   :  { %4498 = vmatpush1.bf16.msra.mxu0 %v6223_v27  ;;  %v6327_v27 = vld [vmem:[#allocation14 + $0x49c] ss:$144 sps:$4 sm:$0xff]  }
 0x285   :  { %4499 = vmatprep.subr.bf16.mxu0 %v6231_v28  ;;  %v6322_v28 = vld [vmem:[#allocation14 + $0x490] ss:$144 sps:$4 sm:$0xff]  }
 0x288   :  { %4500 = vmatpush1.bf16.msra.mxu0 %v6229_v29  ;;  %v6325_v29 = vld [vmem:[#allocation14 + $0x498] ss:$144 sps:$4 sm:$0xff]  }
 0x289   :  { %4501 = vmatprep.subr.bf16.mxu0 %v6237_v30  ;;  %v6330_v30 = vld [vmem:[#allocation14 + $0x5b4] ss:$144 sps:$4 sm:$0xff]  }
 0x28c   :  { %4502 = vmatpush1.bf16.msra.mxu0 %v6235_v31  ;;  %v6333_v31 = vld [vmem:[#allocation14 + $0x5bc] ss:$144 sps:$4 sm:$0xff]  }
 0x28d   :  { %4503 = vmatprep.subr.bf16.mxu0 %v6243_v32  ;;  %v6328_v32 = vld [vmem:[#allocation14 + $0x5b0] ss:$144 sps:$4 sm:$0xff]  }
 0x290   :  { %4504 = vmatpush1.bf16.msra.mxu0 %v6241_v33  ;;  %v6331_v33 = vld [vmem:[#allocation14 + $0x5b8] ss:$144 sps:$4 sm:$0xff]  }
 0x291   :  { %4505 = vmatprep.subr.bf16.mxu0 %v6249_v34  ;;  %v6336_v34 = vld [vmem:[#allocation14 + $0x6d4] ss:$144 sps:$4 sm:$0xff]  }
 0x294   :  { %4506 = vmatpush1.bf16.msra.mxu0 %v6247_v35  ;;  %v6339_v35 = vld [vmem:[#allocation14 + $0x6dc] ss:$144 sps:$4 sm:$0xff]  }
 0x295   :  { %4507 = vmatprep.subr.bf16.mxu0 %v6255_v36  ;;  %v6334_v36 = vld [vmem:[#allocation14 + $0x6d0] ss:$144 sps:$4 sm:$0xff]  }
 0x298   :  { %4508 = vmatpush1.bf16.msra.mxu0 %v6253_v37  ;;  %v6337_v37 = vld [vmem:[#allocation14 + $0x6d8] ss:$144 sps:$4 sm:$0xff]  }
 0x299   :  { %4509 = vmatprep.subr.bf16.mxu0 %v6261_v38  ;;  %v6342_v38 = vld [vmem:[#allocation14 + $0x7f4] ss:$144 sps:$4 sm:$0xff]  }
 0x29c   :  { %4510 = vmatpush1.bf16.msra.mxu0 %v6259_v39  ;;  %v6345_v39 = vld [vmem:[#allocation14 + $0x7fc] ss:$144 sps:$4 sm:$0xff]  }
 0x29d   :  { %4511 = vmatprep.subr.bf16.mxu0 %v6267_v40  ;;  %v6340_v40 = vld [vmem:[#allocation14 + $0x7f0] ss:$144 sps:$4 sm:$0xff]  }
 0x2a0   :  { %4512 = vmatpush1.bf16.msra.mxu0 %v6265_v41  ;;  %v6343_v41 = vld [vmem:[#allocation14 + $0x7f8] ss:$144 sps:$4 sm:$0xff]  }
 0x2a1   :  { %4513 = vmatprep.subr.bf16.mxu0 %v6273_v42  ;;  %v6348_v42 = vld [vmem:[#allocation14 + $0x914] ss:$144 sps:$4 sm:$0xff]  }
 0x2a4   :  { %4514 = vmatpush1.bf16.msra.mxu0 %v6271_v43  ;;  %v6351_v43 = vld [vmem:[#allocation14 + $0x91c] ss:$144 sps:$4 sm:$0xff]  }
 0x2a5   :  { %4515 = vmatprep.subr.bf16.mxu0 %v6279_v44  ;;  %v6346_v44 = vld [vmem:[#allocation14 + $0x910] ss:$144 sps:$4 sm:$0xff]  }
 0x2a8   :  { %4516 = vmatpush1.bf16.msra.mxu0 %v6277_v45  ;;  %v6349_v45 = vld [vmem:[#allocation14 + $0x918] ss:$144 sps:$4 sm:$0xff]  }
 0x2a9   :  { %4517 = vmatprep.subr.bf16.mxu0 %v6285_v46  ;;  %v6354_v46 = vld [vmem:[#allocation14 + $0xa34] ss:$144 sps:$4 sm:$0xff]  }
 0x2ac   :  { %4518 = vmatpush1.bf16.msra.mxu0 %v6283_v47  ;;  %v6357_v47 = vld [vmem:[#allocation14 + $0xa3c] ss:$144 sps:$4 sm:$0xff]  }
 0x2ad   :  { %4519 = vmatprep.subr.bf16.mxu0 %v6291_v49  ;;  %v6355_v49 = vld [vmem:[#allocation14 + $0xa38] ss:$144 sps:$4 sm:$0xff]  }
 0x2b0   :  { %4520 = vmatpush1.bf16.msra.mxu0 %v6289_v51  ;;  %v6363_v51 = vld [vmem:[#allocation14 + $0xb5c] ss:$144 sps:$4 sm:$0xff]  }
 0x2b1   :  { %4521 = vmatprep.subr.bf16.mxu0 %v6297_v53  ;;  %v6361_v53 = vld [vmem:[#allocation14 + $0xb58] ss:$144 sps:$4 sm:$0xff]  }
 0x2b4   :  { %4522 = vmatpush1.bf16.msra.mxu0 %v6295_v55  ;;  %v6369_v55 = vld [vmem:[#allocation14 + $0xc7c] ss:$144 sps:$4 sm:$0xff]  }
 0x2b5   :  { %4573 = vmatprep.subr.bf16.mxu0 %v6303_v57  ;;  %v6367_v57 = vld [vmem:[#allocation14 + $0xc78] ss:$144 sps:$4 sm:$0xff]  }
 0x34a   :  { %v789_v61 = vpop.f32.mrb[4].mxu0 }
 0x34b   :  { %v790_v62 = vadd.f32 %v789_v61, %v588_v59  ;;  %v791_v63 = vpop.f32.mrb[5].mxu0  ;;  %v6375_v59 = vld [vmem:[#allocation14 + $0xd9c] ss:$144 sps:$4 sm:$0xff]   ;;  %v6373_v61 = vld [vmem:[#allocation14 + $0xd98] ss:$144 sps:$4 sm:$0xff]  }
 0x34c   :  { %v792_v0 = vadd.f32 %v791_v63, %v592_v60  ;;  %v793_v1 = vpop.f32.mrb[6].mxu0  ;;  %v6370_v60 = vld [vmem:[#allocation14 + $0xd90] ss:$144 sps:$4 sm:$0xff]   ;;  %v6381_v63 = vld [vmem:[#allocation14 + $0xebc] ss:$144 sps:$4 sm:$0xff]  }
 0x34d   :  { %vm796_vm6 = vcmp.gt.f32.partialorder %v790_v62, 0.0  ;;  %v798_v2 = vmul.f32 0.2, %v790_v62  ;;  %v794_v3 = vpop.f32.mrb[7].mxu0  ;;  %v6379_v1 = vld [vmem:[#allocation14 + $0xeb8] ss:$144 sps:$4 sm:$0xff]  }
 0x34e   :  { %vm797_vm7 = vcmp.gt.f32.partialorder %v792_v0, 0.0  ;;  %v799_v4 = vmul.f32 0.2, %v792_v0  ;;  %v6387_v3 = vld [vmem:[#allocation14 + $0xfdc] ss:$144 sps:$4 sm:$0xff]  }
 0x34f   :  { %v800_v5 = vsel %vm796_vm6, %v790_v62, %v798_v2  ;;  %v6378_v62 = vld [vmem:[#allocation14 + $0xeb4] ss:$144 sps:$4 sm:$0xff]  }
 0x350   :  { %v801_v6 = vsel %vm797_vm7, %v792_v0, %v799_v4  ;;  %v7497_v10 = vpack.c.bf16 %v800_v5, %v800_v5  ;;  %v6376_v0 = vld [vmem:[#allocation14 + $0xeb0] ss:$144 sps:$4 sm:$0xff]   ;;  %v6384_v2 = vld [vmem:[#allocation14 + $0xfd4] ss:$144 sps:$4 sm:$0xff]   ;;  %v6385_v5 = vld [vmem:[#allocation14 + $0xfd8] ss:$144 sps:$4 sm:$0xff]  }
 0x351   :  { %v7495_v7 = vpack.c.bf16 %v801_v6, %v801_v6  ;;  %v6382_v4 = vld [vmem:[#allocation14 + $0xfd0] ss:$144 sps:$4 sm:$0xff]   ;;  %v6390_v6 = vld [vmem:[#allocation14 + $0x10f4] ss:$144 sps:$4 sm:$0xff]  }
 0x353   :  { %4482 = vmatprep.mubr.bf16.mxu1 %v7495_v7  ;;  %4523 = vmatprep.mubr.bf16.mxu0 %v7495_v7 }
 0x354   :  { %4483 = vmatmul.mubr.bf16.vlgmr.msra.gmra.mrb[4].mxu1 %v7497_v10  ;;  %4524 = vmatmul.mubr.bf16.vlgmr.msra.gmra.mrb[8].mxu0 %v7497_v10 }
 0x355   :  { %4533 = vmatpush1.bf16.msra.mxu1 %v6298_v8  ;;  %4574 = vmatpush1.bf16.msra.mxu0 %v6301_v9  ;;  %v6393_v8 = vld [vmem:[#allocation14 + $0x10fc] ss:$144 sps:$4 sm:$0xff]   ;;  %v6388_v9 = vld [vmem:[#allocation14 + $0x10f0] ss:$144 sps:$4 sm:$0xff]  }
 0x356   :  { %4564 = vmatprep.mubr.bf16.mxu1 %v7495_v7  ;;  %4605 = vmatprep.mubr.bf16.mxu0 %v7495_v7 }
 0x357   :  { %4534 = vmatprep.subr.bf16.mxu1 %v6306_v11  ;;  %4575 = vmatprep.subr.bf16.mxu0 %v6309_v12  ;;  %v6391_v11 = vld [vmem:[#allocation14 + $0x10f8] ss:$144 sps:$4 sm:$0xff]   ;;  %v6396_v12 = vld [vmem:[#allocation14 + $0x24] ss:$144 sps:$4 sm:$0xff]  }
 0x359   :  { %4535 = vmatpush1.bf16.msra.mxu1 %v6304_v13  ;;  %4576 = vmatpush1.bf16.msra.mxu0 %v6307_v14  ;;  %v6399_v13 = vld [vmem:[#allocation14 + $0x2c] ss:$144 sps:$4 sm:$0xff]   ;;  %v6394_v14 = vld [vmem:[#allocation14 + $0x20] ss:$144 sps:$4 sm:$0xff]  }
 0x35a   :  { %4536 = vmatprep.subr.bf16.mxu1 %v6312_v15  ;;  %4577 = vmatprep.subr.bf16.mxu0 %v6315_v17  ;;  %v6397_v15 = vld [vmem:[#allocation14 + $0x28] ss:$144 sps:$4 sm:$0xff]   ;;  %v6402_v17 = vld [vmem:[#allocation14 + $0x144] ss:$144 sps:$4 sm:$0xff]  }
 0x35d   :  { %4537 = vmatpush1.bf16.msra.mxu1 %v6310_v20  ;;  %4578 = vmatpush1.bf16.msra.mxu0 %v6313_v21  ;;  %v6405_v20 = vld [vmem:[#allocation14 + $0x14c] ss:$144 sps:$4 sm:$0xff]   ;;  %v6400_v21 = vld [vmem:[#allocation14 + $0x140] ss:$144 sps:$4 sm:$0xff]  }
 0x35e   :  { %4538 = vmatprep.subr.bf16.mxu1 %v6318_v22  ;;  %4579 = vmatprep.subr.bf16.mxu0 %v6321_v23  ;;  %v6403_v22 = vld [vmem:[#allocation14 + $0x148] ss:$144 sps:$4 sm:$0xff]   ;;  %v6408_v23 = vld [vmem:[#allocation14 + $0x264] ss:$144 sps:$4 sm:$0xff]  }
 0x361   :  { %4539 = vmatpush1.bf16.msra.mxu1 %v6316_v24  ;;  %4580 = vmatpush1.bf16.msra.mxu0 %v6319_v25  ;;  %v6411_v24 = vld [vmem:[#allocation14 + $0x26c] ss:$144 sps:$4 sm:$0xff]   ;;  %v6406_v25 = vld [vmem:[#allocation14 + $0x260] ss:$144 sps:$4 sm:$0xff]  }
 0x362   :  { %4540 = vmatprep.subr.bf16.mxu1 %v6324_v26  ;;  %4581 = vmatprep.subr.bf16.mxu0 %v6327_v27  ;;  %v6409_v26 = vld [vmem:[#allocation14 + $0x268] ss:$144 sps:$4 sm:$0xff]   ;;  %v6414_v27 = vld [vmem:[#allocation14 + $0x384] ss:$144 sps:$4 sm:$0xff]  }
 0x365   :  { %4541 = vmatpush1.bf16.msra.mxu1 %v6322_v28  ;;  %4582 = vmatpush1.bf16.msra.mxu0 %v6325_v29  ;;  %v6417_v28 = vld [vmem:[#allocation14 + $0x38c] ss:$144 sps:$4 sm:$0xff]   ;;  %v6412_v29 = vld [vmem:[#allocation14 + $0x380] ss:$144 sps:$4 sm:$0xff]  }
 0x366   :  { %4542 = vmatprep.subr.bf16.mxu1 %v6330_v30  ;;  %4583 = vmatprep.subr.bf16.mxu0 %v6333_v31  ;;  %v6415_v30 = vld [vmem:[#allocation14 + $0x388] ss:$144 sps:$4 sm:$0xff]   ;;  %v6420_v31 = vld [vmem:[#allocation14 + $0x4a4] ss:$144 sps:$4 sm:$0xff]  }
 0x369   :  { %4543 = vmatpush1.bf16.msra.mxu1 %v6328_v32  ;;  %4584 = vmatpush1.bf16.msra.mxu0 %v6331_v33  ;;  %v6423_v32 = vld [vmem:[#allocation14 + $0x4ac] ss:$144 sps:$4 sm:$0xff]   ;;  %v6418_v33 = vld [vmem:[#allocation14 + $0x4a0] ss:$144 sps:$4 sm:$0xff]  }
 0x36a   :  { %4544 = vmatprep.subr.bf16.mxu1 %v6336_v34  ;;  %4585 = vmatprep.subr.bf16.mxu0 %v6339_v35  ;;  %v6421_v34 = vld [vmem:[#allocation14 + $0x4a8] ss:$144 sps:$4 sm:$0xff]   ;;  %v6426_v35 = vld [vmem:[#allocation14 + $0x5c4] ss:$144 sps:$4 sm:$0xff]  }
 0x36d   :  { %4545 = vmatpush1.bf16.msra.mxu1 %v6334_v36  ;;  %4586 = vmatpush1.bf16.msra.mxu0 %v6337_v37  ;;  %v6429_v36 = vld [vmem:[#allocation14 + $0x5cc] ss:$144 sps:$4 sm:$0xff]   ;;  %v6424_v37 = vld [vmem:[#allocation14 + $0x5c0] ss:$144 sps:$4 sm:$0xff]  }
 0x36e   :  { %4546 = vmatprep.subr.bf16.mxu1 %v6342_v38  ;;  %4587 = vmatprep.subr.bf16.mxu0 %v6345_v39  ;;  %v6427_v38 = vld [vmem:[#allocation14 + $0x5c8] ss:$144 sps:$4 sm:$0xff]   ;;  %v6432_v39 = vld [vmem:[#allocation14 + $0x6e4] ss:$144 sps:$4 sm:$0xff]  }
 0x371   :  { %4547 = vmatpush1.bf16.msra.mxu1 %v6340_v40  ;;  %4588 = vmatpush1.bf16.msra.mxu0 %v6343_v41  ;;  %v6435_v40 = vld [vmem:[#allocation14 + $0x6ec] ss:$144 sps:$4 sm:$0xff]   ;;  %v6430_v41 = vld [vmem:[#allocation14 + $0x6e0] ss:$144 sps:$4 sm:$0xff]  }
 0x372   :  { %4548 = vmatprep.subr.bf16.mxu1 %v6348_v42  ;;  %4589 = vmatprep.subr.bf16.mxu0 %v6351_v43  ;;  %v6433_v42 = vld [vmem:[#allocation14 + $0x6e8] ss:$144 sps:$4 sm:$0xff]   ;;  %v6438_v43 = vld [vmem:[#allocation14 + $0x804] ss:$144 sps:$4 sm:$0xff]  }
 0x375   :  { %4549 = vmatpush1.bf16.msra.mxu1 %v6346_v44  ;;  %4590 = vmatpush1.bf16.msra.mxu0 %v6349_v45  ;;  %v6441_v44 = vld [vmem:[#allocation14 + $0x80c] ss:$144 sps:$4 sm:$0xff]   ;;  %v6436_v45 = vld [vmem:[#allocation14 + $0x800] ss:$144 sps:$4 sm:$0xff]  }
 0x376   :  { %4550 = vmatprep.subr.bf16.mxu1 %v6354_v46  ;;  %4591 = vmatprep.subr.bf16.mxu0 %v6357_v47  ;;  %v6439_v46 = vld [vmem:[#allocation14 + $0x808] ss:$144 sps:$4 sm:$0xff]   ;;  %v6444_v47 = vld [vmem:[#allocation14 + $0x924] ss:$144 sps:$4 sm:$0xff]  }
 0x379   :  { %4551 = vmatpush1.bf16.msra.mxu1 %v6352_v48  ;;  %4592 = vmatpush1.bf16.msra.mxu0 %v6355_v49  ;;  %v6447_v48 = vld [vmem:[#allocation14 + $0x92c] ss:$144 sps:$4 sm:$0xff]   ;;  %v6442_v49 = vld [vmem:[#allocation14 + $0x920] ss:$144 sps:$4 sm:$0xff]  }
 0x37a   :  { %4552 = vmatprep.subr.bf16.mxu1 %v6360_v50  ;;  %4593 = vmatprep.subr.bf16.mxu0 %v6363_v51  ;;  %v6445_v50 = vld [vmem:[#allocation14 + $0x928] ss:$144 sps:$4 sm:$0xff]   ;;  %v6450_v51 = vld [vmem:[#allocation14 + $0xa44] ss:$144 sps:$4 sm:$0xff]  }
 0x37d   :  { %4553 = vmatpush1.bf16.msra.mxu1 %v6358_v52  ;;  %4594 = vmatpush1.bf16.msra.mxu0 %v6361_v53  ;;  %v6453_v52 = vld [vmem:[#allocation14 + $0xa4c] ss:$144 sps:$4 sm:$0xff]   ;;  %v6448_v53 = vld [vmem:[#allocation14 + $0xa40] ss:$144 sps:$4 sm:$0xff]  }
 0x37e   :  { %4554 = vmatprep.subr.bf16.mxu1 %v6366_v54  ;;  %4595 = vmatprep.subr.bf16.mxu0 %v6369_v55  ;;  %v6451_v54 = vld [vmem:[#allocation14 + $0xa48] ss:$144 sps:$4 sm:$0xff]   ;;  %v6456_v55 = vld [vmem:[#allocation14 + $0xb64] ss:$144 sps:$4 sm:$0xff]  }
 0x381   :  { %4555 = vmatpush1.bf16.msra.mxu1 %v6364_v56  ;;  %4596 = vmatpush1.bf16.msra.mxu0 %v6367_v57  ;;  %v6459_v56 = vld [vmem:[#allocation14 + $0xb6c] ss:$144 sps:$4 sm:$0xff]   ;;  %v6454_v57 = vld [vmem:[#allocation14 + $0xb60] ss:$144 sps:$4 sm:$0xff]  }
 0x382   :  { %4556 = vmatprep.subr.bf16.mxu1 %v6372_v58  ;;  %4597 = vmatprep.subr.bf16.mxu0 %v6375_v59  ;;  %v6457_v58 = vld [vmem:[#allocation14 + $0xb68] ss:$144 sps:$4 sm:$0xff]   ;;  %v6462_v59 = vld [vmem:[#allocation14 + $0xc84] ss:$144 sps:$4 sm:$0xff]  }
 0x385   :  { %4557 = vmatpush1.bf16.msra.mxu1 %v6370_v60  ;;  %4598 = vmatpush1.bf16.msra.mxu0 %v6373_v61  ;;  %v6465_v60 = vld [vmem:[#allocation14 + $0xc8c] ss:$144 sps:$4 sm:$0xff]   ;;  %v6460_v61 = vld [vmem:[#allocation14 + $0xc80] ss:$144 sps:$4 sm:$0xff]  }
 0x386   :  { %4558 = vmatprep.subr.bf16.mxu1 %v6378_v62  ;;  %4599 = vmatprep.subr.bf16.mxu0 %v6381_v63  ;;  %v6463_v62 = vld [vmem:[#allocation14 + $0xc88] ss:$144 sps:$4 sm:$0xff]   ;;  %v6468_v63 = vld [vmem:[#allocation14 + $0xda4] ss:$144 sps:$4 sm:$0xff]  }
 0x389   :  { %4559 = vmatpush1.bf16.msra.mxu1 %v6376_v0  ;;  %4600 = vmatpush1.bf16.msra.mxu0 %v6379_v1  ;;  %v6471_v0 = vld [vmem:[#allocation14 + $0xdac] ss:$144 sps:$4 sm:$0xff]   ;;  %v6466_v1 = vld [vmem:[#allocation14 + $0xda0] ss:$144 sps:$4 sm:$0xff]  }
 0x38a   :  { %4560 = vmatprep.subr.bf16.mxu1 %v6384_v2  ;;  %4601 = vmatprep.subr.bf16.mxu0 %v6387_v3  ;;  %v6469_v2 = vld [vmem:[#allocation14 + $0xda8] ss:$144 sps:$4 sm:$0xff]   ;;  %v6474_v3 = vld [vmem:[#allocation14 + $0xec4] ss:$144 sps:$4 sm:$0xff]  }
 0x38d   :  { %4561 = vmatpush1.bf16.msra.mxu1 %v6382_v4  ;;  %4602 = vmatpush1.bf16.msra.mxu0 %v6385_v5  ;;  %v6477_v4 = vld [vmem:[#allocation14 + $0xecc] ss:$144 sps:$4 sm:$0xff]   ;;  %v6472_v5 = vld [vmem:[#allocation14 + $0xec0] ss:$144 sps:$4 sm:$0xff]  }
 0x38e   :  { %4562 = vmatprep.subr.bf16.mxu1 %v6390_v6  ;;  %4603 = vmatprep.subr.bf16.mxu0 %v6393_v8  ;;  %v6475_v6 = vld [vmem:[#allocation14 + $0xec8] ss:$144 sps:$4 sm:$0xff]   ;;  %v6480_v8 = vld [vmem:[#allocation14 + $0xfe4] ss:$144 sps:$4 sm:$0xff]  }
 0x391   :  { %4563 = vmatpush1.bf16.msra.mxu1 %v6388_v9  ;;  %4604 = vmatpush1.bf16.msra.mxu0 %v6391_v11  ;;  %v6483_v9 = vld [vmem:[#allocation14 + $0xfec] ss:$144 sps:$4 sm:$0xff]   ;;  %v6478_v11 = vld [vmem:[#allocation14 + $0xfe0] ss:$144 sps:$4 sm:$0xff]  }
 0x392   :  { %4614 = vmatprep.subr.bf16.mxu1 %v6396_v12  ;;  %4655 = vmatprep.subr.bf16.mxu0 %v6399_v13  ;;  %v6481_v12 = vld [vmem:[#allocation14 + $0xfe8] ss:$144 sps:$4 sm:$0xff]   ;;  %v6486_v13 = vld [vmem:[#allocation14 + $0x1104] ss:$144 sps:$4 sm:$0xff]  }
 0x394   :  { %4565 = vmatmul.mubr.bf16.vlgmr.msra.gmra.mrb[8].mxu1 %v7497_v10  ;;  %4606 = vmatmul.mubr.bf16.vlgmr.msra.gmra.mrb[12].mxu0 %v7497_v10 }
 0x395   :  { %4615 = vmatpush1.bf16.msra.mxu1 %v6394_v14  ;;  %4646 = vmatprep.mubr.bf16.mxu1 %v7495_v7  ;;  %v6489_v14 = vld [vmem:[#allocation14 + $0x110c] ss:$144 sps:$4 sm:$0xff]  }
 0x396   :  { %4656 = vmatpush1.bf16.msra.mxu0 %v6397_v15  ;;  %4687 = vmatprep.mubr.bf16.mxu0 %v7495_v7  ;;  %v6484_v15 = vld [vmem:[#allocation14 + $0x1100] ss:$144 sps:$4 sm:$0xff]  }
 0x397   :  { %4616 = vmatprep.subr.bf16.mxu1 %v6402_v17  ;;  %4657 = vmatprep.subr.bf16.mxu0 %v6405_v20  ;;  %v6487_v17 = vld [vmem:[#allocation14 + $0x1108] ss:$144 sps:$4 sm:$0xff]   ;;  %v6492_v20 = vld [vmem:[#allocation14 + $0x34] ss:$144 sps:$4 sm:$0xff]  }
 0x399   :  { %4617 = vmatpush1.bf16.msra.mxu1 %v6400_v21  ;;  %v6495_v21 = vld [vmem:[#allocation14 + $0x3c] ss:$144 sps:$4 sm:$0xff]  }
 0x39a   :  { %4658 = vmatpush1.bf16.msra.mxu0 %v6403_v22  ;;  %4618 = vmatprep.subr.bf16.mxu1 %v6408_v23  ;;  %v6490_v22 = vld [vmem:[#allocation14 + $0x30] ss:$144 sps:$4 sm:$0xff]   ;;  %v6493_v23 = vld [vmem:[#allocation14 + $0x38] ss:$144 sps:$4 sm:$0xff]  }
 0x39b   :  { %4659 = vmatprep.subr.bf16.mxu0 %v6411_v24  ;;  %v6498_v24 = vld [vmem:[#allocation14 + $0x154] ss:$144 sps:$4 sm:$0xff]  }
 0x39d   :  { %4619 = vmatpush1.bf16.msra.mxu1 %v6406_v25  ;;  %v6501_v25 = vld [vmem:[#allocation14 + $0x15c] ss:$144 sps:$4 sm:$0xff]  }
 0x39e   :  { %4660 = vmatpush1.bf16.msra.mxu0 %v6409_v26  ;;  %4620 = vmatprep.subr.bf16.mxu1 %v6414_v27  ;;  %v6496_v26 = vld [vmem:[#allocation14 + $0x150] ss:$144 sps:$4 sm:$0xff]   ;;  %v6499_v27 = vld [vmem:[#allocation14 + $0x158] ss:$144 sps:$4 sm:$0xff]  }
 0x39f   :  { %4661 = vmatprep.subr.bf16.mxu0 %v6417_v28  ;;  %v6504_v28 = vld [vmem:[#allocation14 + $0x274] ss:$144 sps:$4 sm:$0xff]  }
 0x3a1   :  { %4621 = vmatpush1.bf16.msra.mxu1 %v6412_v29  ;;  %v6507_v29 = vld [vmem:[#allocation14 + $0x27c] ss:$144 sps:$4 sm:$0xff]  }
 0x3a2   :  { %4662 = vmatpush1.bf16.msra.mxu0 %v6415_v30  ;;  %4622 = vmatprep.subr.bf16.mxu1 %v6420_v31  ;;  %v6502_v30 = vld [vmem:[#allocation14 + $0x270] ss:$144 sps:$4 sm:$0xff]   ;;  %v6505_v31 = vld [vmem:[#allocation14 + $0x278] ss:$144 sps:$4 sm:$0xff]  }
 0x3a3   :  { %4663 = vmatprep.subr.bf16.mxu0 %v6423_v32  ;;  %v6510_v32 = vld [vmem:[#allocation14 + $0x394] ss:$144 sps:$4 sm:$0xff]  }
 0x3a5   :  { %4623 = vmatpush1.bf16.msra.mxu1 %v6418_v33  ;;  %v6513_v33 = vld [vmem:[#allocation14 + $0x39c] ss:$144 sps:$4 sm:$0xff]  }
 0x3a6   :  { %4664 = vmatpush1.bf16.msra.mxu0 %v6421_v34  ;;  %4624 = vmatprep.subr.bf16.mxu1 %v6426_v35  ;;  %v6508_v34 = vld [vmem:[#allocation14 + $0x390] ss:$144 sps:$4 sm:$0xff]   ;;  %v6511_v35 = vld [vmem:[#allocation14 + $0x398] ss:$144 sps:$4 sm:$0xff]  }
 0x3a7   :  { %4665 = vmatprep.subr.bf16.mxu0 %v6429_v36  ;;  %v6516_v36 = vld [vmem:[#allocation14 + $0x4b4] ss:$144 sps:$4 sm:$0xff]  }
 0x3a9   :  { %4625 = vmatpush1.bf16.msra.mxu1 %v6424_v37  ;;  %v6519_v37 = vld [vmem:[#allocation14 + $0x4bc] ss:$144 sps:$4 sm:$0xff]  }
 0x3aa   :  { %4666 = vmatpush1.bf16.msra.mxu0 %v6427_v38  ;;  %4626 = vmatprep.subr.bf16.mxu1 %v6432_v39  ;;  %v6514_v38 = vld [vmem:[#allocation14 + $0x4b0] ss:$144 sps:$4 sm:$0xff]   ;;  %v6517_v39 = vld [vmem:[#allocation14 + $0x4b8] ss:$144 sps:$4 sm:$0xff]  }
 0x3ab   :  { %4667 = vmatprep.subr.bf16.mxu0 %v6435_v40  ;;  %v6522_v40 = vld [vmem:[#allocation14 + $0x5d4] ss:$144 sps:$4 sm:$0xff]  }
 0x3ad   :  { %4627 = vmatpush1.bf16.msra.mxu1 %v6430_v41  ;;  %v6525_v41 = vld [vmem:[#allocation14 + $0x5dc] ss:$144 sps:$4 sm:$0xff]  }
 0x3ae   :  { %4668 = vmatpush1.bf16.msra.mxu0 %v6433_v42  ;;  %4628 = vmatprep.subr.bf16.mxu1 %v6438_v43  ;;  %v6520_v42 = vld [vmem:[#allocation14 + $0x5d0] ss:$144 sps:$4 sm:$0xff]   ;;  %v6523_v43 = vld [vmem:[#allocation14 + $0x5d8] ss:$144 sps:$4 sm:$0xff]  }
 0x3af   :  { %4669 = vmatprep.subr.bf16.mxu0 %v6441_v44  ;;  %v6528_v44 = vld [vmem:[#allocation14 + $0x6f4] ss:$144 sps:$4 sm:$0xff]  }
 0x3b1   :  { %4629 = vmatpush1.bf16.msra.mxu1 %v6436_v45  ;;  %v6531_v45 = vld [vmem:[#allocation14 + $0x6fc] ss:$144 sps:$4 sm:$0xff]  }
 0x3b2   :  { %4670 = vmatpush1.bf16.msra.mxu0 %v6439_v46  ;;  %4630 = vmatprep.subr.bf16.mxu1 %v6444_v47  ;;  %v6526_v46 = vld [vmem:[#allocation14 + $0x6f0] ss:$144 sps:$4 sm:$0xff]   ;;  %v6529_v47 = vld [vmem:[#allocation14 + $0x6f8] ss:$144 sps:$4 sm:$0xff]  }
 0x3b3   :  { %4671 = vmatprep.subr.bf16.mxu0 %v6447_v48  ;;  %v6534_v48 = vld [vmem:[#allocation14 + $0x814] ss:$144 sps:$4 sm:$0xff]  }
 0x3b5   :  { %4631 = vmatpush1.bf16.msra.mxu1 %v6442_v49  ;;  %v6537_v49 = vld [vmem:[#allocation14 + $0x81c] ss:$144 sps:$4 sm:$0xff]  }
 0x3b6   :  { %4672 = vmatpush1.bf16.msra.mxu0 %v6445_v50  ;;  %4632 = vmatprep.subr.bf16.mxu1 %v6450_v51  ;;  %v6532_v50 = vld [vmem:[#allocation14 + $0x810] ss:$144 sps:$4 sm:$0xff]   ;;  %v6535_v51 = vld [vmem:[#allocation14 + $0x818] ss:$144 sps:$4 sm:$0xff]  }
 0x3b7   :  { %4673 = vmatprep.subr.bf16.mxu0 %v6453_v52  ;;  %v6540_v52 = vld [vmem:[#allocation14 + $0x934] ss:$144 sps:$4 sm:$0xff]  }
 0x3b9   :  { %4633 = vmatpush1.bf16.msra.mxu1 %v6448_v53  ;;  %v6543_v53 = vld [vmem:[#allocation14 + $0x93c] ss:$144 sps:$4 sm:$0xff]  }
 0x3ba   :  { %4674 = vmatpush1.bf16.msra.mxu0 %v6451_v54  ;;  %4634 = vmatprep.subr.bf16.mxu1 %v6456_v55  ;;  %v6538_v54 = vld [vmem:[#allocation14 + $0x930] ss:$144 sps:$4 sm:$0xff]   ;;  %v6541_v55 = vld [vmem:[#allocation14 + $0x938] ss:$144 sps:$4 sm:$0xff]  }
 0x3bb   :  { %4675 = vmatprep.subr.bf16.mxu0 %v6459_v56  ;;  %v6546_v56 = vld [vmem:[#allocation14 + $0xa54] ss:$144 sps:$4 sm:$0xff]  }
 0x3bd   :  { %4635 = vmatpush1.bf16.msra.mxu1 %v6454_v57  ;;  %v6549_v57 = vld [vmem:[#allocation14 + $0xa5c] ss:$144 sps:$4 sm:$0xff]  }
 0x3be   :  { %4676 = vmatpush1.bf16.msra.mxu0 %v6457_v58  ;;  %4636 = vmatprep.subr.bf16.mxu1 %v6462_v59  ;;  %v6544_v58 = vld [vmem:[#allocation14 + $0xa50] ss:$144 sps:$4 sm:$0xff]   ;;  %v6547_v59 = vld [vmem:[#allocation14 + $0xa58] ss:$144 sps:$4 sm:$0xff]  }
 0x3bf   :  { %4677 = vmatprep.subr.bf16.mxu0 %v6465_v60  ;;  %v6552_v60 = vld [vmem:[#allocation14 + $0xb74] ss:$144 sps:$4 sm:$0xff]  }
 0x3c1   :  { %4637 = vmatpush1.bf16.msra.mxu1 %v6460_v61  ;;  %v6555_v61 = vld [vmem:[#allocation14 + $0xb7c] ss:$144 sps:$4 sm:$0xff]  }
 0x3c2   :  { %4678 = vmatpush1.bf16.msra.mxu0 %v6463_v62  ;;  %4638 = vmatprep.subr.bf16.mxu1 %v6468_v63  ;;  %v6550_v62 = vld [vmem:[#allocation14 + $0xb70] ss:$144 sps:$4 sm:$0xff]   ;;  %v6553_v63 = vld [vmem:[#allocation14 + $0xb78] ss:$144 sps:$4 sm:$0xff]  }
 0x3c3   :  { %4679 = vmatprep.subr.bf16.mxu0 %v6471_v0  ;;  %v6558_v0 = vld [vmem:[#allocation14 + $0xc94] ss:$144 sps:$4 sm:$0xff]  }
 0x3c5   :  { %4639 = vmatpush1.bf16.msra.mxu1 %v6466_v1  ;;  %v6561_v1 = vld [vmem:[#allocation14 + $0xc9c] ss:$144 sps:$4 sm:$0xff]  }
 0x3c6   :  { %4680 = vmatpush1.bf16.msra.mxu0 %v6469_v2  ;;  %4640 = vmatprep.subr.bf16.mxu1 %v6474_v3  ;;  %v6556_v2 = vld [vmem:[#allocation14 + $0xc90] ss:$144 sps:$4 sm:$0xff]   ;;  %v6559_v3 = vld [vmem:[#allocation14 + $0xc98] ss:$144 sps:$4 sm:$0xff]  }
 0x3c7   :  { %4681 = vmatprep.subr.bf16.mxu0 %v6477_v4  ;;  %v6564_v4 = vld [vmem:[#allocation14 + $0xdb4] ss:$144 sps:$4 sm:$0xff]  }
 0x3c9   :  { %4641 = vmatpush1.bf16.msra.mxu1 %v6472_v5  ;;  %v6567_v5 = vld [vmem:[#allocation14 + $0xdbc] ss:$144 sps:$4 sm:$0xff]  }
 0x3ca   :  { %4682 = vmatpush1.bf16.msra.mxu0 %v6475_v6  ;;  %4642 = vmatprep.subr.bf16.mxu1 %v6480_v8  ;;  %v6562_v6 = vld [vmem:[#allocation14 + $0xdb0] ss:$144 sps:$4 sm:$0xff]   ;;  %v6565_v8 = vld [vmem:[#allocation14 + $0xdb8] ss:$144 sps:$4 sm:$0xff]  }
 0x3cb   :  { %4683 = vmatprep.subr.bf16.mxu0 %v6483_v9  ;;  %v6570_v9 = vld [vmem:[#allocation14 + $0xed4] ss:$144 sps:$4 sm:$0xff]  }
 0x3cd   :  { %4643 = vmatpush1.bf16.msra.mxu1 %v6478_v11  ;;  %v6573_v11 = vld [vmem:[#allocation14 + $0xedc] ss:$144 sps:$4 sm:$0xff]  }
 0x3ce   :  { %4684 = vmatpush1.bf16.msra.mxu0 %v6481_v12  ;;  %4644 = vmatprep.subr.bf16.mxu1 %v6486_v13  ;;  %v6568_v12 = vld [vmem:[#allocation14 + $0xed0] ss:$144 sps:$4 sm:$0xff]   ;;  %v6571_v13 = vld [vmem:[#allocation14 + $0xed8] ss:$144 sps:$4 sm:$0xff]  }
 0x3cf   :  { %4685 = vmatprep.subr.bf16.mxu0 %v6489_v14  ;;  %v6576_v14 = vld [vmem:[#allocation14 + $0xff4] ss:$144 sps:$4 sm:$0xff]  }
 0x3d1   :  { %4645 = vmatpush1.bf16.msra.mxu1 %v6484_v15  ;;  %v6579_v15 = vld [vmem:[#allocation14 + $0xffc] ss:$144 sps:$4 sm:$0xff]  }
 0x3d2   :  { %4686 = vmatpush1.bf16.msra.mxu0 %v6487_v17  ;;  %4696 = vmatprep.subr.bf16.mxu1 %v6492_v20  ;;  %v6574_v17 = vld [vmem:[#allocation14 + $0xff0] ss:$144 sps:$4 sm:$0xff]   ;;  %v6577_v20 = vld [vmem:[#allocation14 + $0xff8] ss:$144 sps:$4 sm:$0xff]  }
 0x3d3   :  { %4737 = vmatprep.subr.bf16.mxu0 %v6495_v21  ;;  %v6582_v21 = vld [vmem:[#allocation14 + $0x1114] ss:$144 sps:$4 sm:$0xff]  }
 0x3d4   :  { %4647 = vmatmul.mubr.bf16.vlgmr.msra.gmra.mrb[12].mxu1 %v7497_v10 }
 0x3d5   :  { %4688 = vmatmul.mubr.bf16.vlgmr.msra.gmra.mrb[16].mxu0 %v7497_v10  ;;  %4697 = vmatpush1.bf16.msra.mxu1 %v6490_v22  ;;  %v6585_v22 = vld [vmem:[#allocation14 + $0x111c] ss:$144 sps:$4 sm:$0xff]  }
 0x3d6   :  { %4728 = vmatprep.mubr.bf16.mxu1 %v7495_v7  ;;  %4738 = vmatpush1.bf16.msra.mxu0 %v6493_v23  ;;  %v6580_v23 = vld [vmem:[#allocation14 + $0x1110] ss:$144 sps:$4 sm:$0xff]  }
 0x3d7   :  { %4769 = vmatprep.mubr.bf16.mxu0 %v7495_v7  ;;  %4698 = vmatprep.subr.bf16.mxu1 %v6498_v24  ;;  %v6583_v24 = vld [vmem:[#allocation14 + $0x1118] ss:$144 sps:$4 sm:$0xff]  }
 0x3d8   :  { %4739 = vmatprep.subr.bf16.mxu0 %v6501_v25  ;;  %v6588_v25 = vld [vmem:[#allocation14 + $0x44] ss:$144 sps:$4 sm:$0xff]  }
 0x3d9   :  { %4699 = vmatpush1.bf16.msra.mxu1 %v6496_v26  ;;  %v6591_v26 = vld [vmem:[#allocation14 + $0x4c] ss:$144 sps:$4 sm:$0xff]  }
 0x3da   :  { %4740 = vmatpush1.bf16.msra.mxu0 %v6499_v27  ;;  %4700 = vmatprep.subr.bf16.mxu1 %v6504_v28  ;;  %v6586_v27 = vld [vmem:[#allocation14 + $0x40] ss:$144 sps:$4 sm:$0xff]   ;;  %v6589_v28 = vld [vmem:[#allocation14 + $0x48] ss:$144 sps:$4 sm:$0xff]  }
 0x3db   :  { %4741 = vmatprep.subr.bf16.mxu0 %v6507_v29  ;;  %v6594_v29 = vld [vmem:[#allocation14 + $0x164] ss:$144 sps:$4 sm:$0xff]  }
 0x3dd   :  { %4701 = vmatpush1.bf16.msra.mxu1 %v6502_v30  ;;  %v6597_v30 = vld [vmem:[#allocation14 + $0x16c] ss:$144 sps:$4 sm:$0xff]  }
 0x3de   :  { %4742 = vmatpush1.bf16.msra.mxu0 %v6505_v31  ;;  %4702 = vmatprep.subr.bf16.mxu1 %v6510_v32  ;;  %v6592_v31 = vld [vmem:[#allocation14 + $0x160] ss:$144 sps:$4 sm:$0xff]   ;;  %v6595_v32 = vld [vmem:[#allocation14 + $0x168] ss:$144 sps:$4 sm:$0xff]  }
 0x3df   :  { %4743 = vmatprep.subr.bf16.mxu0 %v6513_v33  ;;  %v6600_v33 = vld [vmem:[#allocation14 + $0x284] ss:$144 sps:$4 sm:$0xff]  }
 0x3e1   :  { %4703 = vmatpush1.bf16.msra.mxu1 %v6508_v34  ;;  %v6603_v34 = vld [vmem:[#allocation14 + $0x28c] ss:$144 sps:$4 sm:$0xff]  }
 0x3e2   :  { %4744 = vmatpush1.bf16.msra.mxu0 %v6511_v35  ;;  %4704 = vmatprep.subr.bf16.mxu1 %v6516_v36  ;;  %v6598_v35 = vld [vmem:[#allocation14 + $0x280] ss:$144 sps:$4 sm:$0xff]   ;;  %v6601_v36 = vld [vmem:[#allocation14 + $0x288] ss:$144 sps:$4 sm:$0xff]  }
 0x3e3   :  { %4745 = vmatprep.subr.bf16.mxu0 %v6519_v37  ;;  %v6606_v37 = vld [vmem:[#allocation14 + $0x3a4] ss:$144 sps:$4 sm:$0xff]  }
 0x3e5   :  { %4705 = vmatpush1.bf16.msra.mxu1 %v6514_v38  ;;  %v6609_v38 = vld [vmem:[#allocation14 + $0x3ac] ss:$144 sps:$4 sm:$0xff]  }
 0x3e6   :  { %4746 = vmatpush1.bf16.msra.mxu0 %v6517_v39  ;;  %4706 = vmatprep.subr.bf16.mxu1 %v6522_v40  ;;  %v6604_v39 = vld [vmem:[#allocation14 + $0x3a0] ss:$144 sps:$4 sm:$0xff]   ;;  %v6607_v40 = vld [vmem:[#allocation14 + $0x3a8] ss:$144 sps:$4 sm:$0xff]  }
 0x3e7   :  { %4747 = vmatprep.subr.bf16.mxu0 %v6525_v41  ;;  %v6612_v41 = vld [vmem:[#allocation14 + $0x4c4] ss:$144 sps:$4 sm:$0xff]  }
 0x3e9   :  { %4707 = vmatpush1.bf16.msra.mxu1 %v6520_v42  ;;  %v6615_v42 = vld [vmem:[#allocation14 + $0x4cc] ss:$144 sps:$4 sm:$0xff]  }
 0x3ea   :  { %4748 = vmatpush1.bf16.msra.mxu0 %v6523_v43  ;;  %4708 = vmatprep.subr.bf16.mxu1 %v6528_v44  ;;  %v7518_v43 = vsub.s32 2, %v7481_v16  ;;  %v6610_v44 = vld [vmem:[#allocation14 + $0x4c0] ss:$144 sps:$4 sm:$0xff]  }
 0x3eb   :  { %4749 = vmatprep.subr.bf16.mxu0 %v6531_v45  ;;  %v7520_v45 = vld [vmem:[#allocation16] sm:$0xff] }
 0x3ed   :  { %4709 = vmatpush1.bf16.msra.mxu1 %v6526_v46  ;;  %v7312_v46 = vmov 1983009808  }
 0x3ee   :  { %4750 = vmatpush1.bf16.msra.mxu0 %v6529_v47  ;;  %4710 = vmatprep.subr.bf16.mxu1 %v6534_v48  ;;  %v5227_v47 = vunpack.c.l.s4 %v7312_v46  ;;  %v7523_v48 = vsub.s32 3, %v7481_v16  ;;  %v6658_v46 = vld [vmem:[#allocation14 + $0xdc0] ss:$144 sps:$4 sm:$0xff]  }
 0x3ef   :  { %4751 = vmatprep.subr.bf16.mxu0 %v6537_v49  ;;  %v6613_v49 = vld [vmem:[#allocation14 + $0x4c8] ss:$144 sps:$4 sm:$0xff]  }
 0x3f1   :  { %4711 = vmatpush1.bf16.msra.mxu1 %v6532_v50  ;;  %v6618_v50 = vld [vmem:[#allocation14 + $0x5e4] ss:$144 sps:$4 sm:$0xff]  }
 0x3f2   :  { %4752 = vmatpush1.bf16.msra.mxu0 %v6535_v51  ;;  %4712 = vmatprep.subr.bf16.mxu1 %v6540_v52  ;;  %v6621_v51 = vld [vmem:[#allocation14 + $0x5ec] ss:$144 sps:$4 sm:$0xff]   ;;  %v1393_v52 = vrot.slane %v7520_v45, %v7484_v18 }
 0x3f3   :  { %4753 = vmatprep.subr.bf16.mxu0 %v6543_v53  ;;  %v1401_v53 = vrot.slane %v7520_v45, %v7518_v43 }
 0x3f5   :  { %4713 = vmatpush1.bf16.msra.mxu1 %v6538_v54  ;;  %v6616_v54 = vld [vmem:[#allocation14 + $0x5e0] ss:$144 sps:$4 sm:$0xff]  }
 0x3f6   :  { %4754 = vmatpush1.bf16.msra.mxu0 %v6541_v55  ;;  %4714 = vmatprep.subr.bf16.mxu1 %v6546_v56  ;;  %v1397_v55 = vrot.slane %v7520_v45, %v7487_v19  ;;  %v5228_v56 = vunpack.c.0.s8 %v5227_v47  ;;  %v6661_v47 = vld [vmem:[#allocation14 + $0xdc8] ss:$144 sps:$4 sm:$0xff]  }
 0x3f7   :  { %4755 = vmatprep.subr.bf16.mxu0 %v6549_v57  ;;  %v1405_v57 = vrot.slane %v7520_v45, %v7523_v48 }
 0x3f9   :  { %4715 = vmatpush1.bf16.msra.mxu1 %v6544_v58  ;;  %v6619_v58 = vld [vmem:[#allocation14 + $0x5e8] ss:$144 sps:$4 sm:$0xff]  }
 0x3fa   :  { %4756 = vmatpush1.bf16.msra.mxu0 %v6547_v59  ;;  %4716 = vmatprep.subr.bf16.mxu1 %v6552_v60  ;;  %v6624_v59 = vld [vmem:[#allocation14 + $0x704] ss:$144 sps:$4 sm:$0xff]  }
 0x3fb   :  { %4757 = vmatprep.subr.bf16.mxu0 %v6555_v61 }
 0x3fd   :  { %4717 = vmatpush1.bf16.msra.mxu1 %v6550_v62  ;;  %v6627_v62 = vld [vmem:[#allocation14 + $0x70c] ss:$144 sps:$4 sm:$0xff]  }
 0x3fe   :  { %4758 = vmatpush1.bf16.msra.mxu0 %v6553_v63  ;;  %4718 = vmatprep.subr.bf16.mxu1 %v6558_v0 }
 0x3ff   :  { %4759 = vmatprep.subr.bf16.mxu0 %v6561_v1 }
 0x401   :  { %4719 = vmatpush1.bf16.msra.mxu1 %v6556_v2 }
 0x402   :  { %4760 = vmatpush1.bf16.msra.mxu0 %v6559_v3  ;;  %4720 = vmatprep.subr.bf16.mxu1 %v6564_v4  ;;  %v7534_v4 = vsub.s32 %v5228_v56, %v7481_v16  ;;  %v6673_v56 = vld [vmem:[#allocation14 + $0x1008] ss:$144 sps:$4 sm:$0xff]  }
 0x403   :  { %4761 = vmatprep.subr.bf16.mxu0 %v6567_v5 }
 0x405   :  { %4721 = vmatpush1.bf16.msra.mxu1 %v6562_v6 }
 0x406   :  { %4762 = vmatpush1.bf16.msra.mxu0 %v6565_v8  ;;  %4722 = vmatprep.subr.bf16.mxu1 %v6570_v9  ;;  %v6622_v9 = vld [vmem:[#allocation14 + $0x700] ss:$144 sps:$4 sm:$0xff]  }
 0x407   :  { %4763 = vmatprep.subr.bf16.mxu0 %v6573_v11 }
 0x409   :  { %4723 = vmatpush1.bf16.msra.mxu1 %v6568_v12 }
 0x40a   :  { %4764 = vmatpush1.bf16.msra.mxu0 %v6571_v13  ;;  %4724 = vmatprep.subr.bf16.mxu1 %v6576_v14  ;;  %v6625_v13 = vld [vmem:[#allocation14 + $0x708] ss:$144 sps:$4 sm:$0xff]   ;;  %v6630_v14 = vld [vmem:[#allocation14 + $0x824] ss:$144 sps:$4 sm:$0xff]  }
 0x40b   :  { %4765 = vmatprep.subr.bf16.mxu0 %v6579_v15 }
 0x40d   :  { %4725 = vmatpush1.bf16.msra.mxu1 %v6574_v17 }
 0x40e   :  { %4766 = vmatpush1.bf16.msra.mxu0 %v6577_v20  ;;  %4726 = vmatprep.subr.bf16.mxu1 %v6582_v21  ;;  %v6633_v20 = vld [vmem:[#allocation14 + $0x82c] ss:$144 sps:$4 sm:$0xff]  }
 0x40f   :  { %4767 = vmatprep.subr.bf16.mxu0 %v6585_v22 }
 0x411   :  { %4727 = vmatpush1.bf16.msra.mxu1 %v6580_v23  ;;  %v6628_v23 = vld [vmem:[#allocation14 + $0x820] ss:$144 sps:$4 sm:$0xff]  }
 0x412   :  { %4768 = vmatpush1.bf16.msra.mxu0 %v6583_v24  ;;  %4778 = vmatprep.subr.bf16.mxu1 %v6588_v25  ;;  %v6631_v24 = vld [vmem:[#allocation14 + $0x828] ss:$144 sps:$4 sm:$0xff]   ;;  %v6636_v25 = vld [vmem:[#allocation14 + $0x944] ss:$144 sps:$4 sm:$0xff]  }
 0x413   :  { %4819 = vmatprep.subr.bf16.mxu0 %v6591_v26 }
 0x414   :  { %4729 = vmatmul.mubr.bf16.vlgmr.msra.gmra.mrb[16].mxu1 %v7497_v10 }
 0x415   :  { %4770 = vmatmul.mubr.bf16.vlgmr.msra.gmra.mrb[20].mxu0 %v7497_v10  ;;  %4779 = vmatpush1.bf16.msra.mxu1 %v6586_v27  ;;  %v6639_v27 = vld [vmem:[#allocation14 + $0x94c] ss:$144 sps:$4 sm:$0xff]  }
 0x416   :  { %4810 = vmatprep.mubr.bf16.mxu1 %v7495_v7  ;;  %4820 = vmatpush1.bf16.msra.mxu0 %v6589_v28  ;;  %v6634_v28 = vld [vmem:[#allocation14 + $0x940] ss:$144 sps:$4 sm:$0xff]  }
 0x417   :  { %4851 = vmatprep.mubr.bf16.mxu0 %v7495_v7  ;;  %4780 = vmatprep.subr.bf16.mxu1 %v6594_v29  ;;  %v6637_v29 = vld [vmem:[#allocation14 + $0x948] ss:$144 sps:$4 sm:$0xff]  }
 0x418   :  { %4821 = vmatprep.subr.bf16.mxu0 %v6597_v30  ;;  %v6642_v30 = vld [vmem:[#allocation14 + $0xa64] ss:$144 sps:$4 sm:$0xff]  }
 0x419   :  { %4781 = vmatpush1.bf16.msra.mxu1 %v6592_v31  ;;  %v6645_v31 = vld [vmem:[#allocation14 + $0xa6c] ss:$144 sps:$4 sm:$0xff]  }
 0x41a   :  { %4822 = vmatpush1.bf16.msra.mxu0 %v6595_v32  ;;  %4782 = vmatprep.subr.bf16.mxu1 %v6600_v33  ;;  %v6640_v32 = vld [vmem:[#allocation14 + $0xa60] ss:$144 sps:$4 sm:$0xff]   ;;  %v6643_v33 = vld [vmem:[#allocation14 + $0xa68] ss:$144 sps:$4 sm:$0xff]  }
 0x41b   :  { %4823 = vmatprep.subr.bf16.mxu0 %v6603_v34  ;;  %v6648_v34 = vld [vmem:[#allocation14 + $0xb84] ss:$144 sps:$4 sm:$0xff]  }
 0x41d   :  { %4783 = vmatpush1.bf16.msra.mxu1 %v6598_v35  ;;  %v6651_v35 = vld [vmem:[#allocation14 + $0xb8c] ss:$144 sps:$4 sm:$0xff]  }
 0x41e   :  { %4824 = vmatpush1.bf16.msra.mxu0 %v6601_v36  ;;  %4784 = vmatprep.subr.bf16.mxu1 %v6606_v37  ;;  %v6646_v36 = vld [vmem:[#allocation14 + $0xb80] ss:$144 sps:$4 sm:$0xff]   ;;  %v6649_v37 = vld [vmem:[#allocation14 + $0xb88] ss:$144 sps:$4 sm:$0xff]  }
 0x41f   :  { %4825 = vmatprep.subr.bf16.mxu0 %v6609_v38  ;;  %v6654_v38 = vld [vmem:[#allocation14 + $0xca4] ss:$144 sps:$4 sm:$0xff]  }
 0x421   :  { %4785 = vmatpush1.bf16.msra.mxu1 %v6604_v39  ;;  %v6657_v39 = vld [vmem:[#allocation14 + $0xcac] ss:$144 sps:$4 sm:$0xff]  }
 0x422   :  { %4826 = vmatpush1.bf16.msra.mxu0 %v6607_v40  ;;  %4786 = vmatprep.subr.bf16.mxu1 %v6612_v41  ;;  %v6652_v40 = vld [vmem:[#allocation14 + $0xca0] ss:$144 sps:$4 sm:$0xff]   ;;  %v6655_v41 = vld [vmem:[#allocation14 + $0xca8] ss:$144 sps:$4 sm:$0xff]  }
 0x423   :  { %4827 = vmatprep.subr.bf16.mxu0 %v6615_v42  ;;  %v6660_v42 = vld [vmem:[#allocation14 + $0xdc4] ss:$144 sps:$4 sm:$0xff]  }
 0x425   :  { %4787 = vmatpush1.bf16.msra.mxu1 %v6610_v44  ;;  %v6663_v44 = vld [vmem:[#allocation14 + $0xdcc] ss:$144 sps:$4 sm:$0xff]  }
 0x426   :  { %4828 = vmatpush1.bf16.msra.mxu0 %v6613_v49  ;;  %4788 = vmatprep.subr.bf16.mxu1 %v6618_v50  ;;  %v6666_v49 = vld [vmem:[#allocation14 + $0xee4] ss:$144 sps:$4 sm:$0xff]   ;;  %v6669_v50 = vld [vmem:[#allocation14 + $0xeec] ss:$144 sps:$4 sm:$0xff]  }
 0x427   :  { %v4484_v60 = vpop.f32.mrb[4].mxu1  ;;  %v4525_v61 = vpop.f32.mrb[8].mxu0  ;;  %4829 = vmatprep.subr.bf16.mxu0 %v6621_v51  ;;  %v6664_v51 = vld [vmem:[#allocation14 + $0xee0] ss:$144 sps:$4 sm:$0xff]  }
 0x428   :  { %v4485_v63 = vadd.f32 %v4484_v60, %v1393_v52  ;;  %v4526_v0 = vadd.f32 %v4525_v61, %v1401_v53  ;;  %v4486_v1 = vpop.f32.mrb[5].mxu1  ;;  %v4527_v2 = vpop.f32.mrb[9].mxu0  ;;  %v6667_v52 = vld [vmem:[#allocation14 + $0xee8] ss:$144 sps:$4 sm:$0xff]   ;;  %v6672_v53 = vld [vmem:[#allocation14 + $0x1004] ss:$144 sps:$4 sm:$0xff]  }
 0x429   :  { %v4487_v3 = vadd.f32 %v4486_v1, %v1397_v55  ;;  %v4528_v5 = vadd.f32 %v4527_v2, %v1405_v57  ;;  %4789 = vmatpush1.bf16.msra.mxu1 %v6616_v54  ;;  %v4488_v6 = vpop.f32.mrb[6].mxu1  ;;  %v4529_v8 = vpop.f32.mrb[10].mxu0  ;;  %v6675_v54 = vld [vmem:[#allocation14 + $0x100c] ss:$144 sps:$4 sm:$0xff]   ;;  %v6670_v55 = vld [vmem:[#allocation14 + $0x1000] ss:$144 sps:$4 sm:$0xff]  }
 0x42a   :  { %4830 = vmatpush1.bf16.msra.mxu0 %v6619_v58  ;;  %v4489_v11 = vpop.f32.mrb[7].mxu1  ;;  %v4530_v12 = vpop.f32.mrb[11].mxu0  ;;  %4790 = vmatprep.subr.bf16.mxu1 %v6624_v59  ;;  %v6678_v57 = vld [vmem:[#allocation14 + $0x1124] ss:$144 sps:$4 sm:$0xff]   ;;  %v6681_v58 = vld [vmem:[#allocation14 + $0x112c] ss:$144 sps:$4 sm:$0xff]  }
 0x42b   :  { %v5224_v15 = vcombine.low %v4485_v63, %v4487_v3  ;;  %v5225_v17 = vcombine.low %v4526_v0, %v4528_v5  ;;  %4831 = vmatprep.subr.bf16.mxu0 %v6627_v62  ;;  %v6676_v59 = vld [vmem:[#allocation14 + $0x1120] ss:$144 sps:$4 sm:$0xff]   ;;  %v6679_v60 = vld [vmem:[#allocation14 + $0x1128] ss:$144 sps:$4 sm:$0xff]   ;;  %v6684_v61 = vld [vmem:[#allocation14 + $0x54] ss:$144 sps:$4 sm:$0xff]  }
 0x42c   :  { %v6687_v62 = vld [vmem:[#allocation14 + $0x5c] ss:$144 sps:$4 sm:$0xff]   ;;  %v6682_v63 = vld [vmem:[#allocation14 + $0x50] ss:$144 sps:$4 sm:$0xff]   ;;  %v6685_v0 = vld [vmem:[#allocation14 + $0x58] ss:$144 sps:$4 sm:$0xff]  }
 0x42d   :  { %v5232_v21 = vrot.slane %v5224_v15, %v7534_v4  ;;  %v5239_v22 = vrot.slane %v5225_v17, %v7534_v4  ;;  %4791 = vmatpush1.bf16.msra.mxu1 %v6622_v9  ;;  %v6690_v1 = vld [vmem:[#allocation14 + $0x174] ss:$144 sps:$4 sm:$0xff]   ;;  %v6693_v2 = vld [vmem:[#allocation14 + $0x17c] ss:$144 sps:$4 sm:$0xff]   ;;  %v6688_v3 = vld [vmem:[#allocation14 + $0x170] ss:$144 sps:$4 sm:$0xff]  }
 0x42e   :  { %4832 = vmatpush1.bf16.msra.mxu0 %v6625_v13  ;;  %4792 = vmatprep.subr.bf16.mxu1 %v6630_v14  ;;  %v6691_v5 = vld [vmem:[#allocation14 + $0x178] ss:$144 sps:$4 sm:$0xff]   ;;  %v6696_v6 = vld [vmem:[#allocation14 + $0x294] ss:$144 sps:$4 sm:$0xff]   ;;  %v6699_v8 = vld [vmem:[#allocation14 + $0x29c] ss:$144 sps:$4 sm:$0xff]  }
 0x42f   :  { %v5240_v26 = vcombine.low %v5232_v21, %v5239_v22  ;;  %4833 = vmatprep.subr.bf16.mxu0 %v6633_v20  ;;  %v6694_v9 = vld [vmem:[#allocation14 + $0x290] ss:$144 sps:$4 sm:$0xff]   ;;  %v6697_v11 = vld [vmem:[#allocation14 + $0x298] ss:$144 sps:$4 sm:$0xff]   ;;  %v6702_v12 = vld [vmem:[#allocation14 + $0x3b4] ss:$144 sps:$4 sm:$0xff]  }
 0x430   :  { %v6705_v13 = vld [vmem:[#allocation14 + $0x3bc] ss:$144 sps:$4 sm:$0xff]   ;;  %v6700_v14 = vld [vmem:[#allocation14 + $0x3b0] ss:$144 sps:$4 sm:$0xff]   ;;  %v6703_v15 = vld [vmem:[#allocation14 + $0x3b8] ss:$144 sps:$4 sm:$0xff]  }
 0x431   :  { %5386 = vst [vmem:[#allocation17] sm:$0xff] %v5240_v26  ;;  %4793 = vmatpush1.bf16.msra.mxu1 %v6628_v23  ;;  %v6708_v17 = vld [vmem:[#allocation14 + $0x4d4] ss:$144 sps:$4 sm:$0xff]   ;;  %v6711_v20 = vld [vmem:[#allocation14 + $0x4dc] ss:$144 sps:$4 sm:$0xff]   ;;  %v7543_v21 = vsub.s32 4, %v7481_v16 }
 0x432   :  { %4834 = vmatpush1.bf16.msra.mxu0 %v6631_v24  ;;  %4794 = vmatprep.subr.bf16.mxu1 %v6636_v25  ;;  %v7546_v22 = vsub.s32 6, %v7481_v16  ;;  %v6706_v23 = vld [vmem:[#allocation14 + $0x4d0] ss:$144 sps:$4 sm:$0xff]   ;;  %v7549_v24 = vsub.s32 5, %v7481_v16  ;;  %v7552_v25 = vsub.s32 7, %v7481_v16 }
 0x433   :  { %4835 = vmatprep.subr.bf16.mxu0 %v6639_v27  ;;  %v6709_v26 = vld [vmem:[#allocation14 + $0x4d8] ss:$144 sps:$4 sm:$0xff]   ;;  %v6714_v27 = vld [vmem:[#allocation14 + $0x5f4] ss:$144 sps:$4 sm:$0xff]  }
 0x434   :  { %v1421_v16 = vrot.slane %v7520_v45, %v7552_v25 }
 0x435   :  { %4795 = vmatpush1.bf16.msra.mxu1 %v6634_v28  ;;  %v6717_v28 = vld [vmem:[#allocation14 + $0x5fc] ss:$144 sps:$4 sm:$0xff]  }
 0x436   :  { %4836 = vmatpush1.bf16.msra.mxu0 %v6637_v29  ;;  %4796 = vmatprep.subr.bf16.mxu1 %v6642_v30  ;;  %v1409_v29 = vrot.slane %v7520_v45, %v7543_v21  ;;  %v1417_v30 = vrot.slane %v7520_v45, %v7546_v22 }
 0x437   :  { %4837 = vmatprep.subr.bf16.mxu0 %v6645_v31  ;;  %v1413_v31 = vrot.slane %v7520_v45, %v7549_v24 }
 0x439   :  { %4797 = vmatpush1.bf16.msra.mxu1 %v6640_v32  ;;  %v6712_v32 = vld [vmem:[#allocation14 + $0x5f0] ss:$144 sps:$4 sm:$0xff]  }
 0x43a   :  { %4838 = vmatpush1.bf16.msra.mxu0 %v6643_v33  ;;  %4798 = vmatprep.subr.bf16.mxu1 %v6648_v34  ;;  %v6715_v33 = vld [vmem:[#allocation14 + $0x5f8] ss:$144 sps:$4 sm:$0xff]   ;;  %v6720_v34 = vld [vmem:[#allocation14 + $0x714] ss:$144 sps:$4 sm:$0xff]  }
 0x43b   :  { %4839 = vmatprep.subr.bf16.mxu0 %v6651_v35 }
 0x43d   :  { %4799 = vmatpush1.bf16.msra.mxu1 %v6646_v36 }
 0x43e   :  { %4840 = vmatpush1.bf16.msra.mxu0 %v6649_v37  ;;  %4800 = vmatprep.subr.bf16.mxu1 %v6654_v38  ;;  %v6723_v37 = vld [vmem:[#allocation14 + $0x71c] ss:$144 sps:$4 sm:$0xff]  }
 0x43f   :  { %4841 = vmatprep.subr.bf16.mxu0 %v6657_v39 }
 0x441   :  { %4801 = vmatpush1.bf16.msra.mxu1 %v6652_v40 }
 0x442   :  { %4842 = vmatpush1.bf16.msra.mxu0 %v6655_v41  ;;  %4802 = vmatprep.subr.bf16.mxu1 %v6660_v42 }
 0x443   :  { %4843 = vmatprep.subr.bf16.mxu0 %v6663_v44 }
 0x445   :  { %4803 = vmatpush1.bf16.msra.mxu1 %v6658_v46 }
 0x446   :  { %4844 = vmatpush1.bf16.msra.mxu0 %v6661_v47  ;;  %4804 = vmatprep.subr.bf16.mxu1 %v6666_v49  ;;  %v6718_v49 = vld [vmem:[#allocation14 + $0x710] ss:$144 sps:$4 sm:$0xff]  }
 0x447   :  { %4845 = vmatprep.subr.bf16.mxu0 %v6669_v50 }
 0x449   :  { %4805 = vmatpush1.bf16.msra.mxu1 %v6664_v51  ;;  %v6721_v51 = vld [vmem:[#allocation14 + $0x718] ss:$144 sps:$4 sm:$0xff]  }
 0x44a   :  { %4846 = vmatpush1.bf16.msra.mxu0 %v6667_v52  ;;  %4806 = vmatprep.subr.bf16.mxu1 %v6672_v53  ;;  %v6726_v52 = vld [vmem:[#allocation14 + $0x834] ss:$144 sps:$4 sm:$0xff]  }
 0x44b   :  { %4847 = vmatprep.subr.bf16.mxu0 %v6675_v54 }
 0x44d   :  { %4807 = vmatpush1.bf16.msra.mxu1 %v6670_v55  ;;  %v6729_v55 = vld [vmem:[#allocation14 + $0x83c] ss:$144 sps:$4 sm:$0xff]  }
 0x44e   :  { %4848 = vmatpush1.bf16.msra.mxu0 %v6673_v56  ;;  %4808 = vmatprep.subr.bf16.mxu1 %v6678_v57 }
 0x44f   :  { %4849 = vmatprep.subr.bf16.mxu0 %v6681_v58  ;;  %v6724_v58 = vld [vmem:[#allocation14 + $0x830] ss:$144 sps:$4 sm:$0xff]  }
 0x451   :  { %4809 = vmatpush1.bf16.msra.mxu1 %v6676_v59  ;;  %v6727_v59 = vld [vmem:[#allocation14 + $0x838] ss:$144 sps:$4 sm:$0xff]  }
 0x452   :  { %4850 = vmatpush1.bf16.msra.mxu0 %v6679_v60  ;;  %4860 = vmatprep.subr.bf16.mxu1 %v6684_v61  ;;  %v6732_v60 = vld [vmem:[#allocation14 + $0x954] ss:$144 sps:$4 sm:$0xff]  }
 0x453   :  { %4901 = vmatprep.subr.bf16.mxu0 %v6687_v62  ;;  %v6735_v62 = vld [vmem:[#allocation14 + $0x95c] ss:$144 sps:$4 sm:$0xff]  }
 0x454   :  { %4811 = vmatmul.mubr.bf16.vlgmr.msra.gmra.mrb[20].mxu1 %v7497_v10 }
 0x455   :  { %4852 = vmatmul.mubr.bf16.vlgmr.msra.gmra.mrb[24].mxu0 %v7497_v10  ;;  %4861 = vmatpush1.bf16.msra.mxu1 %v6682_v63  ;;  %v6730_v63 = vld [vmem:[#allocation14 + $0x950] ss:$144 sps:$4 sm:$0xff]  }
 0x456   :  { %4892 = vmatprep.mubr.bf16.mxu1 %v7495_v7  ;;  %4902 = vmatpush1.bf16.msra.mxu0 %v6685_v0  ;;  %v6733_v0 = vld [vmem:[#allocation14 + $0x958] ss:$144 sps:$4 sm:$0xff]  }
 0x457   :  { %4933 = vmatprep.mubr.bf16.mxu0 %v7495_v7  ;;  %4862 = vmatprep.subr.bf16.mxu1 %v6690_v1  ;;  %v6738_v1 = vld [vmem:[#allocation14 + $0xa74] ss:$144 sps:$4 sm:$0xff]  }
 0x458   :  { %4903 = vmatprep.subr.bf16.mxu0 %v6693_v2  ;;  %v6741_v2 = vld [vmem:[#allocation14 + $0xa7c] ss:$144 sps:$4 sm:$0xff]  }
 0x459   :  { %4863 = vmatpush1.bf16.msra.mxu1 %v6688_v3  ;;  %v6736_v3 = vld [vmem:[#allocation14 + $0xa70] ss:$144 sps:$4 sm:$0xff]  }
 0x45a   :  { %4904 = vmatpush1.bf16.msra.mxu0 %v6691_v5  ;;  %4864 = vmatprep.subr.bf16.mxu1 %v6696_v6  ;;  %v6739_v5 = vld [vmem:[#allocation14 + $0xa78] ss:$144 sps:$4 sm:$0xff]   ;;  %v6744_v6 = vld [vmem:[#allocation14 + $0xb94] ss:$144 sps:$4 sm:$0xff]  }
 0x45b   :  { %4905 = vmatprep.subr.bf16.mxu0 %v6699_v8  ;;  %v6747_v8 = vld [vmem:[#allocation14 + $0xb9c] ss:$144 sps:$4 sm:$0xff]  }
 0x45d   :  { %4865 = vmatpush1.bf16.msra.mxu1 %v6694_v9  ;;  %v6742_v9 = vld [vmem:[#allocation14 + $0xb90] ss:$144 sps:$4 sm:$0xff]  }
 0x45e   :  { %4906 = vmatpush1.bf16.msra.mxu0 %v6697_v11  ;;  %4866 = vmatprep.subr.bf16.mxu1 %v6702_v12  ;;  %v6745_v11 = vld [vmem:[#allocation14 + $0xb98] ss:$144 sps:$4 sm:$0xff]   ;;  %v6750_v12 = vld [vmem:[#allocation14 + $0xcb4] ss:$144 sps:$4 sm:$0xff]  }
 0x45f   :  { %4907 = vmatprep.subr.bf16.mxu0 %v6705_v13  ;;  %v6753_v13 = vld [vmem:[#allocation14 + $0xcbc] ss:$144 sps:$4 sm:$0xff]  }
 0x461   :  { %4867 = vmatpush1.bf16.msra.mxu1 %v6700_v14  ;;  %v6748_v14 = vld [vmem:[#allocation14 + $0xcb0] ss:$144 sps:$4 sm:$0xff]  }
 0x462   :  { %4908 = vmatpush1.bf16.msra.mxu0 %v6703_v15  ;;  %4868 = vmatprep.subr.bf16.mxu1 %v6708_v17  ;;  %v6751_v15 = vld [vmem:[#allocation14 + $0xcb8] ss:$144 sps:$4 sm:$0xff]   ;;  %v6756_v17 = vld [vmem:[#allocation14 + $0xdd4] ss:$144 sps:$4 sm:$0xff]  }
 0x463   :  { %4909 = vmatprep.subr.bf16.mxu0 %v6711_v20  ;;  %v6759_v20 = vld [vmem:[#allocation14 + $0xddc] ss:$144 sps:$4 sm:$0xff]  }
 0x465   :  { %4869 = vmatpush1.bf16.msra.mxu1 %v6706_v23  ;;  %v6754_v23 = vld [vmem:[#allocation14 + $0xdd0] ss:$144 sps:$4 sm:$0xff]  }
 0x466   :  { %4910 = vmatpush1.bf16.msra.mxu0 %v6709_v26  ;;  %4870 = vmatprep.subr.bf16.mxu1 %v6714_v27  ;;  %v6757_v26 = vld [vmem:[#allocation14 + $0xdd8] ss:$144 sps:$4 sm:$0xff]   ;;  %v6762_v27 = vld [vmem:[#allocation14 + $0xef4] ss:$144 sps:$4 sm:$0xff]  }
 0x467   :  { %v4566_v35 = vpop.f32.mrb[8].mxu1  ;;  %v4607_v36 = vpop.f32.mrb[12].mxu0  ;;  %4911 = vmatprep.subr.bf16.mxu0 %v6717_v28  ;;  %v6765_v28 = vld [vmem:[#allocation14 + $0xefc] ss:$144 sps:$4 sm:$0xff]  }
 0x468   :  { %v4567_v38 = vadd.f32 %v4566_v35, %v1409_v29  ;;  %v4608_v39 = vadd.f32 %v4607_v36, %v1417_v30  ;;  %v4568_v40 = vpop.f32.mrb[9].mxu1  ;;  %v4609_v41 = vpop.f32.mrb[13].mxu0  ;;  %v6760_v29 = vld [vmem:[#allocation14 + $0xef0] ss:$144 sps:$4 sm:$0xff]   ;;  %v6763_v30 = vld [vmem:[#allocation14 + $0xef8] ss:$144 sps:$4 sm:$0xff]  }
 0x469   :  { %v4569_v42 = vadd.f32 %v4568_v40, %v1413_v31  ;;  %v4610_v44 = vadd.f32 %v4609_v41, %v1421_v16  ;;  %v4570_v46 = vpop.f32.mrb[10].mxu1  ;;  %v4611_v47 = vpop.f32.mrb[14].mxu0  ;;  %4871 = vmatpush1.bf16.msra.mxu1 %v6712_v32  ;;  %v6768_v31 = vld [vmem:[#allocation14 + $0x1014] ss:$144 sps:$4 sm:$0xff]   ;;  %v6771_v16 = vld [vmem:[#allocation14 + $0x101c] ss:$144 sps:$4 sm:$0xff]  }
 0x46a   :  { %4912 = vmatpush1.bf16.msra.mxu0 %v6715_v33  ;;  %v4571_v45 = vpop.f32.mrb[11].mxu1  ;;  %v4612_v50 = vpop.f32.mrb[15].mxu0  ;;  %4872 = vmatprep.subr.bf16.mxu1 %v6720_v34  ;;  %v6766_v32 = vld [vmem:[#allocation14 + $0x1010] ss:$144 sps:$4 sm:$0xff]   ;;  %v6769_v33 = vld [vmem:[#allocation14 + $0x1018] ss:$144 sps:$4 sm:$0xff]  }
 0x46b   :  { %v5241_v53 = vcombine.low %v4567_v38, %v4569_v42  ;;  %v5242_v54 = vcombine.low %v4608_v39, %v4610_v44  ;;  %4913 = vmatprep.subr.bf16.mxu0 %v6723_v37  ;;  %v6774_v34 = vld [vmem:[#allocation14 + $0x1134] ss:$144 sps:$4 sm:$0xff]   ;;  %v6777_v35 = vld [vmem:[#allocation14 + $0x113c] ss:$144 sps:$4 sm:$0xff]   ;;  %v6772_v36 = vld [vmem:[#allocation14 + $0x1130] ss:$144 sps:$4 sm:$0xff]  }
 0x46c   :  { %v6775_v37 = vld [vmem:[#allocation14 + $0x1138] ss:$144 sps:$4 sm:$0xff]   ;;  %v6780_v38 = vld [vmem:[#allocation14 + $0x64] ss:$144 sps:$4 sm:$0xff]   ;;  %v6783_v39 = vld [vmem:[#allocation14 + $0x6c] ss:$144 sps:$4 sm:$0xff]  }
 0x46d   :  { %v5249_v56 = vrot.slane %v5241_v53, %v7534_v4  ;;  %v5256_v57 = vrot.slane %v5242_v54, %v7534_v4  ;;  %4873 = vmatpush1.bf16.msra.mxu1 %v6718_v49  ;;  %v6778_v40 = vld [vmem:[#allocation14 + $0x60] ss:$144 sps:$4 sm:$0xff]   ;;  %v6781_v41 = vld [vmem:[#allocation14 + $0x68] ss:$144 sps:$4 sm:$0xff]   ;;  %v6786_v42 = vld [vmem:[#allocation14 + $0x184] ss:$144 sps:$4 sm:$0xff]  }
 0x46e   :  { %4914 = vmatpush1.bf16.msra.mxu0 %v6721_v51  ;;  %4874 = vmatprep.subr.bf16.mxu1 %v6726_v52  ;;  %v6789_v44 = vld [vmem:[#allocation14 + $0x18c] ss:$144 sps:$4 sm:$0xff]   ;;  %v6784_v46 = vld [vmem:[#allocation14 + $0x180] ss:$144 sps:$4 sm:$0xff]   ;;  %v6787_v47 = vld [vmem:[#allocation14 + $0x188] ss:$144 sps:$4 sm:$0xff]  }
 0x46f   :  { %v5257_v61 = vcombine.low %v5249_v56, %v5256_v57  ;;  %4915 = vmatprep.subr.bf16.mxu0 %v6729_v55  ;;  %v6792_v49 = vld [vmem:[#allocation14 + $0x2a4] ss:$144 sps:$4 sm:$0xff]   ;;  %v6795_v45 = vld [vmem:[#allocation14 + $0x2ac] ss:$144 sps:$4 sm:$0xff]   ;;  %v6790_v50 = vld [vmem:[#allocation14 + $0x2a0] ss:$144 sps:$4 sm:$0xff]  }
 0x470   :  { %v6793_v51 = vld [vmem:[#allocation14 + $0x2a8] ss:$144 sps:$4 sm:$0xff]   ;;  %v6798_v52 = vld [vmem:[#allocation14 + $0x3c4] ss:$144 sps:$4 sm:$0xff]   ;;  %v6801_v53 = vld [vmem:[#allocation14 + $0x3cc] ss:$144 sps:$4 sm:$0xff]  }
 0x471   :  { %5387 = vst [vmem:[#allocation17 + $0x8] sm:$0xff] %v5257_v61  ;;  %4875 = vmatpush1.bf16.msra.mxu1 %v6724_v58  ;;  %v6796_v54 = vld [vmem:[#allocation14 + $0x3c0] ss:$144 sps:$4 sm:$0xff]   ;;  %v6799_v55 = vld [vmem:[#allocation14 + $0x3c8] ss:$144 sps:$4 sm:$0xff]  }
 0x472   :  { %4916 = vmatpush1.bf16.msra.mxu0 %v6727_v59  ;;  %4876 = vmatprep.subr.bf16.mxu1 %v6732_v60  ;;  %v6804_v56 = vld [vmem:[#allocation14 + $0x4e4] ss:$144 sps:$4 sm:$0xff]   ;;  %v6807_v57 = vld [vmem:[#allocation14 + $0x4ec] ss:$144 sps:$4 sm:$0xff]   ;;  %v6802_v58 = vld [vmem:[#allocation14 + $0x4e0] ss:$144 sps:$4 sm:$0xff]  }
 0x473   :  { %4917 = vmatprep.subr.bf16.mxu0 %v6735_v62  ;;  %v7568_v59 = vld [vmem:[#allocation16 + $0x8] sm:$0xff]  ;;  %v6810_v61 = vld [vmem:[#allocation14 + $0x604] ss:$144 sps:$4 sm:$0xff]  }
 0x474   :  { %v6805_v60 = vld [vmem:[#allocation14 + $0x4e8] ss:$144 sps:$4 sm:$0xff]   ;;  %v6813_v62 = vld [vmem:[#allocation14 + $0x60c] ss:$144 sps:$4 sm:$0xff]  }
 0x475   :  { %4877 = vmatpush1.bf16.msra.mxu1 %v6730_v63  ;;  %v1425_v63 = vrot.slane %v7568_v59, %v7484_v18 }
 0x476   :  { %4918 = vmatpush1.bf16.msra.mxu0 %v6733_v0  ;;  %4878 = vmatprep.subr.bf16.mxu1 %v6738_v1  ;;  %v1433_v0 = vrot.slane %v7568_v59, %v7518_v43  ;;  %v1429_v1 = vrot.slane %v7568_v59, %v7487_v19 }
 0x477   :  { %4919 = vmatprep.subr.bf16.mxu0 %v6741_v2  ;;  %v6808_v2 = vld [vmem:[#allocation14 + $0x600] ss:$144 sps:$4 sm:$0xff]  }
 0x479   :  { %4879 = vmatpush1.bf16.msra.mxu1 %v6736_v3  ;;  %v1437_v3 = vrot.slane %v7568_v59, %v7523_v48 }
 0x47a   :  { %4920 = vmatpush1.bf16.msra.mxu0 %v6739_v5  ;;  %4880 = vmatprep.subr.bf16.mxu1 %v6744_v6  ;;  %v6811_v5 = vld [vmem:[#allocation14 + $0x608] ss:$144 sps:$4 sm:$0xff]   ;;  %v6816_v6 = vld [vmem:[#allocation14 + $0x724] ss:$144 sps:$4 sm:$0xff]  }
 0x47b   :  { %4921 = vmatprep.subr.bf16.mxu0 %v6747_v8 }
 0x47d   :  { %4881 = vmatpush1.bf16.msra.mxu1 %v6742_v9  ;;  %v6819_v9 = vld [vmem:[#allocation14 + $0x72c] ss:$144 sps:$4 sm:$0xff]  }
 0x47e   :  { %4922 = vmatpush1.bf16.msra.mxu0 %v6745_v11  ;;  %4882 = vmatprep.subr.bf16.mxu1 %v6750_v12 }
 0x47f   :  { %4923 = vmatprep.subr.bf16.mxu0 %v6753_v13 }
 0x481   :  { %4883 = vmatpush1.bf16.msra.mxu1 %v6748_v14 }
 0x482   :  { %4924 = vmatpush1.bf16.msra.mxu0 %v6751_v15  ;;  %4884 = vmatprep.subr.bf16.mxu1 %v6756_v17 }
 0x483   :  { %4925 = vmatprep.subr.bf16.mxu0 %v6759_v20 }
 0x485   :  { %4885 = vmatpush1.bf16.msra.mxu1 %v6754_v23  ;;  %v6814_v23 = vld [vmem:[#allocation14 + $0x720] ss:$144 sps:$4 sm:$0xff]  }
 0x486   :  { %4926 = vmatpush1.bf16.msra.mxu0 %v6757_v26  ;;  %4886 = vmatprep.subr.bf16.mxu1 %v6762_v27 }
 0x487   :  { %4927 = vmatprep.subr.bf16.mxu0 %v6765_v28 }
 0x489   :  { %4887 = vmatpush1.bf16.msra.mxu1 %v6760_v29  ;;  %v6817_v29 = vld [vmem:[#allocation14 + $0x728] ss:$144 sps:$4 sm:$0xff]  }
 0x48a   :  { %4928 = vmatpush1.bf16.msra.mxu0 %v6763_v30  ;;  %4888 = vmatprep.subr.bf16.mxu1 %v6768_v31  ;;  %v6822_v30 = vld [vmem:[#allocation14 + $0x844] ss:$144 sps:$4 sm:$0xff]  }
 0x48b   :  { %4929 = vmatprep.subr.bf16.mxu0 %v6771_v16 }
 0x48d   :  { %4889 = vmatpush1.bf16.msra.mxu1 %v6766_v32  ;;  %v6825_v32 = vld [vmem:[#allocation14 + $0x84c] ss:$144 sps:$4 sm:$0xff]  }
 0x48e   :  { %4930 = vmatpush1.bf16.msra.mxu0 %v6769_v33  ;;  %4890 = vmatprep.subr.bf16.mxu1 %v6774_v34 }
 0x48f   :  { %4931 = vmatprep.subr.bf16.mxu0 %v6777_v35  ;;  %v6820_v35 = vld [vmem:[#allocation14 + $0x840] ss:$144 sps:$4 sm:$0xff]  }
 0x491   :  { %4891 = vmatpush1.bf16.msra.mxu1 %v6772_v36 }
 0x492   :  { %4932 = vmatpush1.bf16.msra.mxu0 %v6775_v37  ;;  %4942 = vmatprep.subr.bf16.mxu1 %v6780_v38  ;;  %v6823_v37 = vld [vmem:[#allocation14 + $0x848] ss:$144 sps:$4 sm:$0xff]   ;;  %v6828_v38 = vld [vmem:[#allocation14 + $0x964] ss:$144 sps:$4 sm:$0xff]  }
 0x493   :  { %4983 = vmatprep.subr.bf16.mxu0 %v6783_v39  ;;  %v6831_v39 = vld [vmem:[#allocation14 + $0x96c] ss:$144 sps:$4 sm:$0xff]  }
 0x494   :  { %4893 = vmatmul.mubr.bf16.vlgmr.msra.gmra.mrb[24].mxu1 %v7497_v10 }
 0x495   :  { %4934 = vmatmul.mubr.bf16.vlgmr.msra.gmra.mrb[28].mxu0 %v7497_v10  ;;  %4943 = vmatpush1.bf16.msra.mxu1 %v6778_v40 }
 0x496   :  { %4974 = vmatprep.mubr.bf16.mxu1 %v7495_v7  ;;  %4984 = vmatpush1.bf16.msra.mxu0 %v6781_v41  ;;  %v6826_v41 = vld [vmem:[#allocation14 + $0x960] ss:$144 sps:$4 sm:$0xff]  }
 0x497   :  { %5015 = vmatprep.mubr.bf16.mxu0 %v7495_v7  ;;  %4944 = vmatprep.subr.bf16.mxu1 %v6786_v42  ;;  %v6829_v42 = vld [vmem:[#allocation14 + $0x968] ss:$144 sps:$4 sm:$0xff]  }
 0x498   :  { %4985 = vmatprep.subr.bf16.mxu0 %v6789_v44  ;;  %v6834_v44 = vld [vmem:[#allocation14 + $0xa84] ss:$144 sps:$4 sm:$0xff]  }
 0x499   :  { %4945 = vmatpush1.bf16.msra.mxu1 %v6784_v46  ;;  %v6837_v46 = vld [vmem:[#allocation14 + $0xa8c] ss:$144 sps:$4 sm:$0xff]  }
 0x49a   :  { %4986 = vmatpush1.bf16.msra.mxu0 %v6787_v47  ;;  %4946 = vmatprep.subr.bf16.mxu1 %v6792_v49  ;;  %v6832_v47 = vld [vmem:[#allocation14 + $0xa80] ss:$144 sps:$4 sm:$0xff]   ;;  %v6835_v49 = vld [vmem:[#allocation14 + $0xa88] ss:$144 sps:$4 sm:$0xff]  }
 0x49b   :  { %4987 = vmatprep.subr.bf16.mxu0 %v6795_v45  ;;  %v6840_v45 = vld [vmem:[#allocation14 + $0xba4] ss:$144 sps:$4 sm:$0xff]  }
 0x49d   :  { %4947 = vmatpush1.bf16.msra.mxu1 %v6790_v50  ;;  %v6843_v50 = vld [vmem:[#allocation14 + $0xbac] ss:$144 sps:$4 sm:$0xff]  }
 0x49e   :  { %4988 = vmatpush1.bf16.msra.mxu0 %v6793_v51  ;;  %4948 = vmatprep.subr.bf16.mxu1 %v6798_v52  ;;  %v6838_v51 = vld [vmem:[#allocation14 + $0xba0] ss:$144 sps:$4 sm:$0xff]   ;;  %v6841_v52 = vld [vmem:[#allocation14 + $0xba8] ss:$144 sps:$4 sm:$0xff]  }
 0x49f   :  { %4989 = vmatprep.subr.bf16.mxu0 %v6801_v53  ;;  %v6846_v53 = vld [vmem:[#allocation14 + $0xcc4] ss:$144 sps:$4 sm:$0xff]  }
 0x4a1   :  { %4949 = vmatpush1.bf16.msra.mxu1 %v6796_v54  ;;  %v6849_v54 = vld [vmem:[#allocation14 + $0xccc] ss:$144 sps:$4 sm:$0xff]  }
 0x4a2   :  { %4990 = vmatpush1.bf16.msra.mxu0 %v6799_v55  ;;  %4950 = vmatprep.subr.bf16.mxu1 %v6804_v56  ;;  %v6844_v55 = vld [vmem:[#allocation14 + $0xcc0] ss:$144 sps:$4 sm:$0xff]   ;;  %v6847_v56 = vld [vmem:[#allocation14 + $0xcc8] ss:$144 sps:$4 sm:$0xff]  }
 0x4a3   :  { %4991 = vmatprep.subr.bf16.mxu0 %v6807_v57  ;;  %v6852_v57 = vld [vmem:[#allocation14 + $0xde4] ss:$144 sps:$4 sm:$0xff]  }
 0x4a5   :  { %4951 = vmatpush1.bf16.msra.mxu1 %v6802_v58  ;;  %v6855_v58 = vld [vmem:[#allocation14 + $0xdec] ss:$144 sps:$4 sm:$0xff]  }
 0x4a6   :  { %4992 = vmatpush1.bf16.msra.mxu0 %v6805_v60  ;;  %4952 = vmatprep.subr.bf16.mxu1 %v6810_v61  ;;  %v6850_v60 = vld [vmem:[#allocation14 + $0xde0] ss:$144 sps:$4 sm:$0xff]   ;;  %v6853_v61 = vld [vmem:[#allocation14 + $0xde8] ss:$144 sps:$4 sm:$0xff]  }
 0x4a7   :  { %v4648_v8 = vpop.f32.mrb[12].mxu1  ;;  %4993 = vmatprep.subr.bf16.mxu0 %v6813_v62  ;;  %v6858_v62 = vld [vmem:[#allocation14 + $0xf04] ss:$144 sps:$4 sm:$0xff]  }
 0x4a8   :  { %v4649_v11 = vadd.f32 %v4648_v8, %v1425_v63  ;;  %v4689_v12 = vpop.f32.mrb[16].mxu0  ;;  %v4650_v13 = vpop.f32.mrb[13].mxu1  ;;  %v6861_v63 = vld [vmem:[#allocation14 + $0xf0c] ss:$144 sps:$4 sm:$0xff]   ;;  %v6870_v8 = vld [vmem:[#allocation14 + $0x1144] ss:$144 sps:$4 sm:$0xff]  }
 0x4a9   :  { %v4690_v14 = vadd.f32 %v4689_v12, %v1433_v0  ;;  %v4651_v15 = vadd.f32 %v4650_v13, %v1429_v1  ;;  %v4691_v17 = vpop.f32.mrb[17].mxu0  ;;  %v4652_v20 = vpop.f32.mrb[14].mxu1  ;;  %4953 = vmatpush1.bf16.msra.mxu1 %v6808_v2  ;;  %v6856_v0 = vld [vmem:[#allocation14 + $0xf00] ss:$144 sps:$4 sm:$0xff]   ;;  %v6859_v1 = vld [vmem:[#allocation14 + $0xf08] ss:$144 sps:$4 sm:$0xff]  }
 0x4aa   :  { %v4692_v26 = vadd.f32 %v4691_v17, %v1437_v3  ;;  %v4693_v27 = vpop.f32.mrb[18].mxu0  ;;  %4994 = vmatpush1.bf16.msra.mxu0 %v6811_v5  ;;  %v4653_v28 = vpop.f32.mrb[15].mxu1  ;;  %4954 = vmatprep.subr.bf16.mxu1 %v6816_v6  ;;  %v6864_v2 = vld [vmem:[#allocation14 + $0x1024] ss:$144 sps:$4 sm:$0xff]   ;;  %v6867_v3 = vld [vmem:[#allocation14 + $0x102c] ss:$144 sps:$4 sm:$0xff]  }
 0x4ab   :  { %v5258_v31 = vcombine.low %v4649_v11, %v4651_v15  ;;  %v4694_v16 = vpop.f32.mrb[19].mxu0  ;;  %4995 = vmatprep.subr.bf16.mxu0 %v6819_v9  ;;  %v6862_v5 = vld [vmem:[#allocation14 + $0x1020] ss:$144 sps:$4 sm:$0xff]   ;;  %v6865_v6 = vld [vmem:[#allocation14 + $0x1028] ss:$144 sps:$4 sm:$0xff]  }
 0x4ac   :  { %v5259_v33 = vcombine.low %v4690_v14, %v4692_v26  ;;  %v6873_v9 = vld [vmem:[#allocation14 + $0x114c] ss:$144 sps:$4 sm:$0xff]   ;;  %v6868_v11 = vld [vmem:[#allocation14 + $0x1140] ss:$144 sps:$4 sm:$0xff]   ;;  %v6871_v12 = vld [vmem:[#allocation14 + $0x1148] ss:$144 sps:$4 sm:$0xff]  }
 0x4ad   :  { %v5266_v34 = vrot.slane %v5258_v31, %v7534_v4  ;;  %4955 = vmatpush1.bf16.msra.mxu1 %v6814_v23  ;;  %v6876_v13 = vld [vmem:[#allocation14 + $0x74] ss:$144 sps:$4 sm:$0xff]   ;;  %v6879_v14 = vld [vmem:[#allocation14 + $0x7c] ss:$144 sps:$4 sm:$0xff]   ;;  %v6874_v15 = vld [vmem:[#allocation14 + $0x70] ss:$144 sps:$4 sm:$0xff]  }
 0x4ae   :  { %v5273_v36 = vrot.slane %v5259_v33, %v7534_v4  ;;  %4996 = vmatpush1.bf16.msra.mxu0 %v6817_v29  ;;  %4956 = vmatprep.subr.bf16.mxu1 %v6822_v30  ;;  %v6877_v17 = vld [vmem:[#allocation14 + $0x78] ss:$144 sps:$4 sm:$0xff]   ;;  %v6882_v20 = vld [vmem:[#allocation14 + $0x194] ss:$144 sps:$4 sm:$0xff]   ;;  %v6885_v23 = vld [vmem:[#allocation14 + $0x19c] ss:$144 sps:$4 sm:$0xff]  }
 0x4af   :  { %4997 = vmatprep.subr.bf16.mxu0 %v6825_v32  ;;  %v6880_v26 = vld [vmem:[#allocation14 + $0x190] ss:$144 sps:$4 sm:$0xff]   ;;  %v6883_v27 = vld [vmem:[#allocation14 + $0x198] ss:$144 sps:$4 sm:$0xff]   ;;  %v6888_v28 = vld [vmem:[#allocation14 + $0x2b4] ss:$144 sps:$4 sm:$0xff]  }
 0x4b0   :  { %v5274_v40 = vcombine.low %v5266_v34, %v5273_v36  ;;  %v6891_v29 = vld [vmem:[#allocation14 + $0x2bc] ss:$144 sps:$4 sm:$0xff]   ;;  %v6886_v30 = vld [vmem:[#allocation14 + $0x2b0] ss:$144 sps:$4 sm:$0xff]   ;;  %v6889_v31 = vld [vmem:[#allocation14 + $0x2b8] ss:$144 sps:$4 sm:$0xff]  }
 0x4b1   :  { %4957 = vmatpush1.bf16.msra.mxu1 %v6820_v35  ;;  %v6894_v16 = vld [vmem:[#allocation14 + $0x3d4] ss:$144 sps:$4 sm:$0xff]   ;;  %v6897_v32 = vld [vmem:[#allocation14 + $0x3dc] ss:$144 sps:$4 sm:$0xff]   ;;  %v6892_v33 = vld [vmem:[#allocation14 + $0x3d0] ss:$144 sps:$4 sm:$0xff]  }
 0x4b2   :  { %5388 = vst [vmem:[#allocation17 + $0x10] sm:$0xff] %v5274_v40  ;;  %4998 = vmatpush1.bf16.msra.mxu0 %v6823_v37  ;;  %4958 = vmatprep.subr.bf16.mxu1 %v6828_v38  ;;  %v6895_v34 = vld [vmem:[#allocation14 + $0x3d8] ss:$144 sps:$4 sm:$0xff]   ;;  %v6900_v35 = vld [vmem:[#allocation14 + $0x4f4] ss:$144 sps:$4 sm:$0xff]  }
 0x4b3   :  { %4999 = vmatprep.subr.bf16.mxu0 %v6831_v39  ;;  %v6903_v36 = vld [vmem:[#allocation14 + $0x4fc] ss:$144 sps:$4 sm:$0xff]   ;;  %v6898_v37 = vld [vmem:[#allocation14 + $0x4f0] ss:$144 sps:$4 sm:$0xff]   ;;  %v6901_v38 = vld [vmem:[#allocation14 + $0x4f8] ss:$144 sps:$4 sm:$0xff]  }
 0x4b4   :  { %v6906_v39 = vld [vmem:[#allocation14 + $0x614] ss:$144 sps:$4 sm:$0xff]   ;;  %v6909_v40 = vld [vmem:[#allocation14 + $0x61c] ss:$144 sps:$4 sm:$0xff]  }
 0x4b5   :  { %4959 = vmatpush1.bf16.msra.mxu1 %v6826_v41  ;;  %v1441_v41 = vrot.slane %v7568_v59, %v7543_v21 }
 0x4b6   :  { %5000 = vmatpush1.bf16.msra.mxu0 %v6829_v42  ;;  %4960 = vmatprep.subr.bf16.mxu1 %v6834_v44  ;;  %v1449_v42 = vrot.slane %v7568_v59, %v7546_v22  ;;  %v1445_v44 = vrot.slane %v7568_v59, %v7549_v24 }
 0x4b7   :  { %5001 = vmatprep.subr.bf16.mxu0 %v6837_v46  ;;  %v6904_v46 = vld [vmem:[#allocation14 + $0x610] ss:$144 sps:$4 sm:$0xff]  }
 0x4b9   :  { %4961 = vmatpush1.bf16.msra.mxu1 %v6832_v47  ;;  %v1453_v47 = vrot.slane %v7568_v59, %v7552_v25  ;;  %v6913_v59 = vld [vmem:[#allocation14 + $0x738] ss:$144 sps:$4 sm:$0xff]  }
 0x4ba   :  { %5002 = vmatpush1.bf16.msra.mxu0 %v6835_v49  ;;  %4962 = vmatprep.subr.bf16.mxu1 %v6840_v45  ;;  %v6907_v49 = vld [vmem:[#allocation14 + $0x618] ss:$144 sps:$4 sm:$0xff]   ;;  %v6912_v45 = vld [vmem:[#allocation14 + $0x734] ss:$144 sps:$4 sm:$0xff]  }
 0x4bb   :  { %5003 = vmatprep.subr.bf16.mxu0 %v6843_v50 }
 0x4bd   :  { %4963 = vmatpush1.bf16.msra.mxu1 %v6838_v51  ;;  %v6915_v51 = vld [vmem:[#allocation14 + $0x73c] ss:$144 sps:$4 sm:$0xff]  }
 0x4be   :  { %5004 = vmatpush1.bf16.msra.mxu0 %v6841_v52  ;;  %4964 = vmatprep.subr.bf16.mxu1 %v6846_v53 }
 0x4bf   :  { %5005 = vmatprep.subr.bf16.mxu0 %v6849_v54 }
 0x4c1   :  { %4965 = vmatpush1.bf16.msra.mxu1 %v6844_v55 }
 0x4c2   :  { %5006 = vmatpush1.bf16.msra.mxu0 %v6847_v56  ;;  %4966 = vmatprep.subr.bf16.mxu1 %v6852_v57 }
 0x4c3   :  { %5007 = vmatprep.subr.bf16.mxu0 %v6855_v58 }
 0x4c5   :  { %4967 = vmatpush1.bf16.msra.mxu1 %v6850_v60  ;;  %v6910_v60 = vld [vmem:[#allocation14 + $0x730] ss:$144 sps:$4 sm:$0xff]  }
 0x4c6   :  { %5008 = vmatpush1.bf16.msra.mxu0 %v6853_v61  ;;  %4968 = vmatprep.subr.bf16.mxu1 %v6858_v62 }
 0x4c7   :  { %5009 = vmatprep.subr.bf16.mxu0 %v6861_v63 }
 0x4c9   :  { %4969 = vmatpush1.bf16.msra.mxu1 %v6856_v0  ;;  %v6918_v0 = vld [vmem:[#allocation14 + $0x854] ss:$144 sps:$4 sm:$0xff]  }
 0x4ca   :  { %5010 = vmatpush1.bf16.msra.mxu0 %v6859_v1  ;;  %4970 = vmatprep.subr.bf16.mxu1 %v6864_v2 }
 0x4cb   :  { %5011 = vmatprep.subr.bf16.mxu0 %v6867_v3  ;;  %v6921_v3 = vld [vmem:[#allocation14 + $0x85c] ss:$144 sps:$4 sm:$0xff]  }
 0x4cd   :  { %4971 = vmatpush1.bf16.msra.mxu1 %v6862_v5 }
 0x4ce   :  { %5012 = vmatpush1.bf16.msra.mxu0 %v6865_v6  ;;  %4972 = vmatprep.subr.bf16.mxu1 %v6870_v8  ;;  %v6916_v8 = vld [vmem:[#allocation14 + $0x850] ss:$144 sps:$4 sm:$0xff]  }
 0x4cf   :  { %5013 = vmatprep.subr.bf16.mxu0 %v6873_v9 }
 0x4d1   :  { %4973 = vmatpush1.bf16.msra.mxu1 %v6868_v11  ;;  %v6919_v11 = vld [vmem:[#allocation14 + $0x858] ss:$144 sps:$4 sm:$0xff]  }
 0x4d2   :  { %5014 = vmatpush1.bf16.msra.mxu0 %v6871_v12  ;;  %5024 = vmatprep.subr.bf16.mxu1 %v6876_v13  ;;  %v6924_v12 = vld [vmem:[#allocation14 + $0x974] ss:$144 sps:$4 sm:$0xff]   ;;  %v6927_v13 = vld [vmem:[#allocation14 + $0x97c] ss:$144 sps:$4 sm:$0xff]  }
 0x4d3   :  { %5065 = vmatprep.subr.bf16.mxu0 %v6879_v14 }
 0x4d4   :  { %4975 = vmatmul.mubr.bf16.vlgmr.msra.gmra.mrb[28].mxu1 %v7497_v10 }
 0x4d5   :  { %5016 = vmatmul.mubr.bf16.vlgmr.msra.gmra.mrb[32].mxu0 %v7497_v10  ;;  %5025 = vmatpush1.bf16.msra.mxu1 %v6874_v15  ;;  %v6922_v15 = vld [vmem:[#allocation14 + $0x970] ss:$144 sps:$4 sm:$0xff]  }
 0x4d6   :  { %5056 = vmatprep.mubr.bf16.mxu1 %v7495_v7  ;;  %5066 = vmatpush1.bf16.msra.mxu0 %v6877_v17  ;;  %v6925_v17 = vld [vmem:[#allocation14 + $0x978] ss:$144 sps:$4 sm:$0xff]  }
 0x4d7   :  { %5097 = vmatprep.mubr.bf16.mxu0 %v7495_v7  ;;  %5026 = vmatprep.subr.bf16.mxu1 %v6882_v20  ;;  %v6930_v20 = vld [vmem:[#allocation14 + $0xa94] ss:$144 sps:$4 sm:$0xff]  }
 0x4d8   :  { %5067 = vmatprep.subr.bf16.mxu0 %v6885_v23  ;;  %v6933_v23 = vld [vmem:[#allocation14 + $0xa9c] ss:$144 sps:$4 sm:$0xff]  }
 0x4d9   :  { %5027 = vmatpush1.bf16.msra.mxu1 %v6880_v26  ;;  %v6928_v26 = vld [vmem:[#allocation14 + $0xa90] ss:$144 sps:$4 sm:$0xff]  }
 0x4da   :  { %5068 = vmatpush1.bf16.msra.mxu0 %v6883_v27  ;;  %5028 = vmatprep.subr.bf16.mxu1 %v6888_v28  ;;  %v6931_v27 = vld [vmem:[#allocation14 + $0xa98] ss:$144 sps:$4 sm:$0xff]   ;;  %v6936_v28 = vld [vmem:[#allocation14 + $0xbb4] ss:$144 sps:$4 sm:$0xff]  }
 0x4db   :  { %5069 = vmatprep.subr.bf16.mxu0 %v6891_v29  ;;  %v6939_v29 = vld [vmem:[#allocation14 + $0xbbc] ss:$144 sps:$4 sm:$0xff]  }
 0x4dd   :  { %5029 = vmatpush1.bf16.msra.mxu1 %v6886_v30  ;;  %v6934_v30 = vld [vmem:[#allocation14 + $0xbb0] ss:$144 sps:$4 sm:$0xff]  }
 0x4de   :  { %5070 = vmatpush1.bf16.msra.mxu0 %v6889_v31  ;;  %5030 = vmatprep.subr.bf16.mxu1 %v6894_v16  ;;  %v6937_v31 = vld [vmem:[#allocation14 + $0xbb8] ss:$144 sps:$4 sm:$0xff]   ;;  %v6942_v16 = vld [vmem:[#allocation14 + $0xcd4] ss:$144 sps:$4 sm:$0xff]  }
 0x4df   :  { %5071 = vmatprep.subr.bf16.mxu0 %v6897_v32  ;;  %v6945_v32 = vld [vmem:[#allocation14 + $0xcdc] ss:$144 sps:$4 sm:$0xff]  }
 0x4e1   :  { %5031 = vmatpush1.bf16.msra.mxu1 %v6892_v33  ;;  %v6940_v33 = vld [vmem:[#allocation14 + $0xcd0] ss:$144 sps:$4 sm:$0xff]  }
 0x4e2   :  { %5072 = vmatpush1.bf16.msra.mxu0 %v6895_v34  ;;  %5032 = vmatprep.subr.bf16.mxu1 %v6900_v35  ;;  %v6943_v34 = vld [vmem:[#allocation14 + $0xcd8] ss:$144 sps:$4 sm:$0xff]   ;;  %v6948_v35 = vld [vmem:[#allocation14 + $0xdf4] ss:$144 sps:$4 sm:$0xff]  }
 0x4e3   :  { %5073 = vmatprep.subr.bf16.mxu0 %v6903_v36  ;;  %v6951_v36 = vld [vmem:[#allocation14 + $0xdfc] ss:$144 sps:$4 sm:$0xff]  }
 0x4e5   :  { %5033 = vmatpush1.bf16.msra.mxu1 %v6898_v37  ;;  %v6946_v37 = vld [vmem:[#allocation14 + $0xdf0] ss:$144 sps:$4 sm:$0xff]  }
 0x4e6   :  { %5074 = vmatpush1.bf16.msra.mxu0 %v6901_v38  ;;  %5034 = vmatprep.subr.bf16.mxu1 %v6906_v39  ;;  %v6949_v38 = vld [vmem:[#allocation14 + $0xdf8] ss:$144 sps:$4 sm:$0xff]   ;;  %v6954_v39 = vld [vmem:[#allocation14 + $0xf14] ss:$144 sps:$4 sm:$0xff]  }
 0x4e7   :  { %v4730_v50 = vpop.f32.mrb[16].mxu1  ;;  %5075 = vmatprep.subr.bf16.mxu0 %v6909_v40  ;;  %v6957_v40 = vld [vmem:[#allocation14 + $0xf1c] ss:$144 sps:$4 sm:$0xff]  }
 0x4e8   :  { %v4731_v52 = vadd.f32 %v4730_v50, %v1441_v41  ;;  %v4771_v53 = vpop.f32.mrb[20].mxu0  ;;  %v4732_v54 = vpop.f32.mrb[17].mxu1  ;;  %v6952_v41 = vld [vmem:[#allocation14 + $0xf10] ss:$144 sps:$4 sm:$0xff]   ;;  %v6969_v50 = vld [vmem:[#allocation14 + $0x115c] ss:$144 sps:$4 sm:$0xff]  }
 0x4e9   :  { %v4772_v55 = vadd.f32 %v4771_v53, %v1449_v42  ;;  %v4733_v56 = vadd.f32 %v4732_v54, %v1445_v44  ;;  %v4773_v57 = vpop.f32.mrb[21].mxu0  ;;  %v4734_v58 = vpop.f32.mrb[18].mxu1  ;;  %5035 = vmatpush1.bf16.msra.mxu1 %v6904_v46  ;;  %v6955_v42 = vld [vmem:[#allocation14 + $0xf18] ss:$144 sps:$4 sm:$0xff]   ;;  %v6960_v44 = vld [vmem:[#allocation14 + $0x1034] ss:$144 sps:$4 sm:$0xff]  }
 0x4ea   :  { %v4774_v61 = vadd.f32 %v4773_v57, %v1453_v47  ;;  %v4775_v62 = vpop.f32.mrb[22].mxu0  ;;  %5076 = vmatpush1.bf16.msra.mxu0 %v6907_v49  ;;  %v4735_v63 = vpop.f32.mrb[19].mxu1  ;;  %5036 = vmatprep.subr.bf16.mxu1 %v6912_v45  ;;  %v6963_v46 = vld [vmem:[#allocation14 + $0x103c] ss:$144 sps:$4 sm:$0xff]   ;;  %v6958_v47 = vld [vmem:[#allocation14 + $0x1030] ss:$144 sps:$4 sm:$0xff]  }
 0x4eb   :  { %v5275_v1 = vcombine.low %v4731_v52, %v4733_v56  ;;  %v4776_v2 = vpop.f32.mrb[23].mxu0  ;;  %5077 = vmatprep.subr.bf16.mxu0 %v6915_v51  ;;  %v6961_v49 = vld [vmem:[#allocation14 + $0x1038] ss:$144 sps:$4 sm:$0xff]   ;;  %v6966_v45 = vld [vmem:[#allocation14 + $0x1154] ss:$144 sps:$4 sm:$0xff]  }
 0x4ec   :  { %v5276_v5 = vcombine.low %v4772_v55, %v4774_v61  ;;  %v6964_v51 = vld [vmem:[#allocation14 + $0x1150] ss:$144 sps:$4 sm:$0xff]   ;;  %v6967_v52 = vld [vmem:[#allocation14 + $0x1158] ss:$144 sps:$4 sm:$0xff]   ;;  %v6972_v53 = vld [vmem:[#allocation14 + $0x84] ss:$144 sps:$4 sm:$0xff]  }
 0x4ed   :  { %v5283_v6 = vrot.slane %v5275_v1, %v7534_v4  ;;  %5037 = vmatpush1.bf16.msra.mxu1 %v6910_v60  ;;  %v6975_v54 = vld [vmem:[#allocation14 + $0x8c] ss:$144 sps:$4 sm:$0xff]   ;;  %v6970_v55 = vld [vmem:[#allocation14 + $0x80] ss:$144 sps:$4 sm:$0xff]   ;;  %v6973_v56 = vld [vmem:[#allocation14 + $0x88] ss:$144 sps:$4 sm:$0xff]  }
 0x4ee   :  { %v5290_v9 = vrot.slane %v5276_v5, %v7534_v4  ;;  %5078 = vmatpush1.bf16.msra.mxu0 %v6913_v59  ;;  %5038 = vmatprep.subr.bf16.mxu1 %v6918_v0  ;;  %v6978_v57 = vld [vmem:[#allocation14 + $0x1a4] ss:$144 sps:$4 sm:$0xff]   ;;  %v6981_v58 = vld [vmem:[#allocation14 + $0x1ac] ss:$144 sps:$4 sm:$0xff]   ;;  %v6976_v60 = vld [vmem:[#allocation14 + $0x1a0] ss:$144 sps:$4 sm:$0xff]  }
 0x4ef   :  { %5079 = vmatprep.subr.bf16.mxu0 %v6921_v3  ;;  %v6979_v61 = vld [vmem:[#allocation14 + $0x1a8] ss:$144 sps:$4 sm:$0xff]   ;;  %v6984_v62 = vld [vmem:[#allocation14 + $0x2c4] ss:$144 sps:$4 sm:$0xff]   ;;  %v6987_v63 = vld [vmem:[#allocation14 + $0x2cc] ss:$144 sps:$4 sm:$0xff]  }
 0x4f0   :  { %v5291_v14 = vcombine.low %v5283_v6, %v5290_v9  ;;  %v6982_v59 = vld [vmem:[#allocation14 + $0x2c0] ss:$144 sps:$4 sm:$0xff]   ;;  %v6985_v0 = vld [vmem:[#allocation14 + $0x2c8] ss:$144 sps:$4 sm:$0xff]   ;;  %v6990_v1 = vld [vmem:[#allocation14 + $0x3e4] ss:$144 sps:$4 sm:$0xff]  }
 0x4f1   :  { %5039 = vmatpush1.bf16.msra.mxu1 %v6916_v8  ;;  %v6993_v2 = vld [vmem:[#allocation14 + $0x3ec] ss:$144 sps:$4 sm:$0xff]   ;;  %v6988_v3 = vld [vmem:[#allocation14 + $0x3e0] ss:$144 sps:$4 sm:$0xff]   ;;  %v6991_v5 = vld [vmem:[#allocation14 + $0x3e8] ss:$144 sps:$4 sm:$0xff]  }
 0x4f2   :  { %5389 = vst [vmem:[#allocation17 + $0x18] sm:$0xff] %v5291_v14  ;;  %5080 = vmatpush1.bf16.msra.mxu0 %v6919_v11  ;;  %5040 = vmatprep.subr.bf16.mxu1 %v6924_v12  ;;  %v6996_v6 = vld [vmem:[#allocation14 + $0x504] ss:$144 sps:$4 sm:$0xff]   ;;  %v6999_v8 = vld [vmem:[#allocation14 + $0x50c] ss:$144 sps:$4 sm:$0xff]  }
 0x4f3   :  { %5081 = vmatprep.subr.bf16.mxu0 %v6927_v13  ;;  %v7598_v9 = vld [vmem:[#allocation16 + $0x10] sm:$0xff]  ;;  %v6997_v11 = vld [vmem:[#allocation14 + $0x508] ss:$144 sps:$4 sm:$0xff]   ;;  %v7005_v13 = vld [vmem:[#allocation14 + $0x62c] ss:$144 sps:$4 sm:$0xff]  }
 0x4f4   :  { %v7002_v12 = vld [vmem:[#allocation14 + $0x624] ss:$144 sps:$4 sm:$0xff]   ;;  %v1457_v14 = vrot.slane %v7598_v9, %v7484_v18 }
 0x4f5   :  { %5041 = vmatpush1.bf16.msra.mxu1 %v6922_v15  ;;  %v1465_v15 = vrot.slane %v7598_v9, %v7518_v43 }
 0x4f6   :  { %5082 = vmatpush1.bf16.msra.mxu0 %v6925_v17  ;;  %5042 = vmatprep.subr.bf16.mxu1 %v6930_v20  ;;  %v1461_v17 = vrot.slane %v7598_v9, %v7487_v19  ;;  %v7000_v20 = vld [vmem:[#allocation14 + $0x620] ss:$144 sps:$4 sm:$0xff]  }
 0x4f7   :  { %5083 = vmatprep.subr.bf16.mxu0 %v6933_v23  ;;  %v1469_v23 = vrot.slane %v7598_v9, %v7523_v48 }
 0x4f9   :  { %5043 = vmatpush1.bf16.msra.mxu1 %v6928_v26  ;;  %v7003_v26 = vld [vmem:[#allocation14 + $0x628] ss:$144 sps:$4 sm:$0xff]  }
 0x4fa   :  { %5084 = vmatpush1.bf16.msra.mxu0 %v6931_v27  ;;  %5044 = vmatprep.subr.bf16.mxu1 %v6936_v28  ;;  %v7008_v27 = vld [vmem:[#allocation14 + $0x744] ss:$144 sps:$4 sm:$0xff]  }
 0x4fb   :  { %5085 = vmatprep.subr.bf16.mxu0 %v6939_v29  ;;  %v7011_v29 = vld [vmem:[#allocation14 + $0x74c] ss:$144 sps:$4 sm:$0xff]  }
 0x4fd   :  { %5045 = vmatpush1.bf16.msra.mxu1 %v6934_v30 }
 0x4fe   :  { %5086 = vmatpush1.bf16.msra.mxu0 %v6937_v31  ;;  %5046 = vmatprep.subr.bf16.mxu1 %v6942_v16 }
 0x4ff   :  { %5087 = vmatprep.subr.bf16.mxu0 %v6945_v32 }
 0x501   :  { %5047 = vmatpush1.bf16.msra.mxu1 %v6940_v33 }
 0x502   :  { %5088 = vmatpush1.bf16.msra.mxu0 %v6943_v34  ;;  %5048 = vmatprep.subr.bf16.mxu1 %v6948_v35 }
 0x503   :  { %5089 = vmatprep.subr.bf16.mxu0 %v6951_v36  ;;  %v7006_v36 = vld [vmem:[#allocation14 + $0x740] ss:$144 sps:$4 sm:$0xff]  }
 0x505   :  { %5049 = vmatpush1.bf16.msra.mxu1 %v6946_v37 }
 0x506   :  { %5090 = vmatpush1.bf16.msra.mxu0 %v6949_v38  ;;  %5050 = vmatprep.subr.bf16.mxu1 %v6954_v39 }
 0x507   :  { %5091 = vmatprep.subr.bf16.mxu0 %v6957_v40  ;;  %v7009_v40 = vld [vmem:[#allocation14 + $0x748] ss:$144 sps:$4 sm:$0xff]  }
 0x509   :  { %5051 = vmatpush1.bf16.msra.mxu1 %v6952_v41  ;;  %v7014_v41 = vld [vmem:[#allocation14 + $0x864] ss:$144 sps:$4 sm:$0xff]  }
 0x50a   :  { %5092 = vmatpush1.bf16.msra.mxu0 %v6955_v42  ;;  %5052 = vmatprep.subr.bf16.mxu1 %v6960_v44 }
 0x50b   :  { %5093 = vmatprep.subr.bf16.mxu0 %v6963_v46  ;;  %v7017_v46 = vld [vmem:[#allocation14 + $0x86c] ss:$144 sps:$4 sm:$0xff]  }
 0x50d   :  { %5053 = vmatpush1.bf16.msra.mxu1 %v6958_v47 }
 0x50e   :  { %5094 = vmatpush1.bf16.msra.mxu0 %v6961_v49  ;;  %5054 = vmatprep.subr.bf16.mxu1 %v6966_v45  ;;  %v7012_v45 = vld [vmem:[#allocation14 + $0x860] ss:$144 sps:$4 sm:$0xff]  }
 0x50f   :  { %5095 = vmatprep.subr.bf16.mxu0 %v6969_v50 }
 0x511   :  { %5055 = vmatpush1.bf16.msra.mxu1 %v6964_v51  ;;  %v7015_v51 = vld [vmem:[#allocation14 + $0x868] ss:$144 sps:$4 sm:$0xff]  }
 0x512   :  { %5096 = vmatpush1.bf16.msra.mxu0 %v6967_v52  ;;  %5106 = vmatprep.subr.bf16.mxu1 %v6972_v53  ;;  %v7020_v52 = vld [vmem:[#allocation14 + $0x984] ss:$144 sps:$4 sm:$0xff]   ;;  %v7023_v53 = vld [vmem:[#allocation14 + $0x98c] ss:$144 sps:$4 sm:$0xff]  }
 0x513   :  { %5147 = vmatprep.subr.bf16.mxu0 %v6975_v54 }
 0x514   :  { %5057 = vmatmul.mubr.bf16.vlgmr.msra.gmra.mrb[32].mxu1 %v7497_v10 }
 0x515   :  { %5098 = vmatmul.mubr.bf16.vlgmr.msra.gmra.mrb[36].mxu0 %v7497_v10  ;;  %5107 = vmatpush1.bf16.msra.mxu1 %v6970_v55  ;;  %v7018_v55 = vld [vmem:[#allocation14 + $0x980] ss:$144 sps:$4 sm:$0xff]  }
 0x516   :  { %5138 = vmatprep.mubr.bf16.mxu1 %v7495_v7  ;;  %5148 = vmatpush1.bf16.msra.mxu0 %v6973_v56  ;;  %v7021_v56 = vld [vmem:[#allocation14 + $0x988] ss:$144 sps:$4 sm:$0xff]  }
 0x517   :  { %5179 = vmatprep.mubr.bf16.mxu0 %v7495_v7  ;;  %5108 = vmatprep.subr.bf16.mxu1 %v6978_v57  ;;  %v6994_v7 = vld [vmem:[#allocation14 + $0x500] ss:$144 sps:$4 sm:$0xff]   ;;  %v7026_v57 = vld [vmem:[#allocation14 + $0xaa4] ss:$144 sps:$4 sm:$0xff]  }
 0x518   :  { %5149 = vmatprep.subr.bf16.mxu0 %v6981_v58  ;;  %v7029_v58 = vld [vmem:[#allocation14 + $0xaac] ss:$144 sps:$4 sm:$0xff]  }
 0x519   :  { %5109 = vmatpush1.bf16.msra.mxu1 %v6976_v60  ;;  %v7024_v60 = vld [vmem:[#allocation14 + $0xaa0] ss:$144 sps:$4 sm:$0xff]  }
 0x51a   :  { %5150 = vmatpush1.bf16.msra.mxu0 %v6979_v61  ;;  %5110 = vmatprep.subr.bf16.mxu1 %v6984_v62  ;;  %v7027_v61 = vld [vmem:[#allocation14 + $0xaa8] ss:$144 sps:$4 sm:$0xff]   ;;  %v7032_v62 = vld [vmem:[#allocation14 + $0xbc4] ss:$144 sps:$4 sm:$0xff]  }
 0x51b   :  { %5151 = vmatprep.subr.bf16.mxu0 %v6987_v63  ;;  %v7035_v63 = vld [vmem:[#allocation14 + $0xbcc] ss:$144 sps:$4 sm:$0xff]  }
 0x51d   :  { %5111 = vmatpush1.bf16.msra.mxu1 %v6982_v59  ;;  %v7030_v59 = vld [vmem:[#allocation14 + $0xbc0] ss:$144 sps:$4 sm:$0xff]  }
 0x51e   :  { %5152 = vmatpush1.bf16.msra.mxu0 %v6985_v0  ;;  %5112 = vmatprep.subr.bf16.mxu1 %v6990_v1  ;;  %v7033_v0 = vld [vmem:[#allocation14 + $0xbc8] ss:$144 sps:$4 sm:$0xff]   ;;  %v7038_v1 = vld [vmem:[#allocation14 + $0xce4] ss:$144 sps:$4 sm:$0xff]  }
 0x51f   :  { %5153 = vmatprep.subr.bf16.mxu0 %v6993_v2  ;;  %v7041_v2 = vld [vmem:[#allocation14 + $0xcec] ss:$144 sps:$4 sm:$0xff]  }
 0x521   :  { %5113 = vmatpush1.bf16.msra.mxu1 %v6988_v3  ;;  %v7036_v3 = vld [vmem:[#allocation14 + $0xce0] ss:$144 sps:$4 sm:$0xff]  }
 0x522   :  { %5154 = vmatpush1.bf16.msra.mxu0 %v6991_v5  ;;  %5114 = vmatprep.subr.bf16.mxu1 %v6996_v6  ;;  %v7039_v5 = vld [vmem:[#allocation14 + $0xce8] ss:$144 sps:$4 sm:$0xff]   ;;  %v7044_v6 = vld [vmem:[#allocation14 + $0xe04] ss:$144 sps:$4 sm:$0xff]  }
 0x523   :  { %5155 = vmatprep.subr.bf16.mxu0 %v6999_v8  ;;  %v7047_v8 = vld [vmem:[#allocation14 + $0xe0c] ss:$144 sps:$4 sm:$0xff]  }
 0x525   :  { %5115 = vmatpush1.bf16.msra.mxu1 %v6994_v7  ;;  %v7042_v7 = vld [vmem:[#allocation14 + $0xe00] ss:$144 sps:$4 sm:$0xff]  }
 0x526   :  { %5156 = vmatpush1.bf16.msra.mxu0 %v6997_v11  ;;  %5116 = vmatprep.subr.bf16.mxu1 %v7002_v12  ;;  %v7045_v11 = vld [vmem:[#allocation14 + $0xe08] ss:$144 sps:$4 sm:$0xff]   ;;  %v7050_v12 = vld [vmem:[#allocation14 + $0xf24] ss:$144 sps:$4 sm:$0xff]  }
 0x527   :  { %v4812_v28 = vpop.f32.mrb[20].mxu1  ;;  %5157 = vmatprep.subr.bf16.mxu0 %v7005_v13  ;;  %v7053_v13 = vld [vmem:[#allocation14 + $0xf2c] ss:$144 sps:$4 sm:$0xff]  }
 0x528   :  { %v4813_v30 = vadd.f32 %v4812_v28, %v1457_v14  ;;  %v4853_v31 = vpop.f32.mrb[24].mxu0  ;;  %v4814_v16 = vpop.f32.mrb[21].mxu1  ;;  %v7048_v14 = vld [vmem:[#allocation14 + $0xf20] ss:$144 sps:$4 sm:$0xff]   ;;  %v7065_v28 = vld [vmem:[#allocation14 + $0x116c] ss:$144 sps:$4 sm:$0xff]  }
 0x529   :  { %v4854_v32 = vadd.f32 %v4853_v31, %v1465_v15  ;;  %v4815_v33 = vadd.f32 %v4814_v16, %v1461_v17  ;;  %v4855_v34 = vpop.f32.mrb[25].mxu0  ;;  %v4816_v35 = vpop.f32.mrb[22].mxu1  ;;  %5117 = vmatpush1.bf16.msra.mxu1 %v7000_v20  ;;  %v7051_v15 = vld [vmem:[#allocation14 + $0xf28] ss:$144 sps:$4 sm:$0xff]   ;;  %v7056_v17 = vld [vmem:[#allocation14 + $0x1044] ss:$144 sps:$4 sm:$0xff]   ;;  %v1473_v31 = vrot.slane %v7598_v9, %v7543_v21  ;;  %v1481_v16 = vrot.slane %v7598_v9, %v7546_v22 }
 0x52a   :  { %v4856_v37 = vadd.f32 %v4855_v34, %v1469_v23  ;;  %v4857_v38 = vpop.f32.mrb[26].mxu0  ;;  %5158 = vmatpush1.bf16.msra.mxu0 %v7003_v26  ;;  %v4817_v39 = vpop.f32.mrb[23].mxu1  ;;  %5118 = vmatprep.subr.bf16.mxu1 %v7008_v27  ;;  %v7059_v20 = vld [vmem:[#allocation14 + $0x104c] ss:$144 sps:$4 sm:$0xff]   ;;  %v7054_v23 = vld [vmem:[#allocation14 + $0x1040] ss:$144 sps:$4 sm:$0xff]  }
 0x52b   :  { %v5292_v42 = vcombine.low %v4813_v30, %v4815_v33  ;;  %v4858_v44 = vpop.f32.mrb[27].mxu0  ;;  %5159 = vmatprep.subr.bf16.mxu0 %v7011_v29  ;;  %v7057_v26 = vld [vmem:[#allocation14 + $0x1048] ss:$144 sps:$4 sm:$0xff]   ;;  %v7062_v27 = vld [vmem:[#allocation14 + $0x1164] ss:$144 sps:$4 sm:$0xff]   ;;  %v1485_v33 = vrot.slane %v7598_v9, %v7552_v25 }
 0x52c   :  { %v5293_v47 = vcombine.low %v4854_v32, %v4856_v37  ;;  %v7060_v29 = vld [vmem:[#allocation14 + $0x1160] ss:$144 sps:$4 sm:$0xff]   ;;  %v7063_v30 = vld [vmem:[#allocation14 + $0x1168] ss:$144 sps:$4 sm:$0xff]   ;;  %v1477_v32 = vrot.slane %v7598_v9, %v7549_v24 }
 0x52d   :  { %v5300_v49 = vrot.slane %v5292_v42, %v7534_v4  ;;  %5119 = vmatpush1.bf16.msra.mxu1 %v7006_v36  ;;  %v1383_v9 = vld [vmem:[#allocation16 + $0x18] sm:$0xff] }
 0x52e   :  { %v5307_v50 = vrot.slane %v5293_v47, %v7534_v4  ;;  %5160 = vmatpush1.bf16.msra.mxu0 %v7009_v40  ;;  %5120 = vmatprep.subr.bf16.mxu1 %v7014_v41 }
 0x52f   :  { %5161 = vmatprep.subr.bf16.mxu0 %v7017_v46 }
 0x530   :  { %v5308_v54 = vcombine.low %v5300_v49, %v5307_v50 }
 0x531   :  { %5121 = vmatpush1.bf16.msra.mxu1 %v7012_v45 }
 0x532   :  { %5390 = vst [vmem:[#allocation17 + $0x20] sm:$0xff] %v5308_v54  ;;  %5162 = vmatpush1.bf16.msra.mxu0 %v7015_v51  ;;  %5122 = vmatprep.subr.bf16.mxu1 %v7020_v52  ;;  %v1489_v52 = vrot.slane %v1383_v9, %v7484_v18  ;;  %v1493_v54 = vrot.slane %v1383_v9, %v7487_v19 }
 0x533   :  { %5163 = vmatprep.subr.bf16.mxu0 %v7023_v53  ;;  %v1497_v53 = vrot.slane %v1383_v9, %v7518_v43 }
 0x535   :  { %5123 = vmatpush1.bf16.msra.mxu1 %v7018_v55  ;;  %v1501_v55 = vrot.slane %v1383_v9, %v7523_v48 }
 0x536   :  { %5164 = vmatpush1.bf16.msra.mxu0 %v7021_v56  ;;  %5124 = vmatprep.subr.bf16.mxu1 %v7026_v57 }
 0x537   :  { %5165 = vmatprep.subr.bf16.mxu0 %v7029_v58 }
 0x539   :  { %5125 = vmatpush1.bf16.msra.mxu1 %v7024_v60 }
 0x53a   :  { %5166 = vmatpush1.bf16.msra.mxu0 %v7027_v61  ;;  %5126 = vmatprep.subr.bf16.mxu1 %v7032_v62 }
 0x53b   :  { %5167 = vmatprep.subr.bf16.mxu0 %v7035_v63 }
 0x53d   :  { %5127 = vmatpush1.bf16.msra.mxu1 %v7030_v59 }
 0x53e   :  { %5168 = vmatpush1.bf16.msra.mxu0 %v7033_v0  ;;  %5128 = vmatprep.subr.bf16.mxu1 %v7038_v1 }
 0x53f   :  { %5169 = vmatprep.subr.bf16.mxu0 %v7041_v2 }
 0x541   :  { %5129 = vmatpush1.bf16.msra.mxu1 %v7036_v3 }
 0x542   :  { %5170 = vmatpush1.bf16.msra.mxu0 %v7039_v5  ;;  %5130 = vmatprep.subr.bf16.mxu1 %v7044_v6 }
 0x543   :  { %5171 = vmatprep.subr.bf16.mxu0 %v7047_v8 }
 0x545   :  { %5131 = vmatpush1.bf16.msra.mxu1 %v7042_v7 }
 0x546   :  { %5172 = vmatpush1.bf16.msra.mxu0 %v7045_v11  ;;  %5132 = vmatprep.subr.bf16.mxu1 %v7050_v12  ;;  %v1505_v12 = vrot.slane %v1383_v9, %v7543_v21 }
 0x547   :  { %5173 = vmatprep.subr.bf16.mxu0 %v7053_v13  ;;  %v1513_v13 = vrot.slane %v1383_v9, %v7546_v22 }
 0x549   :  { %5133 = vmatpush1.bf16.msra.mxu1 %v7048_v14  ;;  %v1509_v14 = vrot.slane %v1383_v9, %v7549_v24 }
 0x54a   :  { %5174 = vmatpush1.bf16.msra.mxu0 %v7051_v15  ;;  %5134 = vmatprep.subr.bf16.mxu1 %v7056_v17  ;;  %v1517_v15 = vrot.slane %v1383_v9, %v7552_v25  ;;  %v1384_v25 = vld [vmem:[#allocation16 + $0x20] sm:$0xf] }
 0x54b   :  { %5175 = vmatprep.subr.bf16.mxu0 %v7059_v20 }
 0x54d   :  { %5135 = vmatpush1.bf16.msra.mxu1 %v7054_v23 }
 0x54e   :  { %5176 = vmatpush1.bf16.msra.mxu0 %v7057_v26  ;;  %5136 = vmatprep.subr.bf16.mxu1 %v7062_v27 }
 0x54f   :  { %5177 = vmatprep.subr.bf16.mxu0 %v7065_v28 }
 0x551   :  { %5137 = vmatpush1.bf16.msra.mxu1 %v7060_v29 }
 0x552   :  { %5178 = vmatpush1.bf16.msra.mxu0 %v7063_v30 }
 0x554   :  { %5139 = vmatmul.mubr.bf16.vlgmr.msra.gmra.mrb[36].mxu1 %v7497_v10 }
 0x555   :  { %5180 = vmatmul.mubr.bf16.vlgmr.msra.gmra.mrb[40].mxu0 %v7497_v10 }
 0x567   :  { %v4894_v34 = vpop.f32.mrb[24].mxu1 }
 0x568   :  { %v4895_v35 = vadd.f32 %v4894_v34, %v1473_v31  ;;  %v4935_v36 = vpop.f32.mrb[28].mxu0  ;;  %v4896_v37 = vpop.f32.mrb[25].mxu1 }
 0x569   :  { %v4936_v38 = vadd.f32 %v4935_v36, %v1481_v16  ;;  %v4897_v39 = vadd.f32 %v4896_v37, %v1477_v32  ;;  %v4937_v40 = vpop.f32.mrb[29].mxu0  ;;  %v4898_v10 = vpop.f32.mrb[26].mxu1  ;;  %v1521_v36 = vrot.slane %v1384_v25, %v7484_v18  ;;  %v1529_v37 = vrot.slane %v1384_v25, %v7518_v43 }
 0x56a   :  { %v4938_v41 = vadd.f32 %v4937_v40, %v1485_v33  ;;  %v4939_v42 = vpop.f32.mrb[30].mxu0  ;;  %v4899_v44 = vpop.f32.mrb[27].mxu1 }
 0x56b   :  { %v5309_v46 = vcombine.low %v4895_v35, %v4897_v39  ;;  %v4940_v47 = vpop.f32.mrb[31].mxu0  ;;  %v1533_v39 = vrot.slane %v1384_v25, %v7523_v48 }
 0x56c   :  { %v5310_v49 = vcombine.low %v4936_v38, %v4938_v41  ;;  %v1525_v38 = vrot.slane %v1384_v25, %v7487_v19 }
 0x56d   :  { %v5317_v45 = vrot.slane %v5309_v46, %v7534_v4 }
 0x56e   :  { %v5324_v50 = vrot.slane %v5310_v49, %v7534_v4 }
 0x570   :  { %v5325_v51 = vcombine.low %v5317_v45, %v5324_v50 }
 0x572   :  { %5391 = vst [vmem:[#allocation17 + $0x28] sm:$0xff] %v5325_v51 }
 0x5a7   :  { %v4976_v56 = vpop.f32.mrb[28].mxu1 }
 0x5a8   :  { %v4977_v57 = vadd.f32 %v4976_v56, %v1489_v52  ;;  %v5017_v58 = vpop.f32.mrb[32].mxu0  ;;  %v4978_v60 = vpop.f32.mrb[29].mxu1 }
 0x5a9   :  { %v5018_v61 = vadd.f32 %v5017_v58, %v1497_v53  ;;  %v4979_v62 = vadd.f32 %v4978_v60, %v1493_v54  ;;  %v5019_v63 = vpop.f32.mrb[33].mxu0  ;;  %v4980_v59 = vpop.f32.mrb[30].mxu1 }
 0x5aa   :  { %v5020_v0 = vadd.f32 %v5019_v63, %v1501_v55  ;;  %v5021_v1 = vpop.f32.mrb[34].mxu0  ;;  %v4981_v2 = vpop.f32.mrb[31].mxu1 }
 0x5ab   :  { %v5326_v3 = vcombine.low %v4977_v57, %v4979_v62  ;;  %v5022_v5 = vpop.f32.mrb[35].mxu0 }
 0x5ac   :  { %v5327_v6 = vcombine.low %v5018_v61, %v5020_v0 }
 0x5ad   :  { %v5334_v8 = vrot.slane %v5326_v3, %v7534_v4 }
 0x5ae   :  { %v5341_v7 = vrot.slane %v5327_v6, %v7534_v4 }
 0x5b0   :  { %v5342_v11 = vcombine.low %v5334_v8, %v5341_v7 }
 0x5b2   :  { %5392 = vst [vmem:[#allocation17 + $0x30] sm:$0xff] %v5342_v11 }
 0x5e7   :  { %v5058_v17 = vpop.f32.mrb[32].mxu1 }
 0x5e8   :  { %v5059_v20 = vadd.f32 %v5058_v17, %v1505_v12  ;;  %v5099_v23 = vpop.f32.mrb[36].mxu0  ;;  %v5060_v26 = vpop.f32.mrb[33].mxu1 }
 0x5e9   :  { %v5100_v27 = vadd.f32 %v5099_v23, %v1513_v13  ;;  %v5061_v28 = vadd.f32 %v5060_v26, %v1509_v14  ;;  %v5101_v29 = vpop.f32.mrb[37].mxu0  ;;  %v5062_v30 = vpop.f32.mrb[34].mxu1 }
 0x5ea   :  { %v5102_v31 = vadd.f32 %v5101_v29, %v1517_v15  ;;  %v5103_v16 = vpop.f32.mrb[38].mxu0  ;;  %v5063_v32 = vpop.f32.mrb[35].mxu1 }
 0x5eb   :  { %v5343_v33 = vcombine.low %v5059_v20, %v5061_v28  ;;  %v5104_v34 = vpop.f32.mrb[39].mxu0 }
 0x5ec   :  { %v5344_v21 = vcombine.low %v5100_v27, %v5102_v31 }
 0x5ed   :  { %v5351_v22 = vrot.slane %v5343_v33, %v7534_v4 }
 0x5ee   :  { %v5358_v24 = vrot.slane %v5344_v21, %v7534_v4 }
 0x5f0   :  { %v5359_v35 = vcombine.low %v5351_v22, %v5358_v24 }
 0x5f2   :  { %5393 = vst [vmem:[#allocation17 + $0x38] sm:$0xff] %v5359_v35 }
 0x627   :  { %v5140_v40 = vpop.f32.mrb[36].mxu1 }
 0x628   :  { %v5141_v10 = vadd.f32 %v5140_v40, %v1521_v36  ;;  %v5181_v41 = vpop.f32.mrb[40].mxu0  ;;  %v5142_v42 = vpop.f32.mrb[37].mxu1 }
 0x629   :  { %v5182_v44 = vadd.f32 %v5181_v41, %v1529_v37  ;;  %v5143_v46 = vadd.f32 %v5142_v42, %v1525_v38  ;;  %v5183_v47 = vpop.f32.mrb[41].mxu0  ;;  %v5144_v49 = vpop.f32.mrb[38].mxu1 }
 0x62a   :  { %v5184_v45 = vadd.f32 %v5183_v47, %v1533_v39  ;;  %v5185_v50 = vpop.f32.mrb[42].mxu0  ;;  %v5145_v51 = vpop.f32.mrb[39].mxu1 }
 0x62b   :  { %v5360_v9 = vcombine.low %v5141_v10, %v5143_v46  ;;  %v5186_v52 = vpop.f32.mrb[43].mxu0 }
 0x62c   :  { %v5361_v18 = vcombine.low %v5182_v44, %v5184_v45 }
 0x62d   :  { %v5368_v43 = vrot.slane %v5360_v9, %v7534_v4 }
 0x62e   :  { %v5375_v19 = vrot.slane %v5361_v18, %v7534_v4 }
 0x630   :  { %v5376_v48 = vcombine.low %v5368_v43, %v5375_v19 }
 0x632   :  { %5394 = vst [vmem:[#allocation17 + $0x40] sm:$0xff] %v5376_v48 }
 0x633   :  { %7275 = shalt.err (!%p7272_p6)
}
 0x634   :  { %s7276_s2 = scalar_lea.hbm %s7661_s9, 1152 }
 0x635   :  { %p7277_p7 = scmp.ne.s32.totalorder %s7661_s9, %s7276_s2  ;;  %p7280_p8 = scmp.lt.u32.totalorder %s7276_s2, %s7661_s9 }
 0x637   :  { %p7282_p9 = pnand %p7280_p8, %p7277_p7 }
 0x639   :  { %7285 = shalt.err (!%p7282_p9)
}
 0x63a   :  { %5404 = dma.vmem_to_hbm [thread:$0]  %s5402_s23, 1152, %s7661_s9, [#allocation4]  }
 0x63b   :  { %7296 = dma.done.wait [#allocation4], 1152  }
 0x63c   :  { %7297 = vsyncadd [#allocation4], 4294966144 }
 0x63d   :  { %5408 = vsyncpa [#allocation3], 1 }
 0x63e   :  { %5409 = vsyncpa [#allocation6], 1 }
 0x63f   :  { %5410 = vsyncpa [#allocation9], 1 }
 0x640   :  { %5411 = vsyncpa [#allocation12], 1 }
 0x641   :  { %5412 = vsyncpa [#allocation15], 1 }
 0x642   :  { %5413 = vsyncpa [#allocation4], 1 }

</bundles_post_ra>
